<compile_context>
chip_gen: v6e
topology: v6e:2x2x1
jax: 0.10.0
libtpu: 0.0.40
codegen_flags: <defaults>
</compile_context>

<pallas_src>
import jax
import jax.numpy as jnp
from jax.experimental import pallas as pl
from jax.experimental.pallas import tpu as pltpu

# -----------------------------------------------------------------------------
# Config (small synthetic shapes consistent with the module's constructor)
# -----------------------------------------------------------------------------
B = 2
N_POINTS = 64
N_FEATS = 3
SEG_CLASS_NUM = 6
CLS_CLASS_NUM = 4

POINTNET_PLUS_SEG_DICT = dict(
    n_samples_list=[32, 16, 8, 4],
    radius_list=[0.2, 0.4, 0.6, 0.8],
    n_points_per_group_list=[8, 8, 8, 8],
    sa_mlp_out_channels_list=[[16, 16, 32], [32, 32, 64], [64, 64, 128], [128, 128, 256]],
    fp_mlp_out_channels_list=[[256, 128], [128, 64], [64, 64], [64, 32]],
)

BN_EPS = 1e-5
LANE = 128


def _round_up(x, m=LANE):
    return ((x + m - 1) // m) * m


def _pad2d(a, rows, cols, dtype):
    a = a.astype(dtype)
    pr, pc = rows - a.shape[0], cols - a.shape[1]
    if pr or pc:
        a = jnp.pad(a, ((0, pr), (0, pc)))
    return a


# -----------------------------------------------------------------------------
# Pallas kernels
# -----------------------------------------------------------------------------
def _make_pointwise_mlp_kernel(n_layers, n_relu):
    """Stack of 1x1 conv (bf16 matmul, f32 acc) + folded-BN bias; ReLU on the
    first `n_relu` layers (the fused seg-head layer has no ReLU and a per-row
    bias)."""

    def kernel(*refs):
        out_ref = refs[1 + 2 * n_layers]
        h = refs[0][...]                       # bf16 (M, Cin_p)
        for l in range(n_layers):
            w = refs[1 + 2 * l][...]           # bf16 (Ci_p, Co_p)
            b = refs[2 + 2 * l][...]           # f32  (1 or M, Co_p)
            h = jnp.dot(h, w, preferred_element_type=jnp.float32) + b
            if l < n_relu:
                h = jnp.maximum(h, 0.0)
            if l < n_layers - 1:
                h = h.astype(jnp.bfloat16)
        out_ref[...] = h.astype(out_ref.dtype)

    return kernel


def _make_group_mlp_max_kernel(n_layers, rows, group_size, fuse_last):
    """Per-group-point MLP followed by max-pool over the group dimension.

    Input block is (G*rows, Cin_p) laid out G-major.  When `fuse_last`, the
    final layer is done per group slab and max-accumulated into an f32
    (rows, Cout_p) accumulator (bias + ReLU applied once after the max, which
    is exact since both commute with max)."""

    def kernel(*refs):
        out_ref = refs[1 + 2 * n_layers]
        h = refs[0][...]                       # bf16 (G*rows, Cin_p)
        n_pre = n_layers - 1 if fuse_last else n_layers
        for l in range(n_pre):
            w = refs[1 + 2 * l][...]
            b = refs[2 + 2 * l][...]
            h = jnp.maximum(jnp.dot(h, w, preferred_element_type=jnp.float32) + b, 0.0)
            if l < n_layers - 1:
                h = h.astype(jnp.bfloat16)
        if fuse_last:
            wl = refs[1 + 2 * (n_layers - 1)][...]
            bl = refs[2 + 2 * (n_layers - 1)][...]
            acc = jnp.dot(h[0:rows, :], wl, preferred_element_type=jnp.float32)
            for g in range(1, group_size):
                acc = jnp.maximum(
                    acc, jnp.dot(h[g * rows:(g + 1) * rows, :], wl,
                                 preferred_element_type=jnp.float32))
            acc = jnp.maximum(acc + bl, 0.0)
        else:
            acc = h[0:rows, :]                 # f32 result of the last layer
            for g in range(1, group_size):
                acc = jnp.maximum(acc, h[g * rows:(g + 1) * rows, :])
        out_ref[...] = acc.astype(out_ref.dtype)

    return kernel


# -----------------------------------------------------------------------------
# Pallas wrappers (single block, grid=(1,), "arbitrary")
# -----------------------------------------------------------------------------
def _mlp_call(kernel, x_p, layers, out_shape):
    in_specs = [pl.BlockSpec(x_p.shape, lambda i: (0, 0))]
    inputs = [x_p]
    flops = 0
    bytes_accessed = x_p.size * x_p.dtype.itemsize
    for (w, b) in layers:
        in_specs.append(pl.BlockSpec(w.shape, lambda i: (0, 0)))
        in_specs.append(pl.BlockSpec(b.shape, lambda i: (0, 0)))
        inputs += [w, b]
        flops += 2 * x_p.shape[0] * w.shape[0] * w.shape[1]
        bytes_accessed += w.size * w.dtype.itemsize + b.size * b.dtype.itemsize
    bytes_accessed += out_shape.shape[0] * out_shape.shape[1] * out_shape.dtype.itemsize

    return pl.pallas_call(
        kernel,
        out_shape=out_shape,
        grid=(1,),
        in_specs=in_specs,
        out_specs=pl.BlockSpec(out_shape.shape, lambda i: (0, 0)),
        compiler_params=pltpu.CompilerParams(dimension_semantics=("arbitrary",)),
        cost_estimate=pl.CostEstimate(flops=int(flops), transcendentals=0,
                                      bytes_accessed=int(bytes_accessed)),
    )(*inputs)


def pallas_pointwise_mlp(x, layers, out_dtype, n_relu):
    """x: (M, Cin) float; layers: prepped (w bf16 (Ci_p,Co_p), b f32 (1|M, Co_p)).
    Returns (M, Co_p_last) out_dtype (padded cols are zero)."""
    M = x.shape[0]
    cin_p = layers[0][0].shape[0]
    cout_p = layers[-1][0].shape[1]
    x_p = _pad2d(x, M, cin_p, jnp.bfloat16)
    out_shape = jax.ShapeDtypeStruct((M, cout_p), out_dtype)
    return _mlp_call(_make_pointwise_mlp_kernel(len(layers), n_relu), x_p, layers, out_shape)


def pallas_group_mlp_max(x, layers):
    """x: (M, G, Cin) float; returns (M, Co_p_last) after max over G."""
    M, G, cin = x.shape
    cin_p = layers[0][0].shape[0]
    cout_p = layers[-1][0].shape[1]
    # Flatten the group axis into rows, G-major, so per-group slabs are
    # contiguous, sublane-aligned row blocks.
    x_flat = jnp.transpose(x, (1, 0, 2)).reshape(G * M, cin)
    x_p = _pad2d(x_flat, G * M, cin_p, jnp.bfloat16)
    fuse_last = (M % 16 == 0)                       # bf16 slab-slice alignment
    out_dtype = jnp.bfloat16 if M % 16 == 0 else jnp.float32
    out_shape = jax.ShapeDtypeStruct((M, cout_p), out_dtype)
    return _mlp_call(_make_group_mlp_max_kernel(len(layers), M, G, fuse_last),
                     x_p, layers, out_shape)


# -----------------------------------------------------------------------------
# Plain-JAX glue: sampling, grouping, kNN interpolation
# -----------------------------------------------------------------------------
def index_points(points, idx):
    """points (B,N,C), idx (B, ...) int -> (B, ..., C)."""
    return jax.vmap(lambda p, i: p[i])(points, idx)


def square_distance(a, b):
    return (
        jnp.sum(a * a, -1)[:, :, None]
        + jnp.sum(b * b, -1)[:, None, :]
        - 2.0 * jnp.einsum("bmc,bnc->bmn", a, b)
    )


def farthest_point_sample(xyz, npoint):
    """Deterministic FPS (initial point fixed to index 0 instead of torch.randint)."""
    b, n, _ = xyz.shape

    def body(i, state):
        centroids, distance, farthest = state
        centroids = centroids.at[:, i].set(farthest)
        centroid = index_points(xyz, farthest[:, None])  # (B,1,3)
        dist = jnp.sum((xyz - centroid) ** 2, axis=-1)
        distance = jnp.minimum(distance, dist)
        farthest = jnp.argmax(distance, axis=-1).astype(jnp.int32)
        return centroids, distance, farthest

    init = (
        jnp.zeros((b, npoint), jnp.int32),
        jnp.full((b, n), 1e10, jnp.float32),
        jnp.zeros((b,), jnp.int32),
    )
    centroids, _, _ = jax.lax.fori_loop(0, npoint, body, init)
    return centroids


def query_ball_point(radius, nsample, xyz, new_xyz):
    b, n, _ = xyz.shape
    s = new_xyz.shape[1]
    sqrdists = square_distance(new_xyz, xyz)  # (B,S,N)
    group_idx = jnp.broadcast_to(jnp.arange(n, dtype=jnp.int32), (b, s, n))
    group_idx = jnp.where(sqrdists > radius * radius, n, group_idx)
    group_idx = jnp.sort(group_idx, axis=-1)[:, :, :nsample]
    group_first = jnp.broadcast_to(group_idx[:, :, :1], group_idx.shape)
    group_idx = jnp.where(group_idx == n, group_first, group_idx)
    return group_idx


def set_abstraction(xyz, feats, layers, n_samples, radius, nsample):
    b = xyz.shape[0]
    fps_idx = farthest_point_sample(xyz, n_samples)
    new_xyz = index_points(xyz, fps_idx)                       # (B,S,3)
    idx = query_ball_point(radius, nsample, xyz, new_xyz)      # (B,S,G)
    grouped_xyz = (index_points(xyz, idx) - new_xyz[:, :, None, :]).astype(jnp.bfloat16)
    grouped_feats = index_points(feats, idx).astype(jnp.bfloat16)   # padded width for sa2..4
    grouped = jnp.concatenate([grouped_xyz, grouped_feats], axis=-1)
    cin = grouped.shape[-1]
    out = pallas_group_mlp_max(grouped.reshape(b * n_samples, nsample, cin), layers)
    return new_xyz, out.reshape(b, n_samples, -1)


def feature_propagation(xyz_sparse, feats_sparse, xyz_dense, feats_dense, layers,
                        n_relu=None, out_dtype=jnp.bfloat16, k=3):
    b, n2, _ = xyz_dense.shape
    dists = square_distance(xyz_dense, xyz_sparse)             # (B,N2,N1)
    neg_vals, idx = jax.lax.top_k(-dists, k)                   # k nearest
    d = jnp.maximum(-neg_vals, 0.0)                            # clamp cancellation negatives
    w = 1.0 / (d + 1e-8)
    w = w / jnp.sum(w, axis=-1, keepdims=True)
    gathered = index_points(feats_sparse, idx).astype(jnp.float32)   # (B,N2,k,C1p)
    interp = jnp.sum(gathered * w[..., None], axis=2)                # (B,N2,C1p) f32
    new = jnp.concatenate([interp.astype(jnp.bfloat16),
                           feats_dense.astype(jnp.bfloat16)], axis=-1)
    if n_relu is None:
        n_relu = len(layers)
    out = pallas_pointwise_mlp(new.reshape(b * n2, new.shape[-1]), layers, out_dtype, n_relu)
    return out.reshape(b, n2, -1)


# -----------------------------------------------------------------------------
# Parameter init (conv + eval-mode BN folded) and Pallas-layout prep.
# Invariant: padded weight cols AND padded bias entries are zero, so padded
# output columns are exactly zero and can be concatenated straight into the
# next stage ("sticky padding").
# -----------------------------------------------------------------------------
def _init_conv_bn(key, cin, cout, scale=0.1):
    k = jax.random.split(key, 6)
    w = jax.random.normal(k[0], (cin, cout), jnp.float32) * scale
    b = jax.random.normal(k[1], (cout,), jnp.float32) * scale
    gamma = 1.0 + 0.1 * jax.random.normal(k[2], (cout,), jnp.float32)
    beta = 0.1 * jax.random.normal(k[3], (cout,), jnp.float32)
    mean = 0.1 * jax.random.normal(k[4], (cout,), jnp.float32)
    var = 1.0 + 0.1 * jnp.abs(jax.random.normal(k[5], (cout,), jnp.float32))
    s = gamma / jnp.sqrt(var + BN_EPS)
    w_f = w * s[None, :]
    b_f = (b - mean) * s + beta
    return w_f, b_f.reshape(1, cout)


def _init_mlp(key, cin, out_channels):
    keys = jax.random.split(key, len(out_channels))
    params = []
    c = cin
    for kk, co in zip(keys, out_channels):
        params.append(_init_conv_bn(kk, c, co))
        c = co
    return params


def _seg_pad_rows(w, segments):
    """Re-layout weight rows to match a concatenation of padded segments."""
    parts, r = [], 0
    for real, padded in segments:
        parts.append(w[r:r + real])
        if padded > real:
            parts.append(jnp.zeros((padded - real, w.shape[1]), w.dtype))
        r += real
    return jnp.concatenate(parts, axis=0)


def _prep_mlp(raw_params, in_segments):
    """Pad/cast an MLP for the kernels: first-layer rows segment-padded to the
    sticky input layout; all row/col dims rounded to 128; weights bf16, biases f32."""
    out = []
    for l, (w, b) in enumerate(raw_params):
        co_p = _round_up(w.shape[1])
        if l == 0:
            w = _seg_pad_rows(w, in_segments)
        out.append((_pad2d(w, _round_up(w.shape[0]), co_p, jnp.bfloat16),
                    _pad2d(b, 1, co_p, jnp.float32)))
    return out


def init_params(key):
    cfg = POINTNET_PLUS_SEG_DICT
    sa_cfg = cfg["sa_mlp_out_channels_list"]
    fp_cfg = cfg["fp_mlp_out_channels_list"]
    sa_outs = [c[-1] for c in sa_cfg]
    keys = jax.random.split(key, 9)
    params = {}

    # SA stages: input = concat([rel-xyz(3), prev feats (sticky-padded)]).
    c_in = 3 + N_FEATS
    prev_real = None
    for i in range(4):
        segs = [(c_in, c_in)] if i == 0 else [(3, 3), (prev_real, _round_up(prev_real))]
        raw = _init_mlp(keys[i], c_in, sa_cfg[i])
        params[f"sa{i + 1}"] = _prep_mlp(raw, segs)
        prev_real = sa_cfg[i][-1]
        c_in = 3 + prev_real

    # FP stages: input = concat([interp(sparse feats, sticky), dense feats (sticky)]).
    fp_in_segments = [
        [(sa_outs[3], _round_up(sa_outs[3])), (sa_outs[2], _round_up(sa_outs[2]))],
        [(fp_cfg[0][-1], _round_up(fp_cfg[0][-1])), (sa_outs[1], _round_up(sa_outs[1]))],
        [(fp_cfg[1][-1], _round_up(fp_cfg[1][-1])), (sa_outs[0], _round_up(sa_outs[0]))],
        [(fp_cfg[2][-1], _round_up(fp_cfg[2][-1])), (N_FEATS, N_FEATS)],
    ]
    for i in range(4):
        cin_real = sum(s[0] for s in fp_in_segments[i])
        raw = _init_mlp(keys[4 + i], cin_real, fp_cfg[i])
        params[f"fp{i + 1}"] = _prep_mlp(raw, fp_in_segments[i])

    # Seg head Conv1d(fp4_out + cls, seg, 1): feature part fused into the fp4
    # kernel; class part + bias folded into a per-row bias in forward().
    head_in = fp_cfg[3][-1] + CLS_CLASS_NUM
    kw, kb = jax.random.split(keys[8])
    w_head = jax.random.normal(kw, (head_in, SEG_CLASS_NUM), jnp.float32) * 0.1
    b_head = jax.random.normal(kb, (SEG_CLASS_NUM,), jnp.float32) * 0.1
    params["head_w"] = _pad2d(w_head[:fp_cfg[3][-1]], _round_up(fp_cfg[3][-1]),
                              LANE, jnp.bfloat16)
    params["head_w_cls"] = w_head[fp_cfg[3][-1]:]              # (cls, seg) f32
    params["head_b"] = b_head.reshape(1, SEG_CLASS_NUM)        # (1, seg) f32
    return params


# -----------------------------------------------------------------------------
# Forward pass (matches PointNetPlusPartseg.forward)
# -----------------------------------------------------------------------------
def forward(x, cls_label, params):
    cfg = POINTNET_PLUS_SEG_DICT
    b = x.shape[0]
    n = x.shape[2]

    xyz = jnp.transpose(x[:, :3, :], (0, 2, 1))     # (B,N,3)
    feats = jnp.transpose(x[:, 3:, :], (0, 2, 1))   # (B,N,n_feats)

    sa1_xyz, sa1_f = set_abstraction(xyz, feats, params["sa1"],
                                     cfg["n_samples_list"][0], cfg["radius_list"][0],
                                     cfg["n_points_per_group_list"][0])
    sa2_xyz, sa2_f = set_abstraction(sa1_xyz, sa1_f, params["sa2"],
                                     cfg["n_samples_list"][1], cfg["radius_list"][1],
                                     cfg["n_points_per_group_list"][1])
    sa3_xyz, sa3_f = set_abstraction(sa2_xyz, sa2_f, params["sa3"],
                                     cfg["n_samples_list"][2], cfg["radius_list"][2],
                                     cfg["n_points_per_group_list"][2])
    sa4_xyz, sa4_f = set_abstraction(sa3_xyz, sa3_f, params["sa4"],
                                     cfg["n_samples_list"][3], cfg["radius_list"][3],
                                     cfg["n_points_per_group_list"][3])

    f1 = feature_propagation(sa4_xyz, sa4_f, sa3_xyz, sa3_f, params["fp1"], k=3)
    f2 = feature_propagation(sa3_xyz, f1, sa2_xyz, sa2_f, params["fp2"], k=3)
    f3 = feature_propagation(sa2_xyz, f2, sa1_xyz, sa1_f, params["fp3"], k=3)

    # fp4 with the seg head fused in as one extra (no-ReLU) layer.  The class
    # one-hot contribution is a per-row bias: one_hot @ W_cls + b, broadcast
    # over the points of each batch element.
    one_hot = jax.nn.one_hot(cls_label, CLS_CLASS_NUM, dtype=jnp.float32)   # (B,cls)
    rowbias = one_hot @ params["head_w_cls"] + params["head_b"]             # (B,seg)
    rowbias = jnp.broadcast_to(rowbias[:, None, :], (b, n, SEG_CLASS_NUM))
    rowbias = rowbias.reshape(b * n, SEG_CLASS_NUM)
    rowbias = jnp.pad(rowbias, ((0, 0), (0, LANE - SEG_CLASS_NUM)))         # (B*N,128) f32

    head_layers = params["fp4"] + [(params["head_w"], rowbias)]
    f4_seg = feature_propagation(sa1_xyz, f3, xyz, feats, head_layers,
                                 n_relu=len(params["fp4"]), out_dtype=jnp.float32, k=3)
    seg_outs = jnp.transpose(f4_seg[..., :SEG_CLASS_NUM], (0, 2, 1))        # (B,seg,N)
    return seg_outs, None


# -----------------------------------------------------------------------------
if __name__ == "__main__":
    key = jax.random.PRNGKey(0)
    kx, kl, kp = jax.random.split(key, 3)

    x = jax.random.uniform(kx, (B, 3 + N_FEATS, N_POINTS), dtype=jnp.float32)
    cls_label = jax.random.randint(kl, (B,), 0, CLS_CLASS_NUM)
    params = init_params(kp)

    # TODO(synk): farthest-point-sampling / ball-query / kNN gathers are kept in
    # plain JAX (data-dependent gathers with no clean Pallas tile expression);
    # BN is eval-mode with deterministic running stats folded into conv weights.
    fwd = jax.jit(forward)
    seg_outs, _ = fwd(x, cls_label, params)
    seg_outs = jax.block_until_ready(seg_outs)

    assert seg_outs.shape == (B, SEG_CLASS_NUM, N_POINTS)
    assert bool(jnp.all(jnp.isfinite(seg_outs)))
    print("KERNEL_OK")
</pallas_src>

<mosaic_0001>
module attributes {stable_mosaic.version = 11 : i64} {
  func.func @kernel(%arg0: i32, %arg1: memref<512x128xbf16, #tpu.memory_space<vmem>>, %arg2: memref<128x128xbf16, #tpu.memory_space<vmem>>, %arg3: memref<1x128xf32, #tpu.memory_space<vmem>>, %arg4: memref<128x128xbf16, #tpu.memory_space<vmem>>, %arg5: memref<1x128xf32, #tpu.memory_space<vmem>>, %arg6: memref<128x128xbf16, #tpu.memory_space<vmem>>, %arg7: memref<1x128xf32, #tpu.memory_space<vmem>>, %arg8: memref<64x128xbf16, #tpu.memory_space<vmem>>) attributes {dimension_semantics = [#tpu.dimension_semantics<arbitrary>], iteration_bounds = array<i64: 1>, scalar_prefetch = 0 : i64, scratch_operands = 0 : i64, tpu.core_type = #tpu.core_type<tc>, window_params = [{pipeline_mode = #tpu.pipeline_mode<synchronous>, transform_indices = @transform_0, window_bounds = array<i64: 512, 128>}, {pipeline_mode = #tpu.pipeline_mode<synchronous>, transform_indices = @transform_1, window_bounds = array<i64: 128, 128>}, {pipeline_mode = #tpu.pipeline_mode<synchronous>, transform_indices = @transform_2, window_bounds = array<i64: 1, 128>}, {pipeline_mode = #tpu.pipeline_mode<synchronous>, transform_indices = @transform_3, window_bounds = array<i64: 128, 128>}, {pipeline_mode = #tpu.pipeline_mode<synchronous>, transform_indices = @transform_4, window_bounds = array<i64: 1, 128>}, {pipeline_mode = #tpu.pipeline_mode<synchronous>, transform_indices = @transform_5, window_bounds = array<i64: 128, 128>}, {pipeline_mode = #tpu.pipeline_mode<synchronous>, transform_indices = @transform_6, window_bounds = array<i64: 1, 128>}, {pipeline_mode = #tpu.pipeline_mode<synchronous>, transform_indices = @transform_7, window_bounds = array<i64: 64, 128>}]} {
    %c0 = arith.constant 0 : index
    %c0_0 = arith.constant 0 : index
    %0 = vector.load %arg1[%c0, %c0_0] : memref<512x128xbf16, #tpu.memory_space<vmem>>, vector<512x128xbf16>
    %c0_1 = arith.constant 0 : index
    %c0_2 = arith.constant 0 : index
    %1 = vector.load %arg2[%c0_1, %c0_2] : memref<128x128xbf16, #tpu.memory_space<vmem>>, vector<128x128xbf16>
    %c0_3 = arith.constant 0 : index
    %c0_4 = arith.constant 0 : index
    %2 = vector.load %arg3[%c0_3, %c0_4] : memref<1x128xf32, #tpu.memory_space<vmem>>, vector<1x128xf32>
    %cst = arith.constant dense<0.000000e+00> : vector<512x128xf32>
    %3 = tpu.matmul %0, %1, %cst {dimension_numbers = #tpu.dot_dimension_numbers<[1], [0], [0], [1], [0, 0, 1, 1], [], []>} : vector<512x128xbf16>, vector<128x128xbf16>, vector<512x128xf32> -> vector<512x128xf32>
    %4 = vector.broadcast %2 : vector<1x128xf32> to vector<512x128xf32>
    %5 = arith.addf %3, %4 : vector<512x128xf32>
    %cst_5 = arith.constant 0.000000e+00 : f32
    %6 = vector.broadcast %cst_5 : f32 to vector<512x128xf32>
    %7 = arith.maximumf %5, %6 : vector<512x128xf32>
    %8 = arith.truncf %7 : vector<512x128xf32> to vector<512x128xbf16>
    %c0_6 = arith.constant 0 : index
    %c0_7 = arith.constant 0 : index
    %9 = vector.load %arg4[%c0_6, %c0_7] : memref<128x128xbf16, #tpu.memory_space<vmem>>, vector<128x128xbf16>
    %c0_8 = arith.constant 0 : index
    %c0_9 = arith.constant 0 : index
    %10 = vector.load %arg5[%c0_8, %c0_9] : memref<1x128xf32, #tpu.memory_space<vmem>>, vector<1x128xf32>
    %cst_10 = arith.constant dense<0.000000e+00> : vector<512x128xf32>
    %11 = tpu.matmul %8, %9, %cst_10 {dimension_numbers = #tpu.dot_dimension_numbers<[1], [0], [0], [1], [0, 0, 1, 1], [], []>} : vector<512x128xbf16>, vector<128x128xbf16>, vector<512x128xf32> -> vector<512x128xf32>
    %12 = vector.broadcast %10 : vector<1x128xf32> to vector<512x128xf32>
    %13 = arith.addf %11, %12 : vector<512x128xf32>
    %cst_11 = arith.constant 0.000000e+00 : f32
    %14 = vector.broadcast %cst_11 : f32 to vector<512x128xf32>
    %15 = arith.maximumf %13, %14 : vector<512x128xf32>
    %16 = arith.truncf %15 : vector<512x128xf32> to vector<512x128xbf16>
    %c0_12 = arith.constant 0 : index
    %c0_13 = arith.constant 0 : index
    %17 = vector.load %arg6[%c0_12, %c0_13] : memref<128x128xbf16, #tpu.memory_space<vmem>>, vector<128x128xbf16>
    %c0_14 = arith.constant 0 : index
    %c0_15 = arith.constant 0 : index
    %18 = vector.load %arg7[%c0_14, %c0_15] : memref<1x128xf32, #tpu.memory_space<vmem>>, vector<1x128xf32>
    %19 = vector.extract_strided_slice %16 {offsets = [0, 0], sizes = [64, 128], strides = [1, 1]} : vector<512x128xbf16> to vector<64x128xbf16>
    %cst_16 = arith.constant dense<0.000000e+00> : vector<64x128xf32>
    %20 = tpu.matmul %19, %17, %cst_16 {dimension_numbers = #tpu.dot_dimension_numbers<[1], [0], [0], [1], [0, 0, 1, 1], [], []>} : vector<64x128xbf16>, vector<128x128xbf16>, vector<64x128xf32> -> vector<64x128xf32>
    %21 = vector.extract_strided_slice %16 {offsets = [64, 0], sizes = [64, 128], strides = [1, 1]} : vector<512x128xbf16> to vector<64x128xbf16>
    %cst_17 = arith.constant dense<0.000000e+00> : vector<64x128xf32>
    %22 = tpu.matmul %21, %17, %cst_17 {dimension_numbers = #tpu.dot_dimension_numbers<[1], [0], [0], [1], [0, 0, 1, 1], [], []>} : vector<64x128xbf16>, vector<128x128xbf16>, vector<64x128xf32> -> vector<64x128xf32>
    %23 = arith.maximumf %20, %22 : vector<64x128xf32>
    %24 = vector.extract_strided_slice %16 {offsets = [128, 0], sizes = [64, 128], strides = [1, 1]} : vector<512x128xbf16> to vector<64x128xbf16>
    %cst_18 = arith.constant dense<0.000000e+00> : vector<64x128xf32>
    %25 = tpu.matmul %24, %17, %cst_18 {dimension_numbers = #tpu.dot_dimension_numbers<[1], [0], [0], [1], [0, 0, 1, 1], [], []>} : vector<64x128xbf16>, vector<128x128xbf16>, vector<64x128xf32> -> vector<64x128xf32>
    %26 = arith.maximumf %23, %25 : vector<64x128xf32>
    %27 = vector.extract_strided_slice %16 {offsets = [192, 0], sizes = [64, 128], strides = [1, 1]} : vector<512x128xbf16> to vector<64x128xbf16>
    %cst_19 = arith.constant dense<0.000000e+00> : vector<64x128xf32>
    %28 = tpu.matmul %27, %17, %cst_19 {dimension_numbers = #tpu.dot_dimension_numbers<[1], [0], [0], [1], [0, 0, 1, 1], [], []>} : vector<64x128xbf16>, vector<128x128xbf16>, vector<64x128xf32> -> vector<64x128xf32>
    %29 = arith.maximumf %26, %28 : vector<64x128xf32>
    %30 = vector.extract_strided_slice %16 {offsets = [256, 0], sizes = [64, 128], strides = [1, 1]} : vector<512x128xbf16> to vector<64x128xbf16>
    %cst_20 = arith.constant dense<0.000000e+00> : vector<64x128xf32>
    %31 = tpu.matmul %30, %17, %cst_20 {dimension_numbers = #tpu.dot_dimension_numbers<[1], [0], [0], [1], [0, 0, 1, 1], [], []>} : vector<64x128xbf16>, vector<128x128xbf16>, vector<64x128xf32> -> vector<64x128xf32>
    %32 = arith.maximumf %29, %31 : vector<64x128xf32>
    %33 = vector.extract_strided_slice %16 {offsets = [320, 0], sizes = [64, 128], strides = [1, 1]} : vector<512x128xbf16> to vector<64x128xbf16>
    %cst_21 = arith.constant dense<0.000000e+00> : vector<64x128xf32>
    %34 = tpu.matmul %33, %17, %cst_21 {dimension_numbers = #tpu.dot_dimension_numbers<[1], [0], [0], [1], [0, 0, 1, 1], [], []>} : vector<64x128xbf16>, vector<128x128xbf16>, vector<64x128xf32> -> vector<64x128xf32>
    %35 = arith.maximumf %32, %34 : vector<64x128xf32>
    %36 = vector.extract_strided_slice %16 {offsets = [384, 0], sizes = [64, 128], strides = [1, 1]} : vector<512x128xbf16> to vector<64x128xbf16>
    %cst_22 = arith.constant dense<0.000000e+00> : vector<64x128xf32>
    %37 = tpu.matmul %36, %17, %cst_22 {dimension_numbers = #tpu.dot_dimension_numbers<[1], [0], [0], [1], [0, 0, 1, 1], [], []>} : vector<64x128xbf16>, vector<128x128xbf16>, vector<64x128xf32> -> vector<64x128xf32>
    %38 = arith.maximumf %35, %37 : vector<64x128xf32>
    %39 = vector.extract_strided_slice %16 {offsets = [448, 0], sizes = [64, 128], strides = [1, 1]} : vector<512x128xbf16> to vector<64x128xbf16>
    %cst_23 = arith.constant dense<0.000000e+00> : vector<64x128xf32>
    %40 = tpu.matmul %39, %17, %cst_23 {dimension_numbers = #tpu.dot_dimension_numbers<[1], [0], [0], [1], [0, 0, 1, 1], [], []>} : vector<64x128xbf16>, vector<128x128xbf16>, vector<64x128xf32> -> vector<64x128xf32>
    %41 = arith.maximumf %38, %40 : vector<64x128xf32>
    %42 = vector.broadcast %18 : vector<1x128xf32> to vector<64x128xf32>
    %43 = arith.addf %41, %42 : vector<64x128xf32>
    %cst_24 = arith.constant 0.000000e+00 : f32
    %44 = vector.broadcast %cst_24 : f32 to vector<64x128xf32>
    %45 = arith.maximumf %43, %44 : vector<64x128xf32>
    %46 = arith.truncf %45 : vector<64x128xf32> to vector<64x128xbf16>
    %c0_25 = arith.constant 0 : index
    %c0_26 = arith.constant 0 : index
    %47 = vector.load %arg8[%c0_25, %c0_26] : memref<64x128xbf16, #tpu.memory_space<vmem>>, vector<64x128xbf16>
    tpu.vector_store %arg8[%c0_25, %c0_26], %46 {strides = array<i32>} : memref<64x128xbf16, #tpu.memory_space<vmem>>, vector<64x128xbf16>,
    return
  }
  func.func @transform_0(%arg0: i32) -> (i32, i32) {
    %c0_i32 = arith.constant 0 : i32
    %c0_i32_0 = arith.constant 0 : i32
    %c0_i32_1 = arith.constant 0 : i32
    return %c0_i32, %c0_i32_0 : i32, i32
  }
  func.func @transform_1(%arg0: i32) -> (i32, i32) {
    %c0_i32 = arith.constant 0 : i32
    %c0_i32_0 = arith.constant 0 : i32
    %c0_i32_1 = arith.constant 0 : i32
    return %c0_i32, %c0_i32_0 : i32, i32
  }
  func.func @transform_2(%arg0: i32) -> (i32, i32) {
    %c0_i32 = arith.constant 0 : i32
    %c0_i32_0 = arith.constant 0 : i32
    %c0_i32_1 = arith.constant 0 : i32
    return %c0_i32, %c0_i32_0 : i32, i32
  }
  func.func @transform_3(%arg0: i32) -> (i32, i32) {
    %c0_i32 = arith.constant 0 : i32
    %c0_i32_0 = arith.constant 0 : i32
    %c0_i32_1 = arith.constant 0 : i32
    return %c0_i32, %c0_i32_0 : i32, i32
  }
  func.func @transform_4(%arg0: i32) -> (i32, i32) {
    %c0_i32 = arith.constant 0 : i32
    %c0_i32_0 = arith.constant 0 : i32
    %c0_i32_1 = arith.constant 0 : i32
    return %c0_i32, %c0_i32_0 : i32, i32
  }
  func.func @transform_5(%arg0: i32) -> (i32, i32) {
    %c0_i32 = arith.constant 0 : i32
    %c0_i32_0 = arith.constant 0 : i32
    %c0_i32_1 = arith.constant 0 : i32
    return %c0_i32, %c0_i32_0 : i32, i32
  }
  func.func @transform_6(%arg0: i32) -> (i32, i32) {
    %c0_i32 = arith.constant 0 : i32
    %c0_i32_0 = arith.constant 0 : i32
    %c0_i32_1 = arith.constant 0 : i32
    return %c0_i32, %c0_i32_0 : i32, i32
  }
  func.func @transform_7(%arg0: i32) -> (i32, i32) {
    %c0_i32 = arith.constant 0 : i32
    %c0_i32_0 = arith.constant 0 : i32
    %c0_i32_1 = arith.constant 0 : i32
    return %c0_i32, %c0_i32_0 : i32, i32
  }
}

module attributes {stable_mosaic.version = 11 : i64} {
  func.func @kernel(%arg0: i32, %arg1: memref<256x256xbf16, #tpu.memory_space<vmem>>, %arg2: memref<256x128xbf16, #tpu.memory_space<vmem>>, %arg3: memref<1x128xf32, #tpu.memory_space<vmem>>, %arg4: memref<128x128xbf16, #tpu.memory_space<vmem>>, %arg5: memref<1x128xf32, #tpu.memory_space<vmem>>, %arg6: memref<128x128xbf16, #tpu.memory_space<vmem>>, %arg7: memref<1x128xf32, #tpu.memory_space<vmem>>, %arg8: memref<32x128xbf16, #tpu.memory_space<vmem>>) attributes {dimension_semantics = [#tpu.dimension_semantics<arbitrary>], iteration_bounds = array<i64: 1>, scalar_prefetch = 0 : i64, scratch_operands = 0 : i64, tpu.core_type = #tpu.core_type<tc>, window_params = [{pipeline_mode = #tpu.pipeline_mode<synchronous>, transform_indices = @transform_0, window_bounds = array<i64: 256, 256>}, {pipeline_mode = #tpu.pipeline_mode<synchronous>, transform_indices = @transform_1, window_bounds = array<i64: 256, 128>}, {pipeline_mode = #tpu.pipeline_mode<synchronous>, transform_indices = @transform_2, window_bounds = array<i64: 1, 128>}, {pipeline_mode = #tpu.pipeline_mode<synchronous>, transform_indices = @transform_3, window_bounds = array<i64: 128, 128>}, {pipeline_mode = #tpu.pipeline_mode<synchronous>, transform_indices = @transform_4, window_bounds = array<i64: 1, 128>}, {pipeline_mode = #tpu.pipeline_mode<synchronous>, transform_indices = @transform_5, window_bounds = array<i64: 128, 128>}, {pipeline_mode = #tpu.pipeline_mode<synchronous>, transform_indices = @transform_6, window_bounds = array<i64: 1, 128>}, {pipeline_mode = #tpu.pipeline_mode<synchronous>, transform_indices = @transform_7, window_bounds = array<i64: 32, 128>}]} {
    %c0 = arith.constant 0 : index
    %c0_0 = arith.constant 0 : index
    %0 = vector.load %arg1[%c0, %c0_0] : memref<256x256xbf16, #tpu.memory_space<vmem>>, vector<256x256xbf16>
    %c0_1 = arith.constant 0 : index
    %c0_2 = arith.constant 0 : index
    %1 = vector.load %arg2[%c0_1, %c0_2] : memref<256x128xbf16, #tpu.memory_space<vmem>>, vector<256x128xbf16>
    %c0_3 = arith.constant 0 : index
    %c0_4 = arith.constant 0 : index
    %2 = vector.load %arg3[%c0_3, %c0_4] : memref<1x128xf32, #tpu.memory_space<vmem>>, vector<1x128xf32>
    %cst = arith.constant dense<0.000000e+00> : vector<256x128xf32>
    %3 = tpu.matmul %0, %1, %cst {dimension_numbers = #tpu.dot_dimension_numbers<[1], [0], [0], [1], [0, 0, 1, 1], [], []>} : vector<256x256xbf16>, vector<256x128xbf16>, vector<256x128xf32> -> vector<256x128xf32>
    %4 = vector.broadcast %2 : vector<1x128xf32> to vector<256x128xf32>
    %5 = arith.addf %3, %4 : vector<256x128xf32>
    %cst_5 = arith.constant 0.000000e+00 : f32
    %6 = vector.broadcast %cst_5 : f32 to vector<256x128xf32>
    %7 = arith.maximumf %5, %6 : vector<256x128xf32>
    %8 = arith.truncf %7 : vector<256x128xf32> to vector<256x128xbf16>
    %c0_6 = arith.constant 0 : index
    %c0_7 = arith.constant 0 : index
    %9 = vector.load %arg4[%c0_6, %c0_7] : memref<128x128xbf16, #tpu.memory_space<vmem>>, vector<128x128xbf16>
    %c0_8 = arith.constant 0 : index
    %c0_9 = arith.constant 0 : index
    %10 = vector.load %arg5[%c0_8, %c0_9] : memref<1x128xf32, #tpu.memory_space<vmem>>, vector<1x128xf32>
    %cst_10 = arith.constant dense<0.000000e+00> : vector<256x128xf32>
    %11 = tpu.matmul %8, %9, %cst_10 {dimension_numbers = #tpu.dot_dimension_numbers<[1], [0], [0], [1], [0, 0, 1, 1], [], []>} : vector<256x128xbf16>, vector<128x128xbf16>, vector<256x128xf32> -> vector<256x128xf32>
    %12 = vector.broadcast %10 : vector<1x128xf32> to vector<256x128xf32>
    %13 = arith.addf %11, %12 : vector<256x128xf32>
    %cst_11 = arith.constant 0.000000e+00 : f32
    %14 = vector.broadcast %cst_11 : f32 to vector<256x128xf32>
    %15 = arith.maximumf %13, %14 : vector<256x128xf32>
    %16 = arith.truncf %15 : vector<256x128xf32> to vector<256x128xbf16>
    %c0_12 = arith.constant 0 : index
    %c0_13 = arith.constant 0 : index
    %17 = vector.load %arg6[%c0_12, %c0_13] : memref<128x128xbf16, #tpu.memory_space<vmem>>, vector<128x128xbf16>
    %c0_14 = arith.constant 0 : index
    %c0_15 = arith.constant 0 : index
    %18 = vector.load %arg7[%c0_14, %c0_15] : memref<1x128xf32, #tpu.memory_space<vmem>>, vector<1x128xf32>
    %19 = vector.extract_strided_slice %16 {offsets = [0, 0], sizes = [32, 128], strides = [1, 1]} : vector<256x128xbf16> to vector<32x128xbf16>
    %cst_16 = arith.constant dense<0.000000e+00> : vector<32x128xf32>
    %20 = tpu.matmul %19, %17, %cst_16 {dimension_numbers = #tpu.dot_dimension_numbers<[1], [0], [0], [1], [0, 0, 1, 1], [], []>} : vector<32x128xbf16>, vector<128x128xbf16>, vector<32x128xf32> -> vector<32x128xf32>
    %21 = vector.extract_strided_slice %16 {offsets = [32, 0], sizes = [32, 128], strides = [1, 1]} : vector<256x128xbf16> to vector<32x128xbf16>
    %cst_17 = arith.constant dense<0.000000e+00> : vector<32x128xf32>
    %22 = tpu.matmul %21, %17, %cst_17 {dimension_numbers = #tpu.dot_dimension_numbers<[1], [0], [0], [1], [0, 0, 1, 1], [], []>} : vector<32x128xbf16>, vector<128x128xbf16>, vector<32x128xf32> -> vector<32x128xf32>
    %23 = arith.maximumf %20, %22 : vector<32x128xf32>
    %24 = vector.extract_strided_slice %16 {offsets = [64, 0], sizes = [32, 128], strides = [1, 1]} : vector<256x128xbf16> to vector<32x128xbf16>
    %cst_18 = arith.constant dense<0.000000e+00> : vector<32x128xf32>
    %25 = tpu.matmul %24, %17, %cst_18 {dimension_numbers = #tpu.dot_dimension_numbers<[1], [0], [0], [1], [0, 0, 1, 1], [], []>} : vector<32x128xbf16>, vector<128x128xbf16>, vector<32x128xf32> -> vector<32x128xf32>
    %26 = arith.maximumf %23, %25 : vector<32x128xf32>
    %27 = vector.extract_strided_slice %16 {offsets = [96, 0], sizes = [32, 128], strides = [1, 1]} : vector<256x128xbf16> to vector<32x128xbf16>
    %cst_19 = arith.constant dense<0.000000e+00> : vector<32x128xf32>
    %28 = tpu.matmul %27, %17, %cst_19 {dimension_numbers = #tpu.dot_dimension_numbers<[1], [0], [0], [1], [0, 0, 1, 1], [], []>} : vector<32x128xbf16>, vector<128x128xbf16>, vector<32x128xf32> -> vector<32x128xf32>
    %29 = arith.maximumf %26, %28 : vector<32x128xf32>
    %30 = vector.extract_strided_slice %16 {offsets = [128, 0], sizes = [32, 128], strides = [1, 1]} : vector<256x128xbf16> to vector<32x128xbf16>
    %cst_20 = arith.constant dense<0.000000e+00> : vector<32x128xf32>
    %31 = tpu.matmul %30, %17, %cst_20 {dimension_numbers = #tpu.dot_dimension_numbers<[1], [0], [0], [1], [0, 0, 1, 1], [], []>} : vector<32x128xbf16>, vector<128x128xbf16>, vector<32x128xf32> -> vector<32x128xf32>
    %32 = arith.maximumf %29, %31 : vector<32x128xf32>
    %33 = vector.extract_strided_slice %16 {offsets = [160, 0], sizes = [32, 128], strides = [1, 1]} : vector<256x128xbf16> to vector<32x128xbf16>
    %cst_21 = arith.constant dense<0.000000e+00> : vector<32x128xf32>
    %34 = tpu.matmul %33, %17, %cst_21 {dimension_numbers = #tpu.dot_dimension_numbers<[1], [0], [0], [1], [0, 0, 1, 1], [], []>} : vector<32x128xbf16>, vector<128x128xbf16>, vector<32x128xf32> -> vector<32x128xf32>
    %35 = arith.maximumf %32, %34 : vector<32x128xf32>
    %36 = vector.extract_strided_slice %16 {offsets = [192, 0], sizes = [32, 128], strides = [1, 1]} : vector<256x128xbf16> to vector<32x128xbf16>
    %cst_22 = arith.constant dense<0.000000e+00> : vector<32x128xf32>
    %37 = tpu.matmul %36, %17, %cst_22 {dimension_numbers = #tpu.dot_dimension_numbers<[1], [0], [0], [1], [0, 0, 1, 1], [], []>} : vector<32x128xbf16>, vector<128x128xbf16>, vector<32x128xf32> -> vector<32x128xf32>
    %38 = arith.maximumf %35, %37 : vector<32x128xf32>
    %39 = vector.extract_strided_slice %16 {offsets = [224, 0], sizes = [32, 128], strides = [1, 1]} : vector<256x128xbf16> to vector<32x128xbf16>
    %cst_23 = arith.constant dense<0.000000e+00> : vector<32x128xf32>
    %40 = tpu.matmul %39, %17, %cst_23 {dimension_numbers = #tpu.dot_dimension_numbers<[1], [0], [0], [1], [0, 0, 1, 1], [], []>} : vector<32x128xbf16>, vector<128x128xbf16>, vector<32x128xf32> -> vector<32x128xf32>
    %41 = arith.maximumf %38, %40 : vector<32x128xf32>
    %42 = vector.broadcast %18 : vector<1x128xf32> to vector<32x128xf32>
    %43 = arith.addf %41, %42 : vector<32x128xf32>
    %cst_24 = arith.constant 0.000000e+00 : f32
    %44 = vector.broadcast %cst_24 : f32 to vector<32x128xf32>
    %45 = arith.maximumf %43, %44 : vector<32x128xf32>
    %46 = arith.truncf %45 : vector<32x128xf32> to vector<32x128xbf16>
    %c0_25 = arith.constant 0 : index
    %c0_26 = arith.constant 0 : index
    %47 = vector.load %arg8[%c0_25, %c0_26] : memref<32x128xbf16, #tpu.memory_space<vmem>>, vector<32x128xbf16>
    tpu.vector_store %arg8[%c0_25, %c0_26], %46 {strides = array<i32>} : memref<32x128xbf16, #tpu.memory_space<vmem>>, vector<32x128xbf16>,
    return
  }
  func.func @transform_0(%arg0: i32) -> (i32, i32) {
    %c0_i32 = arith.constant 0 : i32
    %c0_i32_0 = arith.constant 0 : i32
    %c0_i32_1 = arith.constant 0 : i32
    return %c0_i32, %c0_i32_0 : i32, i32
  }
  func.func @transform_1(%arg0: i32) -> (i32, i32) {
    %c0_i32 = arith.constant 0 : i32
    %c0_i32_0 = arith.constant 0 : i32
    %c0_i32_1 = arith.constant 0 : i32
    return %c0_i32, %c0_i32_0 : i32, i32
  }
  func.func @transform_2(%arg0: i32) -> (i32, i32) {
    %c0_i32 = arith.constant 0 : i32
    %c0_i32_0 = arith.constant 0 : i32
    %c0_i32_1 = arith.constant 0 : i32
    return %c0_i32, %c0_i32_0 : i32, i32
  }
  func.func @transform_3(%arg0: i32) -> (i32, i32) {
    %c0_i32 = arith.constant 0 : i32
    %c0_i32_0 = arith.constant 0 : i32
    %c0_i32_1 = arith.constant 0 : i32
    return %c0_i32, %c0_i32_0 : i32, i32
  }
  func.func @transform_4(%arg0: i32) -> (i32, i32) {
    %c0_i32 = arith.constant 0 : i32
    %c0_i32_0 = arith.constant 0 : i32
    %c0_i32_1 = arith.constant 0 : i32
    return %c0_i32, %c0_i32_0 : i32, i32
  }
  func.func @transform_5(%arg0: i32) -> (i32, i32) {
    %c0_i32 = arith.constant 0 : i32
    %c0_i32_0 = arith.constant 0 : i32
    %c0_i32_1 = arith.constant 0 : i32
    return %c0_i32, %c0_i32_0 : i32, i32
  }
  func.func @transform_6(%arg0: i32) -> (i32, i32) {
    %c0_i32 = arith.constant 0 : i32
    %c0_i32_0 = arith.constant 0 : i32
    %c0_i32_1 = arith.constant 0 : i32
    return %c0_i32, %c0_i32_0 : i32, i32
  }
  func.func @transform_7(%arg0: i32) -> (i32, i32) {
    %c0_i32 = arith.constant 0 : i32
    %c0_i32_0 = arith.constant 0 : i32
    %c0_i32_1 = arith.constant 0 : i32
    return %c0_i32, %c0_i32_0 : i32, i32
  }
}

module attributes {stable_mosaic.version = 11 : i64} {
  func.func @kernel(%arg0: i32, %arg1: memref<128x256xbf16, #tpu.memory_space<vmem>>, %arg2: memref<256x128xbf16, #tpu.memory_space<vmem>>, %arg3: memref<1x128xf32, #tpu.memory_space<vmem>>, %arg4: memref<128x128xbf16, #tpu.memory_space<vmem>>, %arg5: memref<1x128xf32, #tpu.memory_space<vmem>>, %arg6: memref<128x128xbf16, #tpu.memory_space<vmem>>, %arg7: memref<1x128xf32, #tpu.memory_space<vmem>>, %arg8: memref<16x128xbf16, #tpu.memory_space<vmem>>) attributes {dimension_semantics = [#tpu.dimension_semantics<arbitrary>], iteration_bounds = array<i64: 1>, scalar_prefetch = 0 : i64, scratch_operands = 0 : i64, tpu.core_type = #tpu.core_type<tc>, window_params = [{pipeline_mode = #tpu.pipeline_mode<synchronous>, transform_indices = @transform_0, window_bounds = array<i64: 128, 256>}, {pipeline_mode = #tpu.pipeline_mode<synchronous>, transform_indices = @transform_1, window_bounds = array<i64: 256, 128>}, {pipeline_mode = #tpu.pipeline_mode<synchronous>, transform_indices = @transform_2, window_bounds = array<i64: 1, 128>}, {pipeline_mode = #tpu.pipeline_mode<synchronous>, transform_indices = @transform_3, window_bounds = array<i64: 128, 128>}, {pipeline_mode = #tpu.pipeline_mode<synchronous>, transform_indices = @transform_4, window_bounds = array<i64: 1, 128>}, {pipeline_mode = #tpu.pipeline_mode<synchronous>, transform_indices = @transform_5, window_bounds = array<i64: 128, 128>}, {pipeline_mode = #tpu.pipeline_mode<synchronous>, transform_indices = @transform_6, window_bounds = array<i64: 1, 128>}, {pipeline_mode = #tpu.pipeline_mode<synchronous>, transform_indices = @transform_7, window_bounds = array<i64: 16, 128>}]} {
    %c0 = arith.constant 0 : index
    %c0_0 = arith.constant 0 : index
    %0 = vector.load %arg1[%c0, %c0_0] : memref<128x256xbf16, #tpu.memory_space<vmem>>, vector<128x256xbf16>
    %c0_1 = arith.constant 0 : index
    %c0_2 = arith.constant 0 : index
    %1 = vector.load %arg2[%c0_1, %c0_2] : memref<256x128xbf16, #tpu.memory_space<vmem>>, vector<256x128xbf16>
    %c0_3 = arith.constant 0 : index
    %c0_4 = arith.constant 0 : index
    %2 = vector.load %arg3[%c0_3, %c0_4] : memref<1x128xf32, #tpu.memory_space<vmem>>, vector<1x128xf32>
    %cst = arith.constant dense<0.000000e+00> : vector<128x128xf32>
    %3 = tpu.matmul %0, %1, %cst {dimension_numbers = #tpu.dot_dimension_numbers<[1], [0], [0], [1], [0, 0, 1, 1], [], []>} : vector<128x256xbf16>, vector<256x128xbf16>, vector<128x128xf32> -> vector<128x128xf32>
    %4 = vector.broadcast %2 : vector<1x128xf32> to vector<128x128xf32>
    %5 = arith.addf %3, %4 : vector<128x128xf32>
    %cst_5 = arith.constant 0.000000e+00 : f32
    %6 = vector.broadcast %cst_5 : f32 to vector<128x128xf32>
    %7 = arith.maximumf %5, %6 : vector<128x128xf32>
    %8 = arith.truncf %7 : vector<128x128xf32> to vector<128x128xbf16>
    %c0_6 = arith.constant 0 : index
    %c0_7 = arith.constant 0 : index
    %9 = vector.load %arg4[%c0_6, %c0_7] : memref<128x128xbf16, #tpu.memory_space<vmem>>, vector<128x128xbf16>
    %c0_8 = arith.constant 0 : index
    %c0_9 = arith.constant 0 : index
    %10 = vector.load %arg5[%c0_8, %c0_9] : memref<1x128xf32, #tpu.memory_space<vmem>>, vector<1x128xf32>
    %cst_10 = arith.constant dense<0.000000e+00> : vector<128x128xf32>
    %11 = tpu.matmul %8, %9, %cst_10 {dimension_numbers = #tpu.dot_dimension_numbers<[1], [0], [0], [1], [0, 0, 1, 1], [], []>} : vector<128x128xbf16>, vector<128x128xbf16>, vector<128x128xf32> -> vector<128x128xf32>
    %12 = vector.broadcast %10 : vector<1x128xf32> to vector<128x128xf32>
    %13 = arith.addf %11, %12 : vector<128x128xf32>
    %cst_11 = arith.constant 0.000000e+00 : f32
    %14 = vector.broadcast %cst_11 : f32 to vector<128x128xf32>
    %15 = arith.maximumf %13, %14 : vector<128x128xf32>
    %16 = arith.truncf %15 : vector<128x128xf32> to vector<128x128xbf16>
    %c0_12 = arith.constant 0 : index
    %c0_13 = arith.constant 0 : index
    %17 = vector.load %arg6[%c0_12, %c0_13] : memref<128x128xbf16, #tpu.memory_space<vmem>>, vector<128x128xbf16>
    %c0_14 = arith.constant 0 : index
    %c0_15 = arith.constant 0 : index
    %18 = vector.load %arg7[%c0_14, %c0_15] : memref<1x128xf32, #tpu.memory_space<vmem>>, vector<1x128xf32>
    %19 = vector.extract_strided_slice %16 {offsets = [0, 0], sizes = [16, 128], strides = [1, 1]} : vector<128x128xbf16> to vector<16x128xbf16>
    %cst_16 = arith.constant dense<0.000000e+00> : vector<16x128xf32>
    %20 = tpu.matmul %19, %17, %cst_16 {dimension_numbers = #tpu.dot_dimension_numbers<[1], [0], [0], [1], [0, 0, 1, 1], [], []>} : vector<16x128xbf16>, vector<128x128xbf16>, vector<16x128xf32> -> vector<16x128xf32>
    %21 = vector.extract_strided_slice %16 {offsets = [16, 0], sizes = [16, 128], strides = [1, 1]} : vector<128x128xbf16> to vector<16x128xbf16>
    %cst_17 = arith.constant dense<0.000000e+00> : vector<16x128xf32>
    %22 = tpu.matmul %21, %17, %cst_17 {dimension_numbers = #tpu.dot_dimension_numbers<[1], [0], [0], [1], [0, 0, 1, 1], [], []>} : vector<16x128xbf16>, vector<128x128xbf16>, vector<16x128xf32> -> vector<16x128xf32>
    %23 = arith.maximumf %20, %22 : vector<16x128xf32>
    %24 = vector.extract_strided_slice %16 {offsets = [32, 0], sizes = [16, 128], strides = [1, 1]} : vector<128x128xbf16> to vector<16x128xbf16>
    %cst_18 = arith.constant dense<0.000000e+00> : vector<16x128xf32>
    %25 = tpu.matmul %24, %17, %cst_18 {dimension_numbers = #tpu.dot_dimension_numbers<[1], [0], [0], [1], [0, 0, 1, 1], [], []>} : vector<16x128xbf16>, vector<128x128xbf16>, vector<16x128xf32> -> vector<16x128xf32>
    %26 = arith.maximumf %23, %25 : vector<16x128xf32>
    %27 = vector.extract_strided_slice %16 {offsets = [48, 0], sizes = [16, 128], strides = [1, 1]} : vector<128x128xbf16> to vector<16x128xbf16>
    %cst_19 = arith.constant dense<0.000000e+00> : vector<16x128xf32>
    %28 = tpu.matmul %27, %17, %cst_19 {dimension_numbers = #tpu.dot_dimension_numbers<[1], [0], [0], [1], [0, 0, 1, 1], [], []>} : vector<16x128xbf16>, vector<128x128xbf16>, vector<16x128xf32> -> vector<16x128xf32>
    %29 = arith.maximumf %26, %28 : vector<16x128xf32>
    %30 = vector.extract_strided_slice %16 {offsets = [64, 0], sizes = [16, 128], strides = [1, 1]} : vector<128x128xbf16> to vector<16x128xbf16>
    %cst_20 = arith.constant dense<0.000000e+00> : vector<16x128xf32>
    %31 = tpu.matmul %30, %17, %cst_20 {dimension_numbers = #tpu.dot_dimension_numbers<[1], [0], [0], [1], [0, 0, 1, 1], [], []>} : vector<16x128xbf16>, vector<128x128xbf16>, vector<16x128xf32> -> vector<16x128xf32>
    %32 = arith.maximumf %29, %31 : vector<16x128xf32>
    %33 = vector.extract_strided_slice %16 {offsets = [80, 0], sizes = [16, 128], strides = [1, 1]} : vector<128x128xbf16> to vector<16x128xbf16>
    %cst_21 = arith.constant dense<0.000000e+00> : vector<16x128xf32>
    %34 = tpu.matmul %33, %17, %cst_21 {dimension_numbers = #tpu.dot_dimension_numbers<[1], [0], [0], [1], [0, 0, 1, 1], [], []>} : vector<16x128xbf16>, vector<128x128xbf16>, vector<16x128xf32> -> vector<16x128xf32>
    %35 = arith.maximumf %32, %34 : vector<16x128xf32>
    %36 = vector.extract_strided_slice %16 {offsets = [96, 0], sizes = [16, 128], strides = [1, 1]} : vector<128x128xbf16> to vector<16x128xbf16>
    %cst_22 = arith.constant dense<0.000000e+00> : vector<16x128xf32>
    %37 = tpu.matmul %36, %17, %cst_22 {dimension_numbers = #tpu.dot_dimension_numbers<[1], [0], [0], [1], [0, 0, 1, 1], [], []>} : vector<16x128xbf16>, vector<128x128xbf16>, vector<16x128xf32> -> vector<16x128xf32>
    %38 = arith.maximumf %35, %37 : vector<16x128xf32>
    %39 = vector.extract_strided_slice %16 {offsets = [112, 0], sizes = [16, 128], strides = [1, 1]} : vector<128x128xbf16> to vector<16x128xbf16>
    %cst_23 = arith.constant dense<0.000000e+00> : vector<16x128xf32>
    %40 = tpu.matmul %39, %17, %cst_23 {dimension_numbers = #tpu.dot_dimension_numbers<[1], [0], [0], [1], [0, 0, 1, 1], [], []>} : vector<16x128xbf16>, vector<128x128xbf16>, vector<16x128xf32> -> vector<16x128xf32>
    %41 = arith.maximumf %38, %40 : vector<16x128xf32>
    %42 = vector.broadcast %18 : vector<1x128xf32> to vector<16x128xf32>
    %43 = arith.addf %41, %42 : vector<16x128xf32>
    %cst_24 = arith.constant 0.000000e+00 : f32
    %44 = vector.broadcast %cst_24 : f32 to vector<16x128xf32>
    %45 = arith.maximumf %43, %44 : vector<16x128xf32>
    %46 = arith.truncf %45 : vector<16x128xf32> to vector<16x128xbf16>
    %c0_25 = arith.constant 0 : index
    %c0_26 = arith.constant 0 : index
    %47 = vector.load %arg8[%c0_25, %c0_26] : memref<16x128xbf16, #tpu.memory_space<vmem>>, vector<16x128xbf16>
    tpu.vector_store %arg8[%c0_25, %c0_26], %46 {strides = array<i32>} : memref<16x128xbf16, #tpu.memory_space<vmem>>, vector<16x128xbf16>,
    return
  }
  func.func @transform_0(%arg0: i32) -> (i32, i32) {
    %c0_i32 = arith.constant 0 : i32
    %c0_i32_0 = arith.constant 0 : i32
    %c0_i32_1 = arith.constant 0 : i32
    return %c0_i32, %c0_i32_0 : i32, i32
  }
  func.func @transform_1(%arg0: i32) -> (i32, i32) {
    %c0_i32 = arith.constant 0 : i32
    %c0_i32_0 = arith.constant 0 : i32
    %c0_i32_1 = arith.constant 0 : i32
    return %c0_i32, %c0_i32_0 : i32, i32
  }
  func.func @transform_2(%arg0: i32) -> (i32, i32) {
    %c0_i32 = arith.constant 0 : i32
    %c0_i32_0 = arith.constant 0 : i32
    %c0_i32_1 = arith.constant 0 : i32
    return %c0_i32, %c0_i32_0 : i32, i32
  }
  func.func @transform_3(%arg0: i32) -> (i32, i32) {
    %c0_i32 = arith.constant 0 : i32
    %c0_i32_0 = arith.constant 0 : i32
    %c0_i32_1 = arith.constant 0 : i32
    return %c0_i32, %c0_i32_0 : i32, i32
  }
  func.func @transform_4(%arg0: i32) -> (i32, i32) {
    %c0_i32 = arith.constant 0 : i32
    %c0_i32_0 = arith.constant 0 : i32
    %c0_i32_1 = arith.constant 0 : i32
    return %c0_i32, %c0_i32_0 : i32, i32
  }
  func.func @transform_5(%arg0: i32) -> (i32, i32) {
    %c0_i32 = arith.constant 0 : i32
    %c0_i32_0 = arith.constant 0 : i32
    %c0_i32_1 = arith.constant 0 : i32
    return %c0_i32, %c0_i32_0 : i32, i32
  }
  func.func @transform_6(%arg0: i32) -> (i32, i32) {
    %c0_i32 = arith.constant 0 : i32
    %c0_i32_0 = arith.constant 0 : i32
    %c0_i32_1 = arith.constant 0 : i32
    return %c0_i32, %c0_i32_0 : i32, i32
  }
  func.func @transform_7(%arg0: i32) -> (i32, i32) {
    %c0_i32 = arith.constant 0 : i32
    %c0_i32_0 = arith.constant 0 : i32
    %c0_i32_1 = arith.constant 0 : i32
    return %c0_i32, %c0_i32_0 : i32, i32
  }
}

module attributes {stable_mosaic.version = 11 : i64} {
  func.func @kernel(%arg0: i32, %arg1: memref<64x256xbf16, #tpu.memory_space<vmem>>, %arg2: memref<256x128xbf16, #tpu.memory_space<vmem>>, %arg3: memref<1x128xf32, #tpu.memory_space<vmem>>, %arg4: memref<128x128xbf16, #tpu.memory_space<vmem>>, %arg5: memref<1x128xf32, #tpu.memory_space<vmem>>, %arg6: memref<128x256xbf16, #tpu.memory_space<vmem>>, %arg7: memref<1x256xf32, #tpu.memory_space<vmem>>, %arg8: memref<8x256xf32, #tpu.memory_space<vmem>>) attributes {dimension_semantics = [#tpu.dimension_semantics<arbitrary>], iteration_bounds = array<i64: 1>, scalar_prefetch = 0 : i64, scratch_operands = 0 : i64, tpu.core_type = #tpu.core_type<tc>, window_params = [{pipeline_mode = #tpu.pipeline_mode<synchronous>, transform_indices = @transform_0, window_bounds = array<i64: 64, 256>}, {pipeline_mode = #tpu.pipeline_mode<synchronous>, transform_indices = @transform_1, window_bounds = array<i64: 256, 128>}, {pipeline_mode = #tpu.pipeline_mode<synchronous>, transform_indices = @transform_2, window_bounds = array<i64: 1, 128>}, {pipeline_mode = #tpu.pipeline_mode<synchronous>, transform_indices = @transform_3, window_bounds = array<i64: 128, 128>}, {pipeline_mode = #tpu.pipeline_mode<synchronous>, transform_indices = @transform_4, window_bounds = array<i64: 1, 128>}, {pipeline_mode = #tpu.pipeline_mode<synchronous>, transform_indices = @transform_5, window_bounds = array<i64: 128, 256>}, {pipeline_mode = #tpu.pipeline_mode<synchronous>, transform_indices = @transform_6, window_bounds = array<i64: 1, 256>}, {pipeline_mode = #tpu.pipeline_mode<synchronous>, transform_indices = @transform_7, window_bounds = array<i64: 8, 256>}]} {
    %c0 = arith.constant 0 : index
    %c0_0 = arith.constant 0 : index
    %0 = vector.load %arg1[%c0, %c0_0] : memref<64x256xbf16, #tpu.memory_space<vmem>>, vector<64x256xbf16>
    %c0_1 = arith.constant 0 : index
    %c0_2 = arith.constant 0 : index
    %1 = vector.load %arg2[%c0_1, %c0_2] : memref<256x128xbf16, #tpu.memory_space<vmem>>, vector<256x128xbf16>
    %c0_3 = arith.constant 0 : index
    %c0_4 = arith.constant 0 : index
    %2 = vector.load %arg3[%c0_3, %c0_4] : memref<1x128xf32, #tpu.memory_space<vmem>>, vector<1x128xf32>
    %cst = arith.constant dense<0.000000e+00> : vector<64x128xf32>
    %3 = tpu.matmul %0, %1, %cst {dimension_numbers = #tpu.dot_dimension_numbers<[1], [0], [0], [1], [0, 0, 1, 1], [], []>} : vector<64x256xbf16>, vector<256x128xbf16>, vector<64x128xf32> -> vector<64x128xf32>
    %4 = vector.broadcast %2 : vector<1x128xf32> to vector<64x128xf32>
    %5 = arith.addf %3, %4 : vector<64x128xf32>
    %cst_5 = arith.constant 0.000000e+00 : f32
    %6 = vector.broadcast %cst_5 : f32 to vector<64x128xf32>
    %7 = arith.maximumf %5, %6 : vector<64x128xf32>
    %8 = arith.truncf %7 : vector<64x128xf32> to vector<64x128xbf16>
    %c0_6 = arith.constant 0 : index
    %c0_7 = arith.constant 0 : index
    %9 = vector.load %arg4[%c0_6, %c0_7] : memref<128x128xbf16, #tpu.memory_space<vmem>>, vector<128x128xbf16>
    %c0_8 = arith.constant 0 : index
    %c0_9 = arith.constant 0 : index
    %10 = vector.load %arg5[%c0_8, %c0_9] : memref<1x128xf32, #tpu.memory_space<vmem>>, vector<1x128xf32>
    %cst_10 = arith.constant dense<0.000000e+00> : vector<64x128xf32>
    %11 = tpu.matmul %8, %9, %cst_10 {dimension_numbers = #tpu.dot_dimension_numbers<[1], [0], [0], [1], [0, 0, 1, 1], [], []>} : vector<64x128xbf16>, vector<128x128xbf16>, vector<64x128xf32> -> vector<64x128xf32>
    %12 = vector.broadcast %10 : vector<1x128xf32> to vector<64x128xf32>
    %13 = arith.addf %11, %12 : vector<64x128xf32>
    %cst_11 = arith.constant 0.000000e+00 : f32
    %14 = vector.broadcast %cst_11 : f32 to vector<64x128xf32>
    %15 = arith.maximumf %13, %14 : vector<64x128xf32>
    %16 = arith.truncf %15 : vector<64x128xf32> to vector<64x128xbf16>
    %c0_12 = arith.constant 0 : index
    %c0_13 = arith.constant 0 : index
    %17 = vector.load %arg6[%c0_12, %c0_13] : memref<128x256xbf16, #tpu.memory_space<vmem>>, vector<128x256xbf16>
    %c0_14 = arith.constant 0 : index
    %c0_15 = arith.constant 0 : index
    %18 = vector.load %arg7[%c0_14, %c0_15] : memref<1x256xf32, #tpu.memory_space<vmem>>, vector<1x256xf32>
    %cst_16 = arith.constant dense<0.000000e+00> : vector<64x256xf32>
    %19 = tpu.matmul %16, %17, %cst_16 {dimension_numbers = #tpu.dot_dimension_numbers<[1], [0], [0], [1], [0, 0, 1, 1], [], []>} : vector<64x128xbf16>, vector<128x256xbf16>, vector<64x256xf32> -> vector<64x256xf32>
    %20 = vector.broadcast %18 : vector<1x256xf32> to vector<64x256xf32>
    %21 = arith.addf %19, %20 : vector<64x256xf32>
    %cst_17 = arith.constant 0.000000e+00 : f32
    %22 = vector.broadcast %cst_17 : f32 to vector<64x256xf32>
    %23 = arith.maximumf %21, %22 : vector<64x256xf32>
    %24 = vector.extract_strided_slice %23 {offsets = [0, 0], sizes = [8, 256], strides = [1, 1]} : vector<64x256xf32> to vector<8x256xf32>
    %25 = vector.extract_strided_slice %23 {offsets = [8, 0], sizes = [8, 256], strides = [1, 1]} : vector<64x256xf32> to vector<8x256xf32>
    %26 = arith.maximumf %24, %25 : vector<8x256xf32>
    %27 = vector.extract_strided_slice %23 {offsets = [16, 0], sizes = [8, 256], strides = [1, 1]} : vector<64x256xf32> to vector<8x256xf32>
    %28 = arith.maximumf %26, %27 : vector<8x256xf32>
    %29 = vector.extract_strided_slice %23 {offsets = [24, 0], sizes = [8, 256], strides = [1, 1]} : vector<64x256xf32> to vector<8x256xf32>
    %30 = arith.maximumf %28, %29 : vector<8x256xf32>
    %31 = vector.extract_strided_slice %23 {offsets = [32, 0], sizes = [8, 256], strides = [1, 1]} : vector<64x256xf32> to vector<8x256xf32>
    %32 = arith.maximumf %30, %31 : vector<8x256xf32>
    %33 = vector.extract_strided_slice %23 {offsets = [40, 0], sizes = [8, 256], strides = [1, 1]} : vector<64x256xf32> to vector<8x256xf32>
    %34 = arith.maximumf %32, %33 : vector<8x256xf32>
    %35 = vector.extract_strided_slice %23 {offsets = [48, 0], sizes = [8, 256], strides = [1, 1]} : vector<64x256xf32> to vector<8x256xf32>
    %36 = arith.maximumf %34, %35 : vector<8x256xf32>
    %37 = vector.extract_strided_slice %23 {offsets = [56, 0], sizes = [8, 256], strides = [1, 1]} : vector<64x256xf32> to vector<8x256xf32>
    %38 = arith.maximumf %36, %37 : vector<8x256xf32>
    %c0_18 = arith.constant 0 : index
    %c0_19 = arith.constant 0 : index
    %39 = vector.load %arg8[%c0_18, %c0_19] : memref<8x256xf32, #tpu.memory_space<vmem>>, vector<8x256xf32>
    tpu.vector_store %arg8[%c0_18, %c0_19], %38 {strides = array<i32>} : memref<8x256xf32, #tpu.memory_space<vmem>>, vector<8x256xf32>,
    return
  }
  func.func @transform_0(%arg0: i32) -> (i32, i32) {
    %c0_i32 = arith.constant 0 : i32
    %c0_i32_0 = arith.constant 0 : i32
    %c0_i32_1 = arith.constant 0 : i32
    return %c0_i32, %c0_i32_0 : i32, i32
  }
  func.func @transform_1(%arg0: i32) -> (i32, i32) {
    %c0_i32 = arith.constant 0 : i32
    %c0_i32_0 = arith.constant 0 : i32
    %c0_i32_1 = arith.constant 0 : i32
    return %c0_i32, %c0_i32_0 : i32, i32
  }
  func.func @transform_2(%arg0: i32) -> (i32, i32) {
    %c0_i32 = arith.constant 0 : i32
    %c0_i32_0 = arith.constant 0 : i32
    %c0_i32_1 = arith.constant 0 : i32
    return %c0_i32, %c0_i32_0 : i32, i32
  }
  func.func @transform_3(%arg0: i32) -> (i32, i32) {
    %c0_i32 = arith.constant 0 : i32
    %c0_i32_0 = arith.constant 0 : i32
    %c0_i32_1 = arith.constant 0 : i32
    return %c0_i32, %c0_i32_0 : i32, i32
  }
  func.func @transform_4(%arg0: i32) -> (i32, i32) {
    %c0_i32 = arith.constant 0 : i32
    %c0_i32_0 = arith.constant 0 : i32
    %c0_i32_1 = arith.constant 0 : i32
    return %c0_i32, %c0_i32_0 : i32, i32
  }
  func.func @transform_5(%arg0: i32) -> (i32, i32) {
    %c0_i32 = arith.constant 0 : i32
    %c0_i32_0 = arith.constant 0 : i32
    %c0_i32_1 = arith.constant 0 : i32
    return %c0_i32, %c0_i32_0 : i32, i32
  }
  func.func @transform_6(%arg0: i32) -> (i32, i32) {
    %c0_i32 = arith.constant 0 : i32
    %c0_i32_0 = arith.constant 0 : i32
    %c0_i32_1 = arith.constant 0 : i32
    return %c0_i32, %c0_i32_0 : i32, i32
  }
  func.func @transform_7(%arg0: i32) -> (i32, i32) {
    %c0_i32 = arith.constant 0 : i32
    %c0_i32_0 = arith.constant 0 : i32
    %c0_i32_1 = arith.constant 0 : i32
    return %c0_i32, %c0_i32_0 : i32, i32
  }
}

module attributes {stable_mosaic.version = 11 : i64} {
  func.func @kernel(%arg0: i32, %arg1: memref<16x384xbf16, #tpu.memory_space<vmem>>, %arg2: memref<384x256xbf16, #tpu.memory_space<vmem>>, %arg3: memref<1x256xf32, #tpu.memory_space<vmem>>, %arg4: memref<256x128xbf16, #tpu.memory_space<vmem>>, %arg5: memref<1x128xf32, #tpu.memory_space<vmem>>, %arg6: memref<16x128xbf16, #tpu.memory_space<vmem>>) attributes {dimension_semantics = [#tpu.dimension_semantics<arbitrary>], iteration_bounds = array<i64: 1>, scalar_prefetch = 0 : i64, scratch_operands = 0 : i64, tpu.core_type = #tpu.core_type<tc>, window_params = [{pipeline_mode = #tpu.pipeline_mode<synchronous>, transform_indices = @transform_0, window_bounds = array<i64: 16, 384>}, {pipeline_mode = #tpu.pipeline_mode<synchronous>, transform_indices = @transform_1, window_bounds = array<i64: 384, 256>}, {pipeline_mode = #tpu.pipeline_mode<synchronous>, transform_indices = @transform_2, window_bounds = array<i64: 1, 256>}, {pipeline_mode = #tpu.pipeline_mode<synchronous>, transform_indices = @transform_3, window_bounds = array<i64: 256, 128>}, {pipeline_mode = #tpu.pipeline_mode<synchronous>, transform_indices = @transform_4, window_bounds = array<i64: 1, 128>}, {pipeline_mode = #tpu.pipeline_mode<synchronous>, transform_indices = @transform_5, window_bounds = array<i64: 16, 128>}]} {
    %c0 = arith.constant 0 : index
    %c0_0 = arith.constant 0 : index
    %0 = vector.load %arg1[%c0, %c0_0] : memref<16x384xbf16, #tpu.memory_space<vmem>>, vector<16x384xbf16>
    %c0_1 = arith.constant 0 : index
    %c0_2 = arith.constant 0 : index
    %1 = vector.load %arg2[%c0_1, %c0_2] : memref<384x256xbf16, #tpu.memory_space<vmem>>, vector<384x256xbf16>
    %c0_3 = arith.constant 0 : index
    %c0_4 = arith.constant 0 : index
    %2 = vector.load %arg3[%c0_3, %c0_4] : memref<1x256xf32, #tpu.memory_space<vmem>>, vector<1x256xf32>
    %cst = arith.constant dense<0.000000e+00> : vector<16x256xf32>
    %3 = tpu.matmul %0, %1, %cst {dimension_numbers = #tpu.dot_dimension_numbers<[1], [0], [0], [1], [0, 0, 1, 1], [], []>} : vector<16x384xbf16>, vector<384x256xbf16>, vector<16x256xf32> -> vector<16x256xf32>
    %4 = vector.broadcast %2 : vector<1x256xf32> to vector<16x256xf32>
    %5 = arith.addf %3, %4 : vector<16x256xf32>
    %cst_5 = arith.constant 0.000000e+00 : f32
    %6 = vector.broadcast %cst_5 : f32 to vector<16x256xf32>
    %7 = arith.maximumf %5, %6 : vector<16x256xf32>
    %8 = arith.truncf %7 : vector<16x256xf32> to vector<16x256xbf16>
    %c0_6 = arith.constant 0 : index
    %c0_7 = arith.constant 0 : index
    %9 = vector.load %arg4[%c0_6, %c0_7] : memref<256x128xbf16, #tpu.memory_space<vmem>>, vector<256x128xbf16>
    %c0_8 = arith.constant 0 : index
    %c0_9 = arith.constant 0 : index
    %10 = vector.load %arg5[%c0_8, %c0_9] : memref<1x128xf32, #tpu.memory_space<vmem>>, vector<1x128xf32>
    %cst_10 = arith.constant dense<0.000000e+00> : vector<16x128xf32>
    %11 = tpu.matmul %8, %9, %cst_10 {dimension_numbers = #tpu.dot_dimension_numbers<[1], [0], [0], [1], [0, 0, 1, 1], [], []>} : vector<16x256xbf16>, vector<256x128xbf16>, vector<16x128xf32> -> vector<16x128xf32>
    %12 = vector.broadcast %10 : vector<1x128xf32> to vector<16x128xf32>
    %13 = arith.addf %11, %12 : vector<16x128xf32>
    %cst_11 = arith.constant 0.000000e+00 : f32
    %14 = vector.broadcast %cst_11 : f32 to vector<16x128xf32>
    %15 = arith.maximumf %13, %14 : vector<16x128xf32>
    %16 = arith.truncf %15 : vector<16x128xf32> to vector<16x128xbf16>
    %c0_12 = arith.constant 0 : index
    %c0_13 = arith.constant 0 : index
    %17 = vector.load %arg6[%c0_12, %c0_13] : memref<16x128xbf16, #tpu.memory_space<vmem>>, vector<16x128xbf16>
    tpu.vector_store %arg6[%c0_12, %c0_13], %16 {strides = array<i32>} : memref<16x128xbf16, #tpu.memory_space<vmem>>, vector<16x128xbf16>,
    return
  }
  func.func @transform_0(%arg0: i32) -> (i32, i32) {
    %c0_i32 = arith.constant 0 : i32
    %c0_i32_0 = arith.constant 0 : i32
    %c0_i32_1 = arith.constant 0 : i32
    return %c0_i32, %c0_i32_0 : i32, i32
  }
  func.func @transform_1(%arg0: i32) -> (i32, i32) {
    %c0_i32 = arith.constant 0 : i32
    %c0_i32_0 = arith.constant 0 : i32
    %c0_i32_1 = arith.constant 0 : i32
    return %c0_i32, %c0_i32_0 : i32, i32
  }
  func.func @transform_2(%arg0: i32) -> (i32, i32) {
    %c0_i32 = arith.constant 0 : i32
    %c0_i32_0 = arith.constant 0 : i32
    %c0_i32_1 = arith.constant 0 : i32
    return %c0_i32, %c0_i32_0 : i32, i32
  }
  func.func @transform_3(%arg0: i32) -> (i32, i32) {
    %c0_i32 = arith.constant 0 : i32
    %c0_i32_0 = arith.constant 0 : i32
    %c0_i32_1 = arith.constant 0 : i32
    return %c0_i32, %c0_i32_0 : i32, i32
  }
  func.func @transform_4(%arg0: i32) -> (i32, i32) {
    %c0_i32 = arith.constant 0 : i32
    %c0_i32_0 = arith.constant 0 : i32
    %c0_i32_1 = arith.constant 0 : i32
    return %c0_i32, %c0_i32_0 : i32, i32
  }
  func.func @transform_5(%arg0: i32) -> (i32, i32) {
    %c0_i32 = arith.constant 0 : i32
    %c0_i32_0 = arith.constant 0 : i32
    %c0_i32_1 = arith.constant 0 : i32
    return %c0_i32, %c0_i32_0 : i32, i32
  }
}

module attributes {stable_mosaic.version = 11 : i64} {
  func.func @kernel(%arg0: i32, %arg1: memref<32x256xbf16, #tpu.memory_space<vmem>>, %arg2: memref<256x128xbf16, #tpu.memory_space<vmem>>, %arg3: memref<1x128xf32, #tpu.memory_space<vmem>>, %arg4: memref<128x128xbf16, #tpu.memory_space<vmem>>, %arg5: memref<1x128xf32, #tpu.memory_space<vmem>>, %arg6: memref<32x128xbf16, #tpu.memory_space<vmem>>) attributes {dimension_semantics = [#tpu.dimension_semantics<arbitrary>], iteration_bounds = array<i64: 1>, scalar_prefetch = 0 : i64, scratch_operands = 0 : i64, tpu.core_type = #tpu.core_type<tc>, window_params = [{pipeline_mode = #tpu.pipeline_mode<synchronous>, transform_indices = @transform_0, window_bounds = array<i64: 32, 256>}, {pipeline_mode = #tpu.pipeline_mode<synchronous>, transform_indices = @transform_1, window_bounds = array<i64: 256, 128>}, {pipeline_mode = #tpu.pipeline_mode<synchronous>, transform_indices = @transform_2, window_bounds = array<i64: 1, 128>}, {pipeline_mode = #tpu.pipeline_mode<synchronous>, transform_indices = @transform_3, window_bounds = array<i64: 128, 128>}, {pipeline_mode = #tpu.pipeline_mode<synchronous>, transform_indices = @transform_4, window_bounds = array<i64: 1, 128>}, {pipeline_mode = #tpu.pipeline_mode<synchronous>, transform_indices = @transform_5, window_bounds = array<i64: 32, 128>}]} {
    %c0 = arith.constant 0 : index
    %c0_0 = arith.constant 0 : index
    %0 = vector.load %arg1[%c0, %c0_0] : memref<32x256xbf16, #tpu.memory_space<vmem>>, vector<32x256xbf16>
    %c0_1 = arith.constant 0 : index
    %c0_2 = arith.constant 0 : index
    %1 = vector.load %arg2[%c0_1, %c0_2] : memref<256x128xbf16, #tpu.memory_space<vmem>>, vector<256x128xbf16>
    %c0_3 = arith.constant 0 : index
    %c0_4 = arith.constant 0 : index
    %2 = vector.load %arg3[%c0_3, %c0_4] : memref<1x128xf32, #tpu.memory_space<vmem>>, vector<1x128xf32>
    %cst = arith.constant dense<0.000000e+00> : vector<32x128xf32>
    %3 = tpu.matmul %0, %1, %cst {dimension_numbers = #tpu.dot_dimension_numbers<[1], [0], [0], [1], [0, 0, 1, 1], [], []>} : vector<32x256xbf16>, vector<256x128xbf16>, vector<32x128xf32> -> vector<32x128xf32>
    %4 = vector.broadcast %2 : vector<1x128xf32> to vector<32x128xf32>
    %5 = arith.addf %3, %4 : vector<32x128xf32>
    %cst_5 = arith.constant 0.000000e+00 : f32
    %6 = vector.broadcast %cst_5 : f32 to vector<32x128xf32>
    %7 = arith.maximumf %5, %6 : vector<32x128xf32>
    %8 = arith.truncf %7 : vector<32x128xf32> to vector<32x128xbf16>
    %c0_6 = arith.constant 0 : index
    %c0_7 = arith.constant 0 : index
    %9 = vector.load %arg4[%c0_6, %c0_7] : memref<128x128xbf16, #tpu.memory_space<vmem>>, vector<128x128xbf16>
    %c0_8 = arith.constant 0 : index
    %c0_9 = arith.constant 0 : index
    %10 = vector.load %arg5[%c0_8, %c0_9] : memref<1x128xf32, #tpu.memory_space<vmem>>, vector<1x128xf32>
    %cst_10 = arith.constant dense<0.000000e+00> : vector<32x128xf32>
    %11 = tpu.matmul %8, %9, %cst_10 {dimension_numbers = #tpu.dot_dimension_numbers<[1], [0], [0], [1], [0, 0, 1, 1], [], []>} : vector<32x128xbf16>, vector<128x128xbf16>, vector<32x128xf32> -> vector<32x128xf32>
    %12 = vector.broadcast %10 : vector<1x128xf32> to vector<32x128xf32>
    %13 = arith.addf %11, %12 : vector<32x128xf32>
    %cst_11 = arith.constant 0.000000e+00 : f32
    %14 = vector.broadcast %cst_11 : f32 to vector<32x128xf32>
    %15 = arith.maximumf %13, %14 : vector<32x128xf32>
    %16 = arith.truncf %15 : vector<32x128xf32> to vector<32x128xbf16>
    %c0_12 = arith.constant 0 : index
    %c0_13 = arith.constant 0 : index
    %17 = vector.load %arg6[%c0_12, %c0_13] : memref<32x128xbf16, #tpu.memory_space<vmem>>, vector<32x128xbf16>
    tpu.vector_store %arg6[%c0_12, %c0_13], %16 {strides = array<i32>} : memref<32x128xbf16, #tpu.memory_space<vmem>>, vector<32x128xbf16>,
    return
  }
  func.func @transform_0(%arg0: i32) -> (i32, i32) {
    %c0_i32 = arith.constant 0 : i32
    %c0_i32_0 = arith.constant 0 : i32
    %c0_i32_1 = arith.constant 0 : i32
    return %c0_i32, %c0_i32_0 : i32, i32
  }
  func.func @transform_1(%arg0: i32) -> (i32, i32) {
    %c0_i32 = arith.constant 0 : i32
    %c0_i32_0 = arith.constant 0 : i32
    %c0_i32_1 = arith.constant 0 : i32
    return %c0_i32, %c0_i32_0 : i32, i32
  }
  func.func @transform_2(%arg0: i32) -> (i32, i32) {
    %c0_i32 = arith.constant 0 : i32
    %c0_i32_0 = arith.constant 0 : i32
    %c0_i32_1 = arith.constant 0 : i32
    return %c0_i32, %c0_i32_0 : i32, i32
  }
  func.func @transform_3(%arg0: i32) -> (i32, i32) {
    %c0_i32 = arith.constant 0 : i32
    %c0_i32_0 = arith.constant 0 : i32
    %c0_i32_1 = arith.constant 0 : i32
    return %c0_i32, %c0_i32_0 : i32, i32
  }
  func.func @transform_4(%arg0: i32) -> (i32, i32) {
    %c0_i32 = arith.constant 0 : i32
    %c0_i32_0 = arith.constant 0 : i32
    %c0_i32_1 = arith.constant 0 : i32
    return %c0_i32, %c0_i32_0 : i32, i32
  }
  func.func @transform_5(%arg0: i32) -> (i32, i32) {
    %c0_i32 = arith.constant 0 : i32
    %c0_i32_0 = arith.constant 0 : i32
    %c0_i32_1 = arith.constant 0 : i32
    return %c0_i32, %c0_i32_0 : i32, i32
  }
}

module attributes {stable_mosaic.version = 11 : i64} {
  func.func @kernel(%arg0: i32, %arg1: memref<64x256xbf16, #tpu.memory_space<vmem>>, %arg2: memref<256x128xbf16, #tpu.memory_space<vmem>>, %arg3: memref<1x128xf32, #tpu.memory_space<vmem>>, %arg4: memref<128x128xbf16, #tpu.memory_space<vmem>>, %arg5: memref<1x128xf32, #tpu.memory_space<vmem>>, %arg6: memref<64x128xbf16, #tpu.memory_space<vmem>>) attributes {dimension_semantics = [#tpu.dimension_semantics<arbitrary>], iteration_bounds = array<i64: 1>, scalar_prefetch = 0 : i64, scratch_operands = 0 : i64, tpu.core_type = #tpu.core_type<tc>, window_params = [{pipeline_mode = #tpu.pipeline_mode<synchronous>, transform_indices = @transform_0, window_bounds = array<i64: 64, 256>}, {pipeline_mode = #tpu.pipeline_mode<synchronous>, transform_indices = @transform_1, window_bounds = array<i64: 256, 128>}, {pipeline_mode = #tpu.pipeline_mode<synchronous>, transform_indices = @transform_2, window_bounds = array<i64: 1, 128>}, {pipeline_mode = #tpu.pipeline_mode<synchronous>, transform_indices = @transform_3, window_bounds = array<i64: 128, 128>}, {pipeline_mode = #tpu.pipeline_mode<synchronous>, transform_indices = @transform_4, window_bounds = array<i64: 1, 128>}, {pipeline_mode = #tpu.pipeline_mode<synchronous>, transform_indices = @transform_5, window_bounds = array<i64: 64, 128>}]} {
    %c0 = arith.constant 0 : index
    %c0_0 = arith.constant 0 : index
    %0 = vector.load %arg1[%c0, %c0_0] : memref<64x256xbf16, #tpu.memory_space<vmem>>, vector<64x256xbf16>
    %c0_1 = arith.constant 0 : index
    %c0_2 = arith.constant 0 : index
    %1 = vector.load %arg2[%c0_1, %c0_2] : memref<256x128xbf16, #tpu.memory_space<vmem>>, vector<256x128xbf16>
    %c0_3 = arith.constant 0 : index
    %c0_4 = arith.constant 0 : index
    %2 = vector.load %arg3[%c0_3, %c0_4] : memref<1x128xf32, #tpu.memory_space<vmem>>, vector<1x128xf32>
    %cst = arith.constant dense<0.000000e+00> : vector<64x128xf32>
    %3 = tpu.matmul %0, %1, %cst {dimension_numbers = #tpu.dot_dimension_numbers<[1], [0], [0], [1], [0, 0, 1, 1], [], []>} : vector<64x256xbf16>, vector<256x128xbf16>, vector<64x128xf32> -> vector<64x128xf32>
    %4 = vector.broadcast %2 : vector<1x128xf32> to vector<64x128xf32>
    %5 = arith.addf %3, %4 : vector<64x128xf32>
    %cst_5 = arith.constant 0.000000e+00 : f32
    %6 = vector.broadcast %cst_5 : f32 to vector<64x128xf32>
    %7 = arith.maximumf %5, %6 : vector<64x128xf32>
    %8 = arith.truncf %7 : vector<64x128xf32> to vector<64x128xbf16>
    %c0_6 = arith.constant 0 : index
    %c0_7 = arith.constant 0 : index
    %9 = vector.load %arg4[%c0_6, %c0_7] : memref<128x128xbf16, #tpu.memory_space<vmem>>, vector<128x128xbf16>
    %c0_8 = arith.constant 0 : index
    %c0_9 = arith.constant 0 : index
    %10 = vector.load %arg5[%c0_8, %c0_9] : memref<1x128xf32, #tpu.memory_space<vmem>>, vector<1x128xf32>
    %cst_10 = arith.constant dense<0.000000e+00> : vector<64x128xf32>
    %11 = tpu.matmul %8, %9, %cst_10 {dimension_numbers = #tpu.dot_dimension_numbers<[1], [0], [0], [1], [0, 0, 1, 1], [], []>} : vector<64x128xbf16>, vector<128x128xbf16>, vector<64x128xf32> -> vector<64x128xf32>
    %12 = vector.broadcast %10 : vector<1x128xf32> to vector<64x128xf32>
    %13 = arith.addf %11, %12 : vector<64x128xf32>
    %cst_11 = arith.constant 0.000000e+00 : f32
    %14 = vector.broadcast %cst_11 : f32 to vector<64x128xf32>
    %15 = arith.maximumf %13, %14 : vector<64x128xf32>
    %16 = arith.truncf %15 : vector<64x128xf32> to vector<64x128xbf16>
    %c0_12 = arith.constant 0 : index
    %c0_13 = arith.constant 0 : index
    %17 = vector.load %arg6[%c0_12, %c0_13] : memref<64x128xbf16, #tpu.memory_space<vmem>>, vector<64x128xbf16>
    tpu.vector_store %arg6[%c0_12, %c0_13], %16 {strides = array<i32>} : memref<64x128xbf16, #tpu.memory_space<vmem>>, vector<64x128xbf16>,
    return
  }
  func.func @transform_0(%arg0: i32) -> (i32, i32) {
    %c0_i32 = arith.constant 0 : i32
    %c0_i32_0 = arith.constant 0 : i32
    %c0_i32_1 = arith.constant 0 : i32
    return %c0_i32, %c0_i32_0 : i32, i32
  }
  func.func @transform_1(%arg0: i32) -> (i32, i32) {
    %c0_i32 = arith.constant 0 : i32
    %c0_i32_0 = arith.constant 0 : i32
    %c0_i32_1 = arith.constant 0 : i32
    return %c0_i32, %c0_i32_0 : i32, i32
  }
  func.func @transform_2(%arg0: i32) -> (i32, i32) {
    %c0_i32 = arith.constant 0 : i32
    %c0_i32_0 = arith.constant 0 : i32
    %c0_i32_1 = arith.constant 0 : i32
    return %c0_i32, %c0_i32_0 : i32, i32
  }
  func.func @transform_3(%arg0: i32) -> (i32, i32) {
    %c0_i32 = arith.constant 0 : i32
    %c0_i32_0 = arith.constant 0 : i32
    %c0_i32_1 = arith.constant 0 : i32
    return %c0_i32, %c0_i32_0 : i32, i32
  }
  func.func @transform_4(%arg0: i32) -> (i32, i32) {
    %c0_i32 = arith.constant 0 : i32
    %c0_i32_0 = arith.constant 0 : i32
    %c0_i32_1 = arith.constant 0 : i32
    return %c0_i32, %c0_i32_0 : i32, i32
  }
  func.func @transform_5(%arg0: i32) -> (i32, i32) {
    %c0_i32 = arith.constant 0 : i32
    %c0_i32_0 = arith.constant 0 : i32
    %c0_i32_1 = arith.constant 0 : i32
    return %c0_i32, %c0_i32_0 : i32, i32
  }
}

module attributes {stable_mosaic.version = 11 : i64} {
  func.func @kernel(%arg0: i32, %arg1: memref<128x256xbf16, #tpu.memory_space<vmem>>, %arg2: memref<256x128xbf16, #tpu.memory_space<vmem>>, %arg3: memref<1x128xf32, #tpu.memory_space<vmem>>, %arg4: memref<128x128xbf16, #tpu.memory_space<vmem>>, %arg5: memref<1x128xf32, #tpu.memory_space<vmem>>, %arg6: memref<128x128xbf16, #tpu.memory_space<vmem>>, %arg7: memref<128x128xf32, #tpu.memory_space<vmem>>, %arg8: memref<128x128xf32, #tpu.memory_space<vmem>>) attributes {dimension_semantics = [#tpu.dimension_semantics<arbitrary>], iteration_bounds = array<i64: 1>, scalar_prefetch = 0 : i64, scratch_operands = 0 : i64, tpu.core_type = #tpu.core_type<tc>, window_params = [{pipeline_mode = #tpu.pipeline_mode<synchronous>, transform_indices = @transform_0, window_bounds = array<i64: 128, 256>}, {pipeline_mode = #tpu.pipeline_mode<synchronous>, transform_indices = @transform_1, window_bounds = array<i64: 256, 128>}, {pipeline_mode = #tpu.pipeline_mode<synchronous>, transform_indices = @transform_2, window_bounds = array<i64: 1, 128>}, {pipeline_mode = #tpu.pipeline_mode<synchronous>, transform_indices = @transform_3, window_bounds = array<i64: 128, 128>}, {pipeline_mode = #tpu.pipeline_mode<synchronous>, transform_indices = @transform_4, window_bounds = array<i64: 1, 128>}, {pipeline_mode = #tpu.pipeline_mode<synchronous>, transform_indices = @transform_5, window_bounds = array<i64: 128, 128>}, {pipeline_mode = #tpu.pipeline_mode<synchronous>, transform_indices = @transform_6, window_bounds = array<i64: 128, 128>}, {pipeline_mode = #tpu.pipeline_mode<synchronous>, transform_indices = @transform_7, window_bounds = array<i64: 128, 128>}]} {
    %c0 = arith.constant 0 : index
    %c0_0 = arith.constant 0 : index
    %0 = vector.load %arg1[%c0, %c0_0] : memref<128x256xbf16, #tpu.memory_space<vmem>>, vector<128x256xbf16>
    %c0_1 = arith.constant 0 : index
    %c0_2 = arith.constant 0 : index
    %1 = vector.load %arg2[%c0_1, %c0_2] : memref<256x128xbf16, #tpu.memory_space<vmem>>, vector<256x128xbf16>
    %c0_3 = arith.constant 0 : index
    %c0_4 = arith.constant 0 : index
    %2 = vector.load %arg3[%c0_3, %c0_4] : memref<1x128xf32, #tpu.memory_space<vmem>>, vector<1x128xf32>
    %cst = arith.constant dense<0.000000e+00> : vector<128x128xf32>
    %3 = tpu.matmul %0, %1, %cst {dimension_numbers = #tpu.dot_dimension_numbers<[1], [0], [0], [1], [0, 0, 1, 1], [], []>} : vector<128x256xbf16>, vector<256x128xbf16>, vector<128x128xf32> -> vector<128x128xf32>
    %4 = vector.broadcast %2 : vector<1x128xf32> to vector<128x128xf32>
    %5 = arith.addf %3, %4 : vector<128x128xf32>
    %cst_5 = arith.constant 0.000000e+00 : f32
    %6 = vector.broadcast %cst_5 : f32 to vector<128x128xf32>
    %7 = arith.maximumf %5, %6 : vector<128x128xf32>
    %8 = arith.truncf %7 : vector<128x128xf32> to vector<128x128xbf16>
    %c0_6 = arith.constant 0 : index
    %c0_7 = arith.constant 0 : index
    %9 = vector.load %arg4[%c0_6, %c0_7] : memref<128x128xbf16, #tpu.memory_space<vmem>>, vector<128x128xbf16>
    %c0_8 = arith.constant 0 : index
    %c0_9 = arith.constant 0 : index
    %10 = vector.load %arg5[%c0_8, %c0_9] : memref<1x128xf32, #tpu.memory_space<vmem>>, vector<1x128xf32>
    %cst_10 = arith.constant dense<0.000000e+00> : vector<128x128xf32>
    %11 = tpu.matmul %8, %9, %cst_10 {dimension_numbers = #tpu.dot_dimension_numbers<[1], [0], [0], [1], [0, 0, 1, 1], [], []>} : vector<128x128xbf16>, vector<128x128xbf16>, vector<128x128xf32> -> vector<128x128xf32>
    %12 = vector.broadcast %10 : vector<1x128xf32> to vector<128x128xf32>
    %13 = arith.addf %11, %12 : vector<128x128xf32>
    %cst_11 = arith.constant 0.000000e+00 : f32
    %14 = vector.broadcast %cst_11 : f32 to vector<128x128xf32>
    %15 = arith.maximumf %13, %14 : vector<128x128xf32>
    %16 = arith.truncf %15 : vector<128x128xf32> to vector<128x128xbf16>
    %c0_12 = arith.constant 0 : index
    %c0_13 = arith.constant 0 : index
    %17 = vector.load %arg6[%c0_12, %c0_13] : memref<128x128xbf16, #tpu.memory_space<vmem>>, vector<128x128xbf16>
    %c0_14 = arith.constant 0 : index
    %c0_15 = arith.constant 0 : index
    %18 = vector.load %arg7[%c0_14, %c0_15] : memref<128x128xf32, #tpu.memory_space<vmem>>, vector<128x128xf32>
    %cst_16 = arith.constant dense<0.000000e+00> : vector<128x128xf32>
    %19 = tpu.matmul %16, %17, %cst_16 {dimension_numbers = #tpu.dot_dimension_numbers<[1], [0], [0], [1], [0, 0, 1, 1], [], []>} : vector<128x128xbf16>, vector<128x128xbf16>, vector<128x128xf32> -> vector<128x128xf32>
    %20 = arith.addf %19, %18 : vector<128x128xf32>
    %c0_17 = arith.constant 0 : index
    %c0_18 = arith.constant 0 : index
    %21 = vector.load %arg8[%c0_17, %c0_18] : memref<128x128xf32, #tpu.memory_space<vmem>>, vector<128x128xf32>
    tpu.vector_store %arg8[%c0_17, %c0_18], %20 {strides = array<i32>} : memref<128x128xf32, #tpu.memory_space<vmem>>, vector<128x128xf32>,
    return
  }
  func.func @transform_0(%arg0: i32) -> (i32, i32) {
    %c0_i32 = arith.constant 0 : i32
    %c0_i32_0 = arith.constant 0 : i32
    %c0_i32_1 = arith.constant 0 : i32
    return %c0_i32, %c0_i32_0 : i32, i32
  }
  func.func @transform_1(%arg0: i32) -> (i32, i32) {
    %c0_i32 = arith.constant 0 : i32
    %c0_i32_0 = arith.constant 0 : i32
    %c0_i32_1 = arith.constant 0 : i32
    return %c0_i32, %c0_i32_0 : i32, i32
  }
  func.func @transform_2(%arg0: i32) -> (i32, i32) {
    %c0_i32 = arith.constant 0 : i32
    %c0_i32_0 = arith.constant 0 : i32
    %c0_i32_1 = arith.constant 0 : i32
    return %c0_i32, %c0_i32_0 : i32, i32
  }
  func.func @transform_3(%arg0: i32) -> (i32, i32) {
    %c0_i32 = arith.constant 0 : i32
    %c0_i32_0 = arith.constant 0 : i32
    %c0_i32_1 = arith.constant 0 : i32
    return %c0_i32, %c0_i32_0 : i32, i32
  }
  func.func @transform_4(%arg0: i32) -> (i32, i32) {
    %c0_i32 = arith.constant 0 : i32
    %c0_i32_0 = arith.constant 0 : i32
    %c0_i32_1 = arith.constant 0 : i32
    return %c0_i32, %c0_i32_0 : i32, i32
  }
  func.func @transform_5(%arg0: i32) -> (i32, i32) {
    %c0_i32 = arith.constant 0 : i32
    %c0_i32_0 = arith.constant 0 : i32
    %c0_i32_1 = arith.constant 0 : i32
    return %c0_i32, %c0_i32_0 : i32, i32
  }
  func.func @transform_6(%arg0: i32) -> (i32, i32) {
    %c0_i32 = arith.constant 0 : i32
    %c0_i32_0 = arith.constant 0 : i32
    %c0_i32_1 = arith.constant 0 : i32
    return %c0_i32, %c0_i32_0 : i32, i32
  }
  func.func @transform_7(%arg0: i32) -> (i32, i32) {
    %c0_i32 = arith.constant 0 : i32
    %c0_i32_0 = arith.constant 0 : i32
    %c0_i32_1 = arith.constant 0 : i32
    return %c0_i32, %c0_i32_0 : i32, i32
  }
}

</mosaic_0001>

<bundles_post_ra>
// kernel: custom-call.40
= control target key start
LH: loop header
LB: loop body
LE: loop exit
PB: predicated region body
PF: predicated region fallthrough
CT: control target
= control target key end

     0   :  { %s6_s0 = inlined_call_operand.vmem [shape: f32[2,64], index: 0, kind: output, shape index: {}]  }

// kernel: custom-call.41
= control target key start
LH: loop header
LB: loop body
LE: loop exit
PB: predicated region body
PF: predicated region fallthrough
CT: control target
= control target key end

     0   :  { %s6_s0 = inlined_call_operand.vmem [shape: f32[2,32], index: 0, kind: output, shape index: {}]  }

// kernel: forward.8
= control target key start
LH: loop header
LB: loop body
LE: loop exit
PB: predicated region body
PF: predicated region fallthrough
CT: control target
= control target key end

     0   :  { %s3130_s1 = inlined_call_operand.vmem [shape: bf16[128,128], index: 1, kind: input, shape index: {}]   ;;  %s3131_s0 = inlined_call_operand.vmem [shape: bf16[512,128], index: 0, kind: input, shape index: {}]   ;;  %s3132_s3 = inlined_call_operand.vmem [shape: bf16[128,128], index: 3, kind: input, shape index: {}]   ;;  %s3133_s5 = inlined_call_operand.vmem [shape: bf16[128,128], index: 5, kind: input, shape index: {}]   ;;  %s3134_s2 = inlined_call_operand.vmem [shape: f32[1,128], index: 2, kind: input, shape index: {}]   ;;  %s3135_s4 = inlined_call_operand.vmem [shape: f32[1,128], index: 4, kind: input, shape index: {}]   ;;  %s3136_s6 = inlined_call_operand.vmem [shape: f32[1,128], index: 6, kind: input, shape index: {}]   ;;  %s3137_s7 = inlined_call_operand.vmem [shape: bf16[64,128], index: 7, kind: output, shape index: {}]  }
   0x1   :  { %v2528_v0 = vld [vmem:[%s3130_s1 + $0x38] sm:$0xff]   ;;  %v2529_v1 = vld [vmem:[%s3130_s1 + $0x30] sm:$0xff]   ;;  %v2530_v2 = vld [vmem:[%s3130_s1 + $0x28] sm:$0xff]  }
   0x2   :  { %2176 = vmatprep.subr.bf16.mxu0 %v2528_v0  ;;  %v2531_v3 = vld [vmem:[%s3130_s1 + $0x20] sm:$0xff]   ;;  %v2532_v5 = vld [vmem:[%s3130_s1 + $0x18] sm:$0xff]   ;;  %v2533_v6 = vld [vmem:[%s3130_s1 + $0x10] sm:$0xff]  }
   0x3   :  { %2177 = vmatpush3.bf16.msra.mxu0 %v2528_v0  ;;  %v2536_v4 = vld [vmem:[%s3131_s0] sm:$0xff]   ;;  %v2534_v7 = vld [vmem:[%s3130_s1 + $0x8] sm:$0xff]   ;;  %v2538_v10 = vld [vmem:[%s3131_s0 + $0x10] sm:$0xff]  }
   0x4   :  { %2178 = vmatprep.subr.bf16.mxu0 %v2529_v1  ;;  %2192 = vmatprep.mubr.bf16.mxu0 %v2536_v4  ;;  %v2535_v8 = vld [vmem:[%s3130_s1] sm:$0xff]   ;;  %v2537_v9 = vld [vmem:[%s3131_s0 + $0x8] sm:$0xff]   ;;  %v2539_v11 = vld [vmem:[%s3131_s0 + $0x18] sm:$0xff]  }
   0x5   :  { %v2540_v12 = vld [vmem:[%s3131_s0 + $0x20] sm:$0xff]   ;;  %v2568_v13 = vld [vmem:[%s3132_s3 + $0x38] sm:$0xff]   ;;  %v2569_v14 = vld [vmem:[%s3132_s3 + $0x30] sm:$0xff]  }
   0x6   :  { %2256 = vmatprep.subr.bf16.mxu1 %v2568_v13  ;;  %v2541_v15 = vld [vmem:[%s3131_s0 + $0x28] sm:$0xff]   ;;  %v2542_v17 = vld [vmem:[%s3131_s0 + $0x30] sm:$0xff]   ;;  %v2571_v18 = vld [vmem:[%s3132_s3 + $0x20] sm:$0xff]  }
   0x7   :  { %2179 = vmatpush3.bf16.msra.mxu0 %v2529_v1  ;;  %2257 = vmatpush3.bf16.msra.mxu1 %v2568_v13  ;;  %v2570_v16 = vld [vmem:[%s3132_s3 + $0x28] sm:$0xff]   ;;  %v2572_v19 = vld [vmem:[%s3132_s3 + $0x18] sm:$0xff]   ;;  %v2544_v21 = vld [vmem:[%s3131_s0 + $0x40] sm:$0xff]  }
   0x8   :  { %2180 = vmatprep.subr.bf16.mxu0 %v2530_v2  ;;  %2258 = vmatprep.subr.bf16.mxu1 %v2569_v14  ;;  %v2543_v20 = vld [vmem:[%s3131_s0 + $0x38] sm:$0xff]   ;;  %v2545_v22 = vld [vmem:[%s3131_s0 + $0x48] sm:$0xff]   ;;  %v2546_v23 = vld [vmem:[%s3131_s0 + $0x50] sm:$0xff]  }
   0x9   :  { %v2547_v24 = vld [vmem:[%s3131_s0 + $0x58] sm:$0xff]   ;;  %v2548_v25 = vld [vmem:[%s3131_s0 + $0x60] sm:$0xff]   ;;  %v2549_v26 = vld [vmem:[%s3131_s0 + $0x68] sm:$0xff]  }
   0xa   :  { %v2550_v27 = vld [vmem:[%s3131_s0 + $0x70] sm:$0xff]   ;;  %v2551_v28 = vld [vmem:[%s3131_s0 + $0x78] sm:$0xff]   ;;  %v2552_v29 = vld [vmem:[%s3131_s0 + $0x80] sm:$0xff]  }
   0xb   :  { %2181 = vmatpush3.bf16.msra.mxu0 %v2530_v2  ;;  %2259 = vmatpush3.bf16.msra.mxu1 %v2569_v14  ;;  %v2553_v30 = vld [vmem:[%s3131_s0 + $0x88] sm:$0xff]   ;;  %v2554_v31 = vld [vmem:[%s3131_s0 + $0x90] sm:$0xff]   ;;  %v2555_v33 = vld [vmem:[%s3131_s0 + $0x98] sm:$0xff]  }
   0xc   :  { %2182 = vmatprep.subr.bf16.mxu0 %v2531_v3  ;;  %2260 = vmatprep.subr.bf16.mxu1 %v2570_v16  ;;  %v2573_v32 = vld [vmem:[%s3132_s3 + $0x10] sm:$0xff]   ;;  %v2574_v34 = vld [vmem:[%s3132_s3 + $0x8] sm:$0xff]   ;;  %v2556_v35 = vld [vmem:[%s3131_s0 + $0xa0] sm:$0xff]  }
   0xd   :  { %v2575_v36 = vld [vmem:[%s3132_s3] sm:$0xff]   ;;  %v2557_v37 = vld [vmem:[%s3131_s0 + $0xa8] sm:$0xff]   ;;  %v2558_v38 = vld [vmem:[%s3131_s0 + $0xb0] sm:$0xff]  }
   0xe   :  { %v2559_v39 = vld [vmem:[%s3131_s0 + $0xb8] sm:$0xff]   ;;  %v2560_v40 = vld [vmem:[%s3131_s0 + $0xc0] sm:$0xff]   ;;  %v2561_v41 = vld [vmem:[%s3131_s0 + $0xc8] sm:$0xff]  }
   0xf   :  { %2183 = vmatpush3.bf16.msra.mxu0 %v2531_v3  ;;  %2261 = vmatpush3.bf16.msra.mxu1 %v2570_v16  ;;  %v2562_v42 = vld [vmem:[%s3131_s0 + $0xd0] sm:$0xff]   ;;  %v2563_v43 = vld [vmem:[%s3131_s0 + $0xd8] sm:$0xff]   ;;  %v2564_v44 = vld [vmem:[%s3131_s0 + $0xe0] sm:$0xff]  }
  0x10   :  { %2184 = vmatprep.subr.bf16.mxu0 %v2532_v5  ;;  %2262 = vmatprep.subr.bf16.mxu1 %v2571_v18  ;;  %v2565_v45 = vld [vmem:[%s3131_s0 + $0xe8] sm:$0xff]   ;;  %v2566_v46 = vld [vmem:[%s3131_s0 + $0xf0] sm:$0xff]   ;;  %v2567_v47 = vld [vmem:[%s3131_s0 + $0xf8] sm:$0xff]  }
  0x11   :  { %v2778_v48 = vld [vmem:[%s3133_s5 + $0x38] sm:$0xff]   ;;  %v2786_v49 = vld [vmem:[%s3133_s5 + $0x30] sm:$0xff]   ;;  %v2793_v52 = vld [vmem:[%s3134_s2] ss:$0 sm:$0xff] }
  0x12   :  { %v2801_v58 = vld [vmem:[%s3133_s5 + $0x28] sm:$0xff]   ;;  %v2806_v59 = vld [vmem:[%s3133_s5 + $0x20] sm:$0xff]   ;;  %v2815_v3 = vld [vmem:[%s3133_s5 + $0x18] sm:$0xff]  }
  0x13   :  { %2185 = vmatpush3.bf16.msra.mxu0 %v2532_v5  ;;  %2263 = vmatpush3.bf16.msra.mxu1 %v2571_v18 }
  0x14   :  { %2186 = vmatprep.subr.bf16.mxu0 %v2533_v6  ;;  %2264 = vmatprep.subr.bf16.mxu1 %v2572_v19 }
  0x17   :  { %2187 = vmatpush3.bf16.msra.mxu0 %v2533_v6  ;;  %2265 = vmatpush3.bf16.msra.mxu1 %v2572_v19  ;;  %v2835_v19 = vld [vmem:[%s3133_s5 + $0x8] sm:$0xff]  }
  0x18   :  { %2188 = vmatprep.subr.bf16.mxu0 %v2534_v7  ;;  %2266 = vmatprep.subr.bf16.mxu1 %v2573_v32 }
  0x1b   :  { %2189 = vmatpush3.bf16.msra.mxu0 %v2534_v7  ;;  %2267 = vmatpush3.bf16.msra.mxu1 %v2573_v32 }
  0x1c   :  { %2190 = vmatprep.subr.bf16.mxu0 %v2535_v8  ;;  %2268 = vmatprep.subr.bf16.mxu1 %v2574_v34 }
  0x1f   :  { %2191 = vmatpush3.bf16.msra.mxu0 %v2535_v8  ;;  %2269 = vmatpush3.bf16.msra.mxu1 %v2574_v34 }
  0x20   :  { %2270 = vmatprep.subr.bf16.mxu1 %v2575_v36  ;;  %2336 = vmatprep.subr.bf16.mxu0 %v2778_v48 }
  0x22   :  { %2193 = vmatmul.mubr.bf16.vlgmr.msra.gmra.mxu0 %v2537_v9 }
  0x23   :  { %2196 = vmatprep.mubr.bf16.mxu0 %v2538_v10  ;;  %2271 = vmatpush3.bf16.msra.mxu1 %v2575_v36 }
  0x24   :  { %2360 = vmatprep.subr.bf16.mxu1 %v2778_v48  ;;  %2337 = vmatpush3.bf16.msra.mxu0 %v2778_v48 }
  0x25   :  { %2338 = vmatprep.subr.bf16.mxu0 %v2786_v49 }
  0x28   :  { %2339 = vmatpush3.bf16.msra.mxu0 %v2786_v49 }
  0x29   :  { %2340 = vmatprep.subr.bf16.mxu0 %v2801_v58 }
  0x2a   :  { %2197 = vmatmul.mubr.bf16.gmra.mxu0 %v2539_v11  ;;  %v2825_v11 = vld [vmem:[%s3133_s5 + $0x10] sm:$0xff]  }
  0x2b   :  { %2200 = vmatprep.mubr.bf16.mxu0 %v2540_v12 }
  0x2c   :  { %2341 = vmatpush3.bf16.msra.mxu0 %v2801_v58 }
  0x2d   :  { %2342 = vmatprep.subr.bf16.mxu0 %v2806_v59 }
  0x30   :  { %2343 = vmatpush3.bf16.msra.mxu0 %v2806_v59 }
  0x31   :  { %2344 = vmatprep.subr.bf16.mxu0 %v2815_v3 }
  0x32   :  { %2201 = vmatmul.mubr.bf16.gmra.mxu0 %v2541_v15 }
  0x33   :  { %2204 = vmatprep.mubr.bf16.mxu0 %v2542_v17 }
  0x34   :  { %2345 = vmatpush3.bf16.msra.mxu0 %v2815_v3 }
  0x35   :  { %2346 = vmatprep.subr.bf16.mxu0 %v2825_v11 }
  0x38   :  { %2347 = vmatpush3.bf16.msra.mxu0 %v2825_v11 }
  0x39   :  { %2348 = vmatprep.subr.bf16.mxu0 %v2835_v19 }
  0x3a   :  { %2205 = vmatmul.mubr.bf16.gmra.mxu0 %v2543_v20 }
  0x3b   :  { %2208 = vmatprep.mubr.bf16.mxu0 %v2544_v21 }
  0x3c   :  { %2349 = vmatpush3.bf16.msra.mxu0 %v2835_v19 }
  0x42   :  { %2209 = vmatmul.mubr.bf16.gmra.mxu0 %v2545_v22 }
  0x43   :  { %2212 = vmatprep.mubr.bf16.mxu0 %v2546_v23 }
  0x4a   :  { %2213 = vmatmul.mubr.bf16.gmra.mxu0 %v2547_v24 }
  0x4b   :  { %2216 = vmatprep.mubr.bf16.mxu0 %v2548_v25 }
  0x52   :  { %2217 = vmatmul.mubr.bf16.gmra.mxu0 %v2549_v26 }
  0x53   :  { %2220 = vmatprep.mubr.bf16.mxu0 %v2550_v27 }
  0x5a   :  { %2221 = vmatmul.mubr.bf16.gmra.mxu0 %v2551_v28 }
  0x5b   :  { %2224 = vmatprep.mubr.bf16.mxu0 %v2552_v29 }
  0x62   :  { %2225 = vmatmul.mubr.bf16.gmra.mxu0 %v2553_v30 }
  0x63   :  { %2228 = vmatprep.mubr.bf16.mxu0 %v2554_v31 }
  0x6a   :  { %2229 = vmatmul.mubr.bf16.gmra.mxu0 %v2555_v33 }
  0x6b   :  { %2232 = vmatprep.mubr.bf16.mxu0 %v2556_v35 }
  0x72   :  { %2233 = vmatmul.mubr.bf16.gmra.mxu0 %v2557_v37 }
  0x73   :  { %2236 = vmatprep.mubr.bf16.mxu0 %v2558_v38 }
  0x7a   :  { %2237 = vmatmul.mubr.bf16.gmra.mxu0 %v2559_v39 }
  0x7b   :  { %2240 = vmatprep.mubr.bf16.mxu0 %v2560_v40 }
  0x82   :  { %2241 = vmatmul.mubr.bf16.gmra.mxu0 %v2561_v41 }
  0x83   :  { %2244 = vmatprep.mubr.bf16.mxu0 %v2562_v42 }
  0x8a   :  { %2245 = vmatmul.mubr.bf16.gmra.mxu0 %v2563_v43 }
  0x8b   :  { %2248 = vmatprep.mubr.bf16.mxu0 %v2564_v44 }
  0x92   :  { %2249 = vmatmul.mubr.bf16.gmra.mxu0 %v2565_v45 }
  0x93   :  { %2252 = vmatprep.mubr.bf16.mxu0 %v2566_v46 }
  0x9a   :  { %2253 = vmatmul.mubr.bf16.gmra.mxu0 %v2567_v47 }
  0xe2   :  { %v2194_v50 = vpop.f32.mrf.mxu0 }
  0xe3   :  { %v397_v56 = vadd.f32 %v2194_v50, %v2793_v52 }
  0xe4   :  { %v388_v51 = vpop.f32.mrf.mxu0 }
  0xe5   :  { %v389_v54 = vadd.f32 %v2793_v52, %v388_v51  ;;  %v645_v1 = vmax.f32 %v397_v56, 0.0 }
  0xe6   :  { %v2195_v53 = vpop.f32.mrf.mxu0 }
  0xe7   :  { %v400_v55 = vadd.f32 %v2195_v53, %v2793_v52  ;;  %v643_v63 = vmax.f32 %v389_v54, 0.0 }
  0xe8   :  { %v391_v57 = vpop.f32.mrf.mxu0 }
  0xe9   :  { %v392_v60 = vadd.f32 %v2793_v52, %v391_v57  ;;  %v646_v61 = vmax.f32 %v400_v55, 0.0 }
  0xea   :  { %v2198_v62 = vpop.f32.mrf.mxu0 }
  0xeb   :  { %v644_v0 = vmax.f32 %v392_v60, 0.0  ;;  %v708_v5 = vpack.c.bf16 %v646_v61, %v645_v1  ;;  %v413_v9 = vadd.f32 %v2198_v62, %v2793_v52 }
  0xec   :  { %v404_v2 = vpop.f32.mrf.mxu0 }
  0xed   :  { %v707_v4 = vpack.c.bf16 %v644_v0, %v643_v63  ;;  %v405_v7 = vadd.f32 %v2793_v52, %v404_v2  ;;  %v649_v17 = vmax.f32 %v413_v9, 0.0 }
  0xee   :  { %v2199_v6 = vpop.f32.mrf.mxu0 }
  0xef   :  { %v416_v8 = vadd.f32 %v2199_v6, %v2793_v52  ;;  %2272 = vmatprep.mubr.bf16.mxu1 %v707_v4  ;;  %v647_v15 = vmax.f32 %v405_v7, 0.0 }
  0xf0   :  { %v407_v10 = vpop.f32.mrf.mxu0  ;;  %2273 = vmatmul.mubr.bf16.vlgmr.msra.gmra.mxu1 %v708_v5 }
  0xf1   :  { %v408_v12 = vadd.f32 %v2793_v52, %v407_v10  ;;  %2361 = vmatpush3.bf16.msra.mxu1 %v2778_v48  ;;  %v650_v13 = vmax.f32 %v416_v8, 0.0 }
  0xf2   :  { %v2202_v14 = vpop.f32.mrf.mxu0  ;;  %2362 = vmatprep.subr.bf16.mxu1 %v2786_v49 }
  0xf3   :  { %v648_v16 = vmax.f32 %v408_v12, 0.0  ;;  %v710_v21 = vpack.c.bf16 %v650_v13, %v649_v17  ;;  %v429_v25 = vadd.f32 %v2202_v14, %v2793_v52 }
  0xf4   :  { %v420_v18 = vpop.f32.mrf.mxu0 }
  0xf5   :  { %v709_v20 = vpack.c.bf16 %v648_v16, %v647_v15  ;;  %2363 = vmatpush3.bf16.msra.mxu1 %v2786_v49  ;;  %v421_v23 = vadd.f32 %v2793_v52, %v420_v18  ;;  %v653_v32 = vmax.f32 %v429_v25, 0.0 }
  0xf6   :  { %v2203_v22 = vpop.f32.mrf.mxu0  ;;  %2364 = vmatprep.subr.bf16.mxu1 %v2801_v58 }
  0xf7   :  { %v432_v24 = vadd.f32 %v2203_v22, %v2793_v52  ;;  %2276 = vmatprep.mubr.bf16.mxu1 %v709_v20  ;;  %v651_v30 = vmax.f32 %v421_v23, 0.0 }
  0xf8   :  { %v423_v26 = vpop.f32.mrf.mxu0  ;;  %2277 = vmatmul.mubr.bf16.gmra.mxu1 %v710_v21 }
  0xf9   :  { %v424_v27 = vadd.f32 %v2793_v52, %v423_v26  ;;  %2365 = vmatpush3.bf16.msra.mxu1 %v2801_v58  ;;  %v654_v28 = vmax.f32 %v432_v24, 0.0 }
  0xfa   :  { %v2206_v29 = vpop.f32.mrf.mxu0  ;;  %2366 = vmatprep.subr.bf16.mxu1 %v2806_v59 }
  0xfb   :  { %v652_v31 = vmax.f32 %v424_v27, 0.0  ;;  %v712_v35 = vpack.c.bf16 %v654_v28, %v653_v32  ;;  %v445_v39 = vadd.f32 %v2206_v29, %v2793_v52 }
  0xfc   :  { %v436_v33 = vpop.f32.mrf.mxu0 }
  0xfd   :  { %v711_v34 = vpack.c.bf16 %v652_v31, %v651_v30  ;;  %2367 = vmatpush3.bf16.msra.mxu1 %v2806_v59  ;;  %v437_v37 = vadd.f32 %v2793_v52, %v436_v33  ;;  %v657_v46 = vmax.f32 %v445_v39, 0.0 }
  0xfe   :  { %v2207_v36 = vpop.f32.mrf.mxu0  ;;  %2368 = vmatprep.subr.bf16.mxu1 %v2815_v3 }
  0xff   :  { %v448_v38 = vadd.f32 %v2207_v36, %v2793_v52  ;;  %2280 = vmatprep.mubr.bf16.mxu1 %v711_v34  ;;  %v655_v44 = vmax.f32 %v437_v37, 0.0 }
 0x100   :  { %v439_v40 = vpop.f32.mrf.mxu0  ;;  %2281 = vmatmul.mubr.bf16.gmra.mxu1 %v712_v35 }
 0x101   :  { %v440_v41 = vadd.f32 %v2793_v52, %v439_v40  ;;  %2369 = vmatpush3.bf16.msra.mxu1 %v2815_v3  ;;  %v658_v42 = vmax.f32 %v448_v38, 0.0 }
 0x102   :  { %v2210_v43 = vpop.f32.mrf.mxu0  ;;  %2370 = vmatprep.subr.bf16.mxu1 %v2825_v11 }
 0x103   :  { %v656_v45 = vmax.f32 %v440_v41, 0.0  ;;  %v714_v51 = vpack.c.bf16 %v658_v42, %v657_v46  ;;  %v461_v56 = vadd.f32 %v2210_v43, %v2793_v52 }
 0x104   :  { %v452_v47 = vpop.f32.mrf.mxu0 }
 0x105   :  { %v713_v50 = vpack.c.bf16 %v656_v45, %v655_v44  ;;  %2371 = vmatpush3.bf16.msra.mxu1 %v2825_v11  ;;  %v453_v54 = vadd.f32 %v2793_v52, %v452_v47  ;;  %v661_v1 = vmax.f32 %v461_v56, 0.0 }
 0x106   :  { %v2211_v53 = vpop.f32.mrf.mxu0  ;;  %2372 = vmatprep.subr.bf16.mxu1 %v2835_v19 }
 0x107   :  { %v464_v55 = vadd.f32 %v2211_v53, %v2793_v52  ;;  %2284 = vmatprep.mubr.bf16.mxu1 %v713_v50  ;;  %v659_v63 = vmax.f32 %v453_v54, 0.0 }
 0x108   :  { %v455_v57 = vpop.f32.mrf.mxu0  ;;  %2285 = vmatmul.mubr.bf16.gmra.mxu1 %v714_v51 }
 0x109   :  { %v456_v60 = vadd.f32 %v2793_v52, %v455_v57  ;;  %2373 = vmatpush3.bf16.msra.mxu1 %v2835_v19  ;;  %v662_v61 = vmax.f32 %v464_v55, 0.0 }
 0x10a   :  { %v2214_v62 = vpop.f32.mrf.mxu0 }
 0x10b   :  { %v660_v0 = vmax.f32 %v456_v60, 0.0  ;;  %v716_v5 = vpack.c.bf16 %v662_v61, %v661_v1  ;;  %v477_v9 = vadd.f32 %v2214_v62, %v2793_v52 }
 0x10c   :  { %v468_v2 = vpop.f32.mrf.mxu0 }
 0x10d   :  { %v715_v4 = vpack.c.bf16 %v660_v0, %v659_v63  ;;  %v469_v7 = vadd.f32 %v2793_v52, %v468_v2  ;;  %v665_v17 = vmax.f32 %v477_v9, 0.0 }
 0x10e   :  { %v2215_v6 = vpop.f32.mrf.mxu0 }
 0x10f   :  { %v480_v8 = vadd.f32 %v2215_v6, %v2793_v52  ;;  %2288 = vmatprep.mubr.bf16.mxu1 %v715_v4  ;;  %v663_v15 = vmax.f32 %v469_v7, 0.0 }
 0x110   :  { %v471_v10 = vpop.f32.mrf.mxu0  ;;  %2289 = vmatmul.mubr.bf16.gmra.mxu1 %v716_v5 }
 0x111   :  { %v472_v12 = vadd.f32 %v2793_v52, %v471_v10  ;;  %v666_v13 = vmax.f32 %v480_v8, 0.0 }
 0x112   :  { %v2218_v14 = vpop.f32.mrf.mxu0 }
 0x113   :  { %v664_v16 = vmax.f32 %v472_v12, 0.0  ;;  %v718_v21 = vpack.c.bf16 %v666_v13, %v665_v17  ;;  %v493_v25 = vadd.f32 %v2218_v14, %v2793_v52 }
 0x114   :  { %v484_v18 = vpop.f32.mrf.mxu0 }
 0x115   :  { %v717_v20 = vpack.c.bf16 %v664_v16, %v663_v15  ;;  %v485_v23 = vadd.f32 %v2793_v52, %v484_v18  ;;  %v669_v32 = vmax.f32 %v493_v25, 0.0 }
 0x116   :  { %v2219_v22 = vpop.f32.mrf.mxu0 }
 0x117   :  { %v496_v24 = vadd.f32 %v2219_v22, %v2793_v52  ;;  %2292 = vmatprep.mubr.bf16.mxu1 %v717_v20  ;;  %v667_v30 = vmax.f32 %v485_v23, 0.0 }
 0x118   :  { %v487_v26 = vpop.f32.mrf.mxu0  ;;  %2293 = vmatmul.mubr.bf16.gmra.mxu1 %v718_v21 }
 0x119   :  { %v488_v27 = vadd.f32 %v2793_v52, %v487_v26  ;;  %v670_v28 = vmax.f32 %v496_v24, 0.0 }
 0x11a   :  { %v2222_v29 = vpop.f32.mrf.mxu0 }
 0x11b   :  { %v668_v31 = vmax.f32 %v488_v27, 0.0  ;;  %v720_v35 = vpack.c.bf16 %v670_v28, %v669_v32  ;;  %v509_v39 = vadd.f32 %v2222_v29, %v2793_v52  ;;  %v2889_v27 = vld [vmem:[%s3133_s5] sm:$0xff]  }
 0x11c   :  { %v500_v33 = vpop.f32.mrf.mxu0  ;;  %2350 = vmatprep.subr.bf16.mxu0 %v2889_v27  ;;  %2374 = vmatprep.subr.bf16.mxu1 %v2889_v27 }
 0x11d   :  { %v719_v34 = vpack.c.bf16 %v668_v31, %v667_v30  ;;  %v501_v37 = vadd.f32 %v2793_v52, %v500_v33  ;;  %v673_v46 = vmax.f32 %v509_v39, 0.0  ;;  %2351 = vmatpush3.bf16.msra.mxu0 %v2889_v27  ;;  %2375 = vmatpush3.bf16.msra.mxu1 %v2889_v27 }
 0x11e   :  { %v2223_v36 = vpop.f32.mrf.mxu0  ;;  %2384 = vmatprep.subr.bf16.mxu0 %v2778_v48  ;;  %2408 = vmatprep.subr.bf16.mxu1 %v2778_v48 }
 0x11f   :  { %v512_v38 = vadd.f32 %v2223_v36, %v2793_v52  ;;  %2296 = vmatprep.mubr.bf16.mxu1 %v719_v34  ;;  %v671_v44 = vmax.f32 %v501_v37, 0.0 }
 0x120   :  { %v503_v40 = vpop.f32.mrf.mxu0  ;;  %2297 = vmatmul.mubr.bf16.gmra.mxu1 %v720_v35 }
 0x121   :  { %v504_v41 = vadd.f32 %v2793_v52, %v503_v40  ;;  %v674_v42 = vmax.f32 %v512_v38, 0.0 }
 0x122   :  { %v2226_v43 = vpop.f32.mrf.mxu0 }
 0x123   :  { %v672_v45 = vmax.f32 %v504_v41, 0.0  ;;  %v722_v51 = vpack.c.bf16 %v674_v42, %v673_v46  ;;  %v525_v56 = vadd.f32 %v2226_v43, %v2793_v52 }
 0x124   :  { %v516_v47 = vpop.f32.mrf.mxu0 }
 0x125   :  { %v721_v50 = vpack.c.bf16 %v672_v45, %v671_v44  ;;  %v517_v54 = vadd.f32 %v2793_v52, %v516_v47  ;;  %v677_v1 = vmax.f32 %v525_v56, 0.0 }
 0x126   :  { %v2227_v53 = vpop.f32.mrf.mxu0 }
 0x127   :  { %v528_v55 = vadd.f32 %v2227_v53, %v2793_v52  ;;  %2300 = vmatprep.mubr.bf16.mxu1 %v721_v50  ;;  %v675_v63 = vmax.f32 %v517_v54, 0.0 }
 0x128   :  { %v519_v57 = vpop.f32.mrf.mxu0  ;;  %2301 = vmatmul.mubr.bf16.gmra.mxu1 %v722_v51 }
 0x129   :  { %v520_v60 = vadd.f32 %v2793_v52, %v519_v57  ;;  %v678_v61 = vmax.f32 %v528_v55, 0.0 }
 0x12a   :  { %v2230_v62 = vpop.f32.mrf.mxu0 }
 0x12b   :  { %v676_v0 = vmax.f32 %v520_v60, 0.0  ;;  %v724_v5 = vpack.c.bf16 %v678_v61, %v677_v1  ;;  %v541_v9 = vadd.f32 %v2230_v62, %v2793_v52 }
 0x12c   :  { %v532_v2 = vpop.f32.mrf.mxu0 }
 0x12d   :  { %v723_v4 = vpack.c.bf16 %v676_v0, %v675_v63  ;;  %v533_v7 = vadd.f32 %v2793_v52, %v532_v2  ;;  %v681_v17 = vmax.f32 %v541_v9, 0.0 }
 0x12e   :  { %v2231_v6 = vpop.f32.mrf.mxu0 }
 0x12f   :  { %v544_v8 = vadd.f32 %v2231_v6, %v2793_v52  ;;  %2304 = vmatprep.mubr.bf16.mxu1 %v723_v4  ;;  %v679_v15 = vmax.f32 %v533_v7, 0.0 }
 0x130   :  { %v535_v10 = vpop.f32.mrf.mxu0  ;;  %2305 = vmatmul.mubr.bf16.gmra.mxu1 %v724_v5 }
 0x131   :  { %v536_v12 = vadd.f32 %v2793_v52, %v535_v10  ;;  %v682_v13 = vmax.f32 %v544_v8, 0.0 }
 0x132   :  { %v2234_v14 = vpop.f32.mrf.mxu0 }
 0x133   :  { %v680_v16 = vmax.f32 %v536_v12, 0.0  ;;  %v726_v21 = vpack.c.bf16 %v682_v13, %v681_v17  ;;  %v557_v25 = vadd.f32 %v2234_v14, %v2793_v52 }
 0x134   :  { %v548_v18 = vpop.f32.mrf.mxu0 }
 0x135   :  { %v725_v20 = vpack.c.bf16 %v680_v16, %v679_v15  ;;  %v549_v23 = vadd.f32 %v2793_v52, %v548_v18  ;;  %v685_v33 = vmax.f32 %v557_v25, 0.0 }
 0x136   :  { %v2235_v22 = vpop.f32.mrf.mxu0 }
 0x137   :  { %v560_v24 = vadd.f32 %v2235_v22, %v2793_v52  ;;  %2308 = vmatprep.mubr.bf16.mxu1 %v725_v20  ;;  %v683_v31 = vmax.f32 %v549_v23, 0.0 }
 0x138   :  { %v551_v26 = vpop.f32.mrf.mxu0  ;;  %2309 = vmatmul.mubr.bf16.gmra.mxu1 %v726_v21 }
 0x139   :  { %v552_v28 = vadd.f32 %v2793_v52, %v551_v26  ;;  %v686_v29 = vmax.f32 %v560_v24, 0.0 }
 0x13a   :  { %v2238_v30 = vpop.f32.mrf.mxu0 }
 0x13b   :  { %v684_v32 = vmax.f32 %v552_v28, 0.0  ;;  %v728_v36 = vpack.c.bf16 %v686_v29, %v685_v33  ;;  %v573_v40 = vadd.f32 %v2238_v30, %v2793_v52 }
 0x13c   :  { %v564_v34 = vpop.f32.mrf.mxu0 }
 0x13d   :  { %v727_v35 = vpack.c.bf16 %v684_v32, %v683_v31  ;;  %v565_v38 = vadd.f32 %v2793_v52, %v564_v34  ;;  %v689_v47 = vmax.f32 %v573_v40, 0.0 }
 0x13e   :  { %v2239_v37 = vpop.f32.mrf.mxu0 }
 0x13f   :  { %v576_v39 = vadd.f32 %v2239_v37, %v2793_v52  ;;  %2312 = vmatprep.mubr.bf16.mxu1 %v727_v35  ;;  %v687_v45 = vmax.f32 %v565_v38, 0.0 }
 0x140   :  { %v567_v41 = vpop.f32.mrf.mxu0  ;;  %2313 = vmatmul.mubr.bf16.gmra.mxu1 %v728_v36 }
 0x141   :  { %v568_v42 = vadd.f32 %v2793_v52, %v567_v41  ;;  %v690_v43 = vmax.f32 %v576_v39, 0.0 }
 0x142   :  { %v2242_v44 = vpop.f32.mrf.mxu0 }
 0x143   :  { %v688_v46 = vmax.f32 %v568_v42, 0.0  ;;  %v730_v53 = vpack.c.bf16 %v690_v43, %v689_v47  ;;  %v589_v57 = vadd.f32 %v2242_v44, %v2793_v52 }
 0x144   :  { %v580_v50 = vpop.f32.mrf.mxu0 }
 0x145   :  { %v729_v51 = vpack.c.bf16 %v688_v46, %v687_v45  ;;  %v581_v55 = vadd.f32 %v2793_v52, %v580_v50  ;;  %v693_v2 = vmax.f32 %v589_v57, 0.0 }
 0x146   :  { %v2243_v54 = vpop.f32.mrf.mxu0 }
 0x147   :  { %v592_v56 = vadd.f32 %v2243_v54, %v2793_v52  ;;  %2316 = vmatprep.mubr.bf16.mxu1 %v729_v51  ;;  %v691_v0 = vmax.f32 %v581_v55, 0.0  ;;  %v2921_v55 = vld [vmem:[%s3135_s4] ss:$0 sm:$0xff] }
 0x148   :  { %v583_v60 = vpop.f32.mrf.mxu0  ;;  %2317 = vmatmul.mubr.bf16.gmra.mxu1 %v730_v53 }
 0x149   :  { %v584_v61 = vadd.f32 %v2793_v52, %v583_v60  ;;  %v694_v62 = vmax.f32 %v592_v56, 0.0 }
 0x14a   :  { %v2246_v63 = vpop.f32.mrf.mxu0 }
 0x14b   :  { %v692_v1 = vmax.f32 %v584_v61, 0.0  ;;  %v732_v6 = vpack.c.bf16 %v694_v62, %v693_v2  ;;  %v605_v10 = vadd.f32 %v2246_v63, %v2793_v52 }
 0x14c   :  { %v596_v4 = vpop.f32.mrf.mxu0 }
 0x14d   :  { %v731_v5 = vpack.c.bf16 %v692_v1, %v691_v0  ;;  %v597_v8 = vadd.f32 %v2793_v52, %v596_v4  ;;  %v697_v18 = vmax.f32 %v605_v10, 0.0 }
 0x14e   :  { %v2247_v7 = vpop.f32.mrf.mxu0 }
 0x14f   :  { %v608_v9 = vadd.f32 %v2247_v7, %v2793_v52  ;;  %2320 = vmatprep.mubr.bf16.mxu1 %v731_v5  ;;  %v695_v16 = vmax.f32 %v597_v8, 0.0 }
 0x150   :  { %v599_v12 = vpop.f32.mrf.mxu0  ;;  %2321 = vmatmul.mubr.bf16.gmra.mxu1 %v732_v6 }
 0x151   :  { %v600_v13 = vadd.f32 %v2793_v52, %v599_v12  ;;  %v698_v14 = vmax.f32 %v608_v9, 0.0 }
 0x152   :  { %v2250_v15 = vpop.f32.mrf.mxu0 }
 0x153   :  { %v696_v17 = vmax.f32 %v600_v13, 0.0  ;;  %v734_v22 = vpack.c.bf16 %v698_v14, %v697_v18  ;;  %v621_v26 = vadd.f32 %v2250_v15, %v2793_v52 }
 0x154   :  { %v612_v20 = vpop.f32.mrf.mxu0 }
 0x155   :  { %v733_v21 = vpack.c.bf16 %v696_v17, %v695_v16  ;;  %v613_v24 = vadd.f32 %v2793_v52, %v612_v20  ;;  %v701_v34 = vmax.f32 %v621_v26, 0.0 }
 0x156   :  { %v2251_v23 = vpop.f32.mrf.mxu0 }
 0x157   :  { %v624_v25 = vadd.f32 %v2251_v23, %v2793_v52  ;;  %2324 = vmatprep.mubr.bf16.mxu1 %v733_v21  ;;  %v699_v32 = vmax.f32 %v613_v24, 0.0 }
 0x158   :  { %v615_v28 = vpop.f32.mrf.mxu0  ;;  %2325 = vmatmul.mubr.bf16.gmra.mxu1 %v734_v22 }
 0x159   :  { %v616_v29 = vadd.f32 %v2793_v52, %v615_v28  ;;  %v702_v30 = vmax.f32 %v624_v25, 0.0 }
 0x15a   :  { %v2254_v31 = vpop.f32.mrf.mxu0 }
 0x15b   :  { %v700_v33 = vmax.f32 %v616_v29, 0.0  ;;  %v736_v37 = vpack.c.bf16 %v702_v30, %v701_v34  ;;  %v637_v41 = vadd.f32 %v2254_v31, %v2793_v52 }
 0x15c   :  { %v628_v35 = vpop.f32.mrf.mxu0 }
 0x15d   :  { %v735_v36 = vpack.c.bf16 %v700_v33, %v699_v32  ;;  %v629_v39 = vadd.f32 %v2793_v52, %v628_v35  ;;  %v705_v47 = vmax.f32 %v637_v41, 0.0 }
 0x15e   :  { %v2255_v38 = vpop.f32.mrf.mxu0 }
 0x15f   :  { %v640_v40 = vadd.f32 %v2255_v38, %v2793_v52  ;;  %2328 = vmatprep.mubr.bf16.mxu1 %v735_v36  ;;  %v703_v45 = vmax.f32 %v629_v39, 0.0 }
 0x160   :  { %v631_v42 = vpop.f32.mrf.mxu0  ;;  %2329 = vmatmul.mubr.bf16.gmra.mxu1 %v736_v37 }
 0x161   :  { %v632_v43 = vadd.f32 %v2793_v52, %v631_v42  ;;  %v706_v44 = vmax.f32 %v640_v40, 0.0 }
 0x163   :  { %v704_v46 = vmax.f32 %v632_v43, 0.0  ;;  %v738_v51 = vpack.c.bf16 %v706_v44, %v705_v47 }
 0x165   :  { %v737_v50 = vpack.c.bf16 %v704_v46, %v703_v45 }
 0x167   :  { %2332 = vmatprep.mubr.bf16.mxu1 %v737_v50 }
 0x168   :  { %2333 = vmatmul.mubr.bf16.gmra.mxu1 %v738_v51 }
 0x1b0   :  { %v2274_v53 = vpop.f32.mrf.mxu1 }
 0x1b1   :  { %v853_v60 = vadd.f32 %v2274_v53, %v2921_v55 }
 0x1b2   :  { %v844_v54 = vpop.f32.mrf.mxu1 }
 0x1b3   :  { %v845_v57 = vadd.f32 %v2921_v55, %v844_v54  ;;  %v1101_v4 = vmax.f32 %v853_v60, 0.0 }
 0x1b4   :  { %v2275_v56 = vpop.f32.mrf.mxu1 }
 0x1b5   :  { %v856_v52 = vadd.f32 %v2275_v56, %v2921_v55  ;;  %v1099_v1 = vmax.f32 %v845_v57, 0.0 }
 0x1b6   :  { %v847_v61 = vpop.f32.mrf.mxu1 }
 0x1b7   :  { %v848_v62 = vadd.f32 %v2921_v55, %v847_v61  ;;  %v1102_v63 = vmax.f32 %v856_v52, 0.0 }
 0x1b8   :  { %v2278_v0 = vpop.f32.mrf.mxu1 }
 0x1b9   :  { %v1100_v2 = vmax.f32 %v848_v62, 0.0  ;;  %v1164_v7 = vpack.c.bf16 %v1102_v63, %v1101_v4  ;;  %v869_v12 = vadd.f32 %v2278_v0, %v2921_v55 }
 0x1ba   :  { %v860_v5 = vpop.f32.mrf.mxu1 }
 0x1bb   :  { %v1163_v6 = vpack.c.bf16 %v1100_v2, %v1099_v1  ;;  %v861_v9 = vadd.f32 %v2921_v55, %v860_v5  ;;  %v1105_v20 = vmax.f32 %v869_v12, 0.0 }
 0x1bc   :  { %v2279_v8 = vpop.f32.mrf.mxu1 }
 0x1bd   :  { %v872_v10 = vadd.f32 %v2279_v8, %v2921_v55  ;;  %2352 = vmatprep.mubr.bf16.mxu0 %v1163_v6  ;;  %v1103_v17 = vmax.f32 %v861_v9, 0.0 }
 0x1be   :  { %v863_v13 = vpop.f32.mrf.mxu1  ;;  %2353 = vmatmul.mubr.bf16.vlgmr.msra.gmra.mxu0 %v1164_v7 }
 0x1bf   :  { %v864_v14 = vadd.f32 %v2921_v55, %v863_v13  ;;  %2385 = vmatpush3.bf16.msra.mxu0 %v2778_v48  ;;  %v1106_v15 = vmax.f32 %v872_v10, 0.0 }
 0x1c0   :  { %v2282_v16 = vpop.f32.mrf.mxu1  ;;  %2386 = vmatprep.subr.bf16.mxu0 %v2786_v49 }
 0x1c1   :  { %v1104_v18 = vmax.f32 %v864_v14, 0.0  ;;  %v1166_v23 = vpack.c.bf16 %v1106_v15, %v1105_v20  ;;  %v885_v28 = vadd.f32 %v2282_v16, %v2921_v55 }
 0x1c2   :  { %v876_v21 = vpop.f32.mrf.mxu1 }
 0x1c3   :  { %v1165_v22 = vpack.c.bf16 %v1104_v18, %v1103_v17  ;;  %2387 = vmatpush3.bf16.msra.mxu0 %v2786_v49  ;;  %v877_v25 = vadd.f32 %v2921_v55, %v876_v21  ;;  %v1109_v35 = vmax.f32 %v885_v28, 0.0 }
 0x1c4   :  { %v2283_v24 = vpop.f32.mrf.mxu1  ;;  %2388 = vmatprep.subr.bf16.mxu0 %v2801_v58 }
 0x1c5   :  { %v888_v26 = vadd.f32 %v2283_v24, %v2921_v55  ;;  %2356 = vmatprep.mubr.bf16.mxu0 %v1165_v22  ;;  %v1107_v33 = vmax.f32 %v877_v25, 0.0 }
 0x1c6   :  { %v879_v29 = vpop.f32.mrf.mxu1  ;;  %2357 = vmatmul.mubr.bf16.gmra.mxu0 %v1166_v23 }
 0x1c7   :  { %v880_v30 = vadd.f32 %v2921_v55, %v879_v29  ;;  %2389 = vmatpush3.bf16.msra.mxu0 %v2801_v58  ;;  %v1110_v31 = vmax.f32 %v888_v26, 0.0 }
 0x1c8   :  { %v2286_v32 = vpop.f32.mrf.mxu1  ;;  %2390 = vmatprep.subr.bf16.mxu0 %v2806_v59 }
 0x1c9   :  { %v1108_v34 = vmax.f32 %v880_v30, 0.0  ;;  %v1168_v38 = vpack.c.bf16 %v1110_v31, %v1109_v35  ;;  %v901_v42 = vadd.f32 %v2286_v32, %v2921_v55 }
 0x1ca   :  { %v892_v36 = vpop.f32.mrf.mxu1 }
 0x1cb   :  { %v1167_v37 = vpack.c.bf16 %v1108_v34, %v1107_v33  ;;  %2391 = vmatpush3.bf16.msra.mxu0 %v2806_v59  ;;  %v893_v40 = vadd.f32 %v2921_v55, %v892_v36  ;;  %v1113_v51 = vmax.f32 %v901_v42, 0.0 }
 0x1cc   :  { %v2287_v39 = vpop.f32.mrf.mxu1  ;;  %2392 = vmatprep.subr.bf16.mxu0 %v2815_v3 }
 0x1cd   :  { %v904_v41 = vadd.f32 %v2287_v39, %v2921_v55  ;;  %2376 = vmatprep.mubr.bf16.mxu1 %v1167_v37  ;;  %v1111_v47 = vmax.f32 %v893_v40, 0.0 }
 0x1ce   :  { %v895_v43 = vpop.f32.mrf.mxu1  ;;  %2377 = vmatmul.mubr.bf16.vlgmr.msra.gmra.mxu1 %v1168_v38 }
 0x1cf   :  { %v896_v44 = vadd.f32 %v2921_v55, %v895_v43  ;;  %2393 = vmatpush3.bf16.msra.mxu0 %v2815_v3  ;;  %2409 = vmatpush3.bf16.msra.mxu1 %v2778_v48  ;;  %v1114_v45 = vmax.f32 %v904_v41, 0.0 }
 0x1d0   :  { %v2290_v46 = vpop.f32.mrf.mxu1  ;;  %2394 = vmatprep.subr.bf16.mxu0 %v2825_v11  ;;  %2410 = vmatprep.subr.bf16.mxu1 %v2786_v49 }
 0x1d1   :  { %v1112_v50 = vmax.f32 %v896_v44, 0.0  ;;  %v1170_v56 = vpack.c.bf16 %v1114_v45, %v1113_v51  ;;  %v917_v61 = vadd.f32 %v2290_v46, %v2921_v55 }
 0x1d2   :  { %v908_v53 = vpop.f32.mrf.mxu1 }
 0x1d3   :  { %v1169_v54 = vpack.c.bf16 %v1112_v50, %v1111_v47  ;;  %2395 = vmatpush3.bf16.msra.mxu0 %v2825_v11  ;;  %2411 = vmatpush3.bf16.msra.mxu1 %v2786_v49  ;;  %v909_v52 = vadd.f32 %v2921_v55, %v908_v53  ;;  %v1117_v5 = vmax.f32 %v917_v61, 0.0 }
 0x1d4   :  { %v2291_v57 = vpop.f32.mrf.mxu1  ;;  %2396 = vmatprep.subr.bf16.mxu0 %v2835_v19  ;;  %2412 = vmatprep.subr.bf16.mxu1 %v2801_v58 }
 0x1d5   :  { %v920_v60 = vadd.f32 %v2291_v57, %v2921_v55  ;;  %2380 = vmatprep.mubr.bf16.mxu1 %v1169_v54  ;;  %v1115_v2 = vmax.f32 %v909_v52, 0.0 }
 0x1d6   :  { %v911_v62 = vpop.f32.mrf.mxu1  ;;  %2381 = vmatmul.mubr.bf16.gmra.mxu1 %v1170_v56 }
 0x1d7   :  { %v912_v63 = vadd.f32 %v2921_v55, %v911_v62  ;;  %2397 = vmatpush3.bf16.msra.mxu0 %v2835_v19  ;;  %2413 = vmatpush3.bf16.msra.mxu1 %v2801_v58  ;;  %v1118_v0 = vmax.f32 %v920_v60, 0.0 }
 0x1d8   :  { %v2294_v1 = vpop.f32.mrf.mxu1  ;;  %2398 = vmatprep.subr.bf16.mxu0 %v2889_v27  ;;  %2414 = vmatprep.subr.bf16.mxu1 %v2806_v59 }
 0x1d9   :  { %v1116_v4 = vmax.f32 %v912_v63, 0.0  ;;  %v1172_v8 = vpack.c.bf16 %v1118_v0, %v1117_v5  ;;  %v933_v13 = vadd.f32 %v2294_v1, %v2921_v55 }
 0x1da   :  { %v924_v6 = vpop.f32.mrf.mxu1 }
 0x1db   :  { %v1171_v7 = vpack.c.bf16 %v1116_v4, %v1115_v2  ;;  %2399 = vmatpush3.bf16.msra.mxu0 %v2889_v27  ;;  %2415 = vmatpush3.bf16.msra.mxu1 %v2806_v59  ;;  %v925_v10 = vadd.f32 %v2921_v55, %v924_v6  ;;  %v1121_v21 = vmax.f32 %v933_v13, 0.0 }
 0x1dc   :  { %v2295_v9 = vpop.f32.mrf.mxu1  ;;  %2416 = vmatprep.subr.bf16.mxu1 %v2815_v3  ;;  %2432 = vmatprep.subr.bf16.mxu0 %v2778_v48 }
 0x1dd   :  { %v936_v12 = vadd.f32 %v2295_v9, %v2921_v55  ;;  %2400 = vmatprep.mubr.bf16.mxu0 %v1171_v7  ;;  %v1119_v18 = vmax.f32 %v925_v10, 0.0  ;;  %v2584_v10 = vld [vmem:[%s3133_s5 + $0x38] sm:$0xff]  }
 0x1de   :  { %v927_v14 = vpop.f32.mrf.mxu1  ;;  %2401 = vmatmul.mubr.bf16.vlgmr.msra.gmra.mxu0 %v1172_v8 }
 0x1df   :  { %v928_v15 = vadd.f32 %v2921_v55, %v927_v14  ;;  %2417 = vmatpush3.bf16.msra.mxu1 %v2815_v3  ;;  %2433 = vmatpush3.bf16.msra.mxu0 %v2778_v48  ;;  %v1122_v16 = vmax.f32 %v936_v12, 0.0 }
 0x1e0   :  { %v2298_v17 = vpop.f32.mrf.mxu1  ;;  %2418 = vmatprep.subr.bf16.mxu1 %v2825_v11  ;;  %2434 = vmatprep.subr.bf16.mxu0 %v2786_v49 }
 0x1e1   :  { %v1120_v20 = vmax.f32 %v928_v15, 0.0  ;;  %v1174_v24 = vpack.c.bf16 %v1122_v16, %v1121_v21  ;;  %v949_v29 = vadd.f32 %v2298_v17, %v2921_v55 }
 0x1e2   :  { %v940_v22 = vpop.f32.mrf.mxu1 }
 0x1e3   :  { %v1173_v23 = vpack.c.bf16 %v1120_v20, %v1119_v18  ;;  %2419 = vmatpush3.bf16.msra.mxu1 %v2825_v11  ;;  %2435 = vmatpush3.bf16.msra.mxu0 %v2786_v49  ;;  %v941_v26 = vadd.f32 %v2921_v55, %v940_v22  ;;  %v1125_v36 = vmax.f32 %v949_v29, 0.0 }
 0x1e4   :  { %v2299_v25 = vpop.f32.mrf.mxu1  ;;  %2420 = vmatprep.subr.bf16.mxu1 %v2835_v19  ;;  %2436 = vmatprep.subr.bf16.mxu0 %v2801_v58 }
 0x1e5   :  { %v952_v28 = vadd.f32 %v2299_v25, %v2921_v55  ;;  %2404 = vmatprep.mubr.bf16.mxu0 %v1173_v23  ;;  %v1123_v34 = vmax.f32 %v941_v26, 0.0 }
 0x1e6   :  { %v943_v30 = vpop.f32.mrf.mxu1  ;;  %2405 = vmatmul.mubr.bf16.gmra.mxu0 %v1174_v24  ;;  %v2585_v24 = vld [vmem:[%s3133_s5 + $0x30] sm:$0xff]  }
 0x1e7   :  { %v944_v31 = vadd.f32 %v2921_v55, %v943_v30  ;;  %2421 = vmatpush3.bf16.msra.mxu1 %v2835_v19  ;;  %2437 = vmatpush3.bf16.msra.mxu0 %v2801_v58  ;;  %v1126_v32 = vmax.f32 %v952_v28, 0.0  ;;  %v2586_v30 = vld [vmem:[%s3133_s5 + $0x28] sm:$0xff]  }
 0x1e8   :  { %v2302_v33 = vpop.f32.mrf.mxu1  ;;  %2422 = vmatprep.subr.bf16.mxu1 %v2889_v27  ;;  %2438 = vmatprep.subr.bf16.mxu0 %v2806_v59 }
 0x1e9   :  { %v1124_v35 = vmax.f32 %v944_v31, 0.0  ;;  %v1176_v39 = vpack.c.bf16 %v1126_v32, %v1125_v36  ;;  %v965_v43 = vadd.f32 %v2302_v33, %v2921_v55  ;;  %v2587_v32 = vld [vmem:[%s3133_s5 + $0x20] sm:$0xff]  }
 0x1ea   :  { %v956_v37 = vpop.f32.mrf.mxu1 }
 0x1eb   :  { %v1175_v38 = vpack.c.bf16 %v1124_v35, %v1123_v34  ;;  %2423 = vmatpush3.bf16.msra.mxu1 %v2889_v27  ;;  %2439 = vmatpush3.bf16.msra.mxu0 %v2806_v59  ;;  %v957_v41 = vadd.f32 %v2921_v55, %v956_v37  ;;  %v1129_v53 = vmax.f32 %v965_v43, 0.0 }
 0x1ec   :  { %v2303_v40 = vpop.f32.mrf.mxu1  ;;  %2440 = vmatprep.subr.bf16.mxu0 %v2815_v3  ;;  %2456 = vmatprep.subr.bf16.mxu1 %v2778_v48 }
 0x1ed   :  { %v968_v42 = vadd.f32 %v2303_v40, %v2921_v55  ;;  %2424 = vmatprep.mubr.bf16.mxu1 %v1175_v38  ;;  %v1127_v50 = vmax.f32 %v957_v41, 0.0 }
 0x1ee   :  { %v959_v44 = vpop.f32.mrf.mxu1  ;;  %2425 = vmatmul.mubr.bf16.vlgmr.msra.gmra.mxu1 %v1176_v39  ;;  %v2588_v39 = vld [vmem:[%s3133_s5 + $0x18] sm:$0xff]  }
 0x1ef   :  { %v960_v45 = vadd.f32 %v2921_v55, %v959_v44  ;;  %2441 = vmatpush3.bf16.msra.mxu0 %v2815_v3  ;;  %2457 = vmatpush3.bf16.msra.mxu1 %v2778_v48  ;;  %v1130_v46 = vmax.f32 %v968_v42, 0.0 }
 0x1f0   :  { %v2306_v47 = vpop.f32.mrf.mxu1  ;;  %2442 = vmatprep.subr.bf16.mxu0 %v2825_v11  ;;  %2458 = vmatprep.subr.bf16.mxu1 %v2786_v49 }
 0x1f1   :  { %v1128_v51 = vmax.f32 %v960_v45, 0.0  ;;  %v1178_v57 = vpack.c.bf16 %v1130_v46, %v1129_v53  ;;  %v981_v61 = vadd.f32 %v2306_v47, %v2921_v55  ;;  %v2589_v47 = vld [vmem:[%s3133_s5 + $0x10] sm:$0xff]  }
 0x1f2   :  { %v972_v54 = vpop.f32.mrf.mxu1 }
 0x1f3   :  { %v1177_v56 = vpack.c.bf16 %v1128_v51, %v1127_v50  ;;  %2443 = vmatpush3.bf16.msra.mxu0 %v2825_v11  ;;  %2459 = vmatpush3.bf16.msra.mxu1 %v2786_v49  ;;  %v973_v48 = vadd.f32 %v2921_v55, %v972_v54  ;;  %v1133_v5 = vmax.f32 %v981_v61, 0.0 }
 0x1f4   :  { %v2307_v52 = vpop.f32.mrf.mxu1  ;;  %2444 = vmatprep.subr.bf16.mxu0 %v2835_v19  ;;  %2460 = vmatprep.subr.bf16.mxu1 %v2801_v58 }
 0x1f5   :  { %v984_v60 = vadd.f32 %v2307_v52, %v2921_v55  ;;  %2428 = vmatprep.mubr.bf16.mxu1 %v1177_v56  ;;  %v1131_v2 = vmax.f32 %v973_v48, 0.0  ;;  %v2590_v48 = vld [vmem:[%s3133_s5 + $0x8] sm:$0xff]  }
 0x1f6   :  { %v975_v62 = vpop.f32.mrf.mxu1  ;;  %2429 = vmatmul.mubr.bf16.gmra.mxu1 %v1178_v57 }
 0x1f7   :  { %v976_v63 = vadd.f32 %v2921_v55, %v975_v62  ;;  %2445 = vmatpush3.bf16.msra.mxu0 %v2835_v19  ;;  %2461 = vmatpush3.bf16.msra.mxu1 %v2801_v58  ;;  %v1134_v0 = vmax.f32 %v984_v60, 0.0 }
 0x1f8   :  { %v2310_v1 = vpop.f32.mrf.mxu1  ;;  %2446 = vmatprep.subr.bf16.mxu0 %v2889_v27  ;;  %2462 = vmatprep.subr.bf16.mxu1 %v2806_v59 }
 0x1f9   :  { %v1132_v4 = vmax.f32 %v976_v63, 0.0  ;;  %v1180_v8 = vpack.c.bf16 %v1134_v0, %v1133_v5  ;;  %v997_v14 = vadd.f32 %v2310_v1, %v2921_v55 }
 0x1fa   :  { %v988_v6 = vpop.f32.mrf.mxu1 }
 0x1fb   :  { %v1179_v7 = vpack.c.bf16 %v1132_v4, %v1131_v2  ;;  %2447 = vmatpush3.bf16.msra.mxu0 %v2889_v27  ;;  %2463 = vmatpush3.bf16.msra.mxu1 %v2806_v59  ;;  %v989_v12 = vadd.f32 %v2921_v55, %v988_v6  ;;  %v1137_v21 = vmax.f32 %v997_v14, 0.0 }
 0x1fc   :  { %v2311_v9 = vpop.f32.mrf.mxu1  ;;  %2464 = vmatprep.subr.bf16.mxu1 %v2815_v3  ;;  %2480 = vmatprep.subr.bf16.mxu0 %v2584_v10 }
 0x1fd   :  { %v1000_v13 = vadd.f32 %v2311_v9, %v2921_v55  ;;  %2448 = vmatprep.mubr.bf16.mxu0 %v1179_v7  ;;  %v1135_v18 = vmax.f32 %v989_v12, 0.0 }
 0x1fe   :  { %v991_v15 = vpop.f32.mrf.mxu1  ;;  %2449 = vmatmul.mubr.bf16.vlgmr.msra.gmra.mxu0 %v1180_v8 }
 0x1ff   :  { %v992_v59 = vadd.f32 %v2921_v55, %v991_v15  ;;  %2465 = vmatpush3.bf16.msra.mxu1 %v2815_v3  ;;  %2481 = vmatpush3.bf16.msra.mxu0 %v2584_v10  ;;  %v1138_v16 = vmax.f32 %v1000_v13, 0.0 }
 0x200   :  { %v2314_v17 = vpop.f32.mrf.mxu1  ;;  %2466 = vmatprep.subr.bf16.mxu1 %v2825_v11  ;;  %2482 = vmatprep.subr.bf16.mxu0 %v2786_v49 }
 0x201   :  { %v1136_v20 = vmax.f32 %v992_v59, 0.0  ;;  %v1182_v3 = vpack.c.bf16 %v1138_v16, %v1137_v21  ;;  %v1013_v28 = vadd.f32 %v2314_v17, %v2921_v55 }
 0x202   :  { %v1004_v22 = vpop.f32.mrf.mxu1 }
 0x203   :  { %v1181_v23 = vpack.c.bf16 %v1136_v20, %v1135_v18  ;;  %2467 = vmatpush3.bf16.msra.mxu1 %v2825_v11  ;;  %2483 = vmatpush3.bf16.msra.mxu0 %v2585_v24  ;;  %v1005_v49 = vadd.f32 %v2921_v55, %v1004_v22  ;;  %v1141_v35 = vmax.f32 %v1013_v28, 0.0 }
 0x204   :  { %v2315_v25 = vpop.f32.mrf.mxu1  ;;  %2468 = vmatprep.subr.bf16.mxu1 %v2835_v19  ;;  %2484 = vmatprep.subr.bf16.mxu0 %v2801_v58 }
 0x205   :  { %v1016_v26 = vadd.f32 %v2315_v25, %v2921_v55  ;;  %2452 = vmatprep.mubr.bf16.mxu0 %v1181_v23  ;;  %v1139_v33 = vmax.f32 %v1005_v49, 0.0 }
 0x206   :  { %v1007_v29 = vpop.f32.mrf.mxu1  ;;  %2453 = vmatmul.mubr.bf16.gmra.mxu0 %v1182_v3 }
 0x207   :  { %v1008_v11 = vadd.f32 %v2921_v55, %v1007_v29  ;;  %2469 = vmatpush3.bf16.msra.mxu1 %v2835_v19  ;;  %2485 = vmatpush3.bf16.msra.mxu0 %v2586_v30  ;;  %v1142_v31 = vmax.f32 %v1016_v26, 0.0 }
 0x208   :  { %v2318_v58 = vpop.f32.mrf.mxu1  ;;  %2470 = vmatprep.subr.bf16.mxu1 %v2889_v27  ;;  %2486 = vmatprep.subr.bf16.mxu0 %v2587_v32 }
 0x209   :  { %v1140_v34 = vmax.f32 %v1008_v11, 0.0  ;;  %v1184_v19 = vpack.c.bf16 %v1142_v31, %v1141_v35  ;;  %v1029_v42 = vadd.f32 %v2318_v58, %v2921_v55 }
 0x20a   :  { %v1020_v36 = vpop.f32.mrf.mxu1 }
 0x20b   :  { %v1183_v37 = vpack.c.bf16 %v1140_v34, %v1139_v33  ;;  %2471 = vmatpush3.bf16.msra.mxu1 %v2889_v27  ;;  %2487 = vmatpush3.bf16.msra.mxu0 %v2587_v32  ;;  %v1021_v40 = vadd.f32 %v2921_v55, %v1020_v36  ;;  %v1145_v53 = vmax.f32 %v1029_v42, 0.0 }
 0x20c   :  { %v2319_v38 = vpop.f32.mrf.mxu1  ;;  %2488 = vmatprep.subr.bf16.mxu0 %v2588_v39  ;;  %2504 = vmatprep.subr.bf16.mxu1 %v2584_v10 }
 0x20d   :  { %v1032_v41 = vadd.f32 %v2319_v38, %v2921_v55  ;;  %2472 = vmatprep.mubr.bf16.mxu1 %v1183_v37  ;;  %v1143_v50 = vmax.f32 %v1021_v40, 0.0 }
 0x20e   :  { %v1023_v43 = vpop.f32.mrf.mxu1  ;;  %2473 = vmatmul.mubr.bf16.vlgmr.msra.gmra.mxu1 %v1184_v19 }
 0x20f   :  { %v1024_v44 = vadd.f32 %v2921_v55, %v1023_v43  ;;  %2489 = vmatpush3.bf16.msra.mxu0 %v2588_v39  ;;  %2505 = vmatpush3.bf16.msra.mxu1 %v2584_v10  ;;  %v1146_v45 = vmax.f32 %v1032_v41, 0.0 }
 0x210   :  { %v2322_v46 = vpop.f32.mrf.mxu1  ;;  %2490 = vmatprep.subr.bf16.mxu0 %v2589_v47  ;;  %2506 = vmatprep.subr.bf16.mxu1 %v2585_v24 }
 0x211   :  { %v1144_v51 = vmax.f32 %v1024_v44, 0.0  ;;  %v1186_v57 = vpack.c.bf16 %v1146_v45, %v1145_v53  ;;  %v1045_v62 = vadd.f32 %v2322_v46, %v2921_v55 }
 0x212   :  { %v1036_v54 = vpop.f32.mrf.mxu1 }
 0x213   :  { %v1185_v56 = vpack.c.bf16 %v1144_v51, %v1143_v50  ;;  %2491 = vmatpush3.bf16.msra.mxu0 %v2589_v47  ;;  %2507 = vmatpush3.bf16.msra.mxu1 %v2585_v24  ;;  %v1037_v60 = vadd.f32 %v2921_v55, %v1036_v54  ;;  %v1149_v6 = vmax.f32 %v1045_v62, 0.0 }
 0x214   :  { %v2323_v52 = vpop.f32.mrf.mxu1  ;;  %2492 = vmatprep.subr.bf16.mxu0 %v2590_v48  ;;  %2508 = vmatprep.subr.bf16.mxu1 %v2586_v30 }
 0x215   :  { %v1048_v61 = vadd.f32 %v2323_v52, %v2921_v55  ;;  %2476 = vmatprep.mubr.bf16.mxu1 %v1185_v56  ;;  %v1147_v4 = vmax.f32 %v1037_v60, 0.0 }
 0x216   :  { %v1039_v63 = vpop.f32.mrf.mxu1  ;;  %2477 = vmatmul.mubr.bf16.gmra.mxu1 %v1186_v57 }
 0x217   :  { %v1040_v0 = vadd.f32 %v2921_v55, %v1039_v63  ;;  %2493 = vmatpush3.bf16.msra.mxu0 %v2590_v48  ;;  %2509 = vmatpush3.bf16.msra.mxu1 %v2586_v30  ;;  %v1150_v1 = vmax.f32 %v1048_v61, 0.0 }
 0x218   :  { %v2326_v2 = vpop.f32.mrf.mxu1  ;;  %2494 = vmatprep.subr.bf16.mxu0 %v2889_v27  ;;  %2510 = vmatprep.subr.bf16.mxu1 %v2587_v32 }
 0x219   :  { %v1148_v5 = vmax.f32 %v1040_v0, 0.0  ;;  %v1188_v9 = vpack.c.bf16 %v1150_v1, %v1149_v6  ;;  %v1061_v14 = vadd.f32 %v2326_v2, %v2921_v55 }
 0x21a   :  { %v1052_v7 = vpop.f32.mrf.mxu1 }
 0x21b   :  { %v1187_v8 = vpack.c.bf16 %v1148_v5, %v1147_v4  ;;  %2495 = vmatpush3.bf16.msra.mxu0 %v2889_v27  ;;  %2511 = vmatpush3.bf16.msra.mxu1 %v2587_v32  ;;  %v1053_v12 = vadd.f32 %v2921_v55, %v1052_v7  ;;  %v1153_v21 = vmax.f32 %v1061_v14, 0.0 }
 0x21c   :  { %v2327_v10 = vpop.f32.mrf.mxu1  ;;  %2512 = vmatprep.subr.bf16.mxu1 %v2588_v39 }
 0x21d   :  { %v1064_v13 = vadd.f32 %v2327_v10, %v2921_v55  ;;  %2496 = vmatprep.mubr.bf16.mxu0 %v1187_v8  ;;  %v1151_v18 = vmax.f32 %v1053_v12, 0.0 }
 0x21e   :  { %v1055_v15 = vpop.f32.mrf.mxu1  ;;  %2497 = vmatmul.mubr.bf16.vlgmr.msra.gmra.mxu0 %v1188_v9 }
 0x21f   :  { %v1056_v59 = vadd.f32 %v2921_v55, %v1055_v15  ;;  %2513 = vmatpush3.bf16.msra.mxu1 %v2588_v39  ;;  %v1154_v16 = vmax.f32 %v1064_v13, 0.0 }
 0x220   :  { %v2330_v17 = vpop.f32.mrf.mxu1  ;;  %2514 = vmatprep.subr.bf16.mxu1 %v2589_v47 }
 0x221   :  { %v1152_v20 = vmax.f32 %v1056_v59, 0.0  ;;  %v1190_v24 = vpack.c.bf16 %v1154_v16, %v1153_v21  ;;  %v1077_v26 = vadd.f32 %v2330_v17, %v2921_v55 }
 0x222   :  { %v1068_v22 = vpop.f32.mrf.mxu1 }
 0x223   :  { %v1189_v23 = vpack.c.bf16 %v1152_v20, %v1151_v18  ;;  %2515 = vmatpush3.bf16.msra.mxu1 %v2589_v47  ;;  %v1069_v25 = vadd.f32 %v2921_v55, %v1068_v22  ;;  %v1157_v32 = vmax.f32 %v1077_v26, 0.0 }
 0x224   :  { %v2331_v3 = vpop.f32.mrf.mxu1  ;;  %2516 = vmatprep.subr.bf16.mxu1 %v2590_v48 }
 0x225   :  { %v1080_v49 = vadd.f32 %v2331_v3, %v2921_v55  ;;  %2500 = vmatprep.mubr.bf16.mxu0 %v1189_v23  ;;  %v1155_v31 = vmax.f32 %v1069_v25, 0.0 }
 0x226   :  { %v1071_v28 = vpop.f32.mrf.mxu1  ;;  %2501 = vmatmul.mubr.bf16.gmra.mxu0 %v1190_v24 }
 0x227   :  { %v1072_v29 = vadd.f32 %v2921_v55, %v1071_v28  ;;  %2517 = vmatpush3.bf16.msra.mxu1 %v2590_v48  ;;  %v1158_v11 = vmax.f32 %v1080_v49, 0.0 }
 0x228   :  { %v2334_v30 = vpop.f32.mrf.mxu1  ;;  %2518 = vmatprep.subr.bf16.mxu1 %v2889_v27 }
 0x229   :  { %v1156_v58 = vmax.f32 %v1072_v29, 0.0  ;;  %v1192_v35 = vpack.c.bf16 %v1158_v11, %v1157_v32  ;;  %v1093_v38 = vadd.f32 %v2334_v30, %v2921_v55 }
 0x22a   :  { %v1084_v33 = vpop.f32.mrf.mxu1 }
 0x22b   :  { %v1191_v34 = vpack.c.bf16 %v1156_v58, %v1155_v31  ;;  %2519 = vmatpush3.bf16.msra.mxu1 %v2889_v27  ;;  %v1085_v37 = vadd.f32 %v2921_v55, %v1084_v33  ;;  %v1161_v44 = vmax.f32 %v1093_v38, 0.0 }
 0x22c   :  { %v2335_v36 = vpop.f32.mrf.mxu1 }
 0x22d   :  { %v1096_v19 = vadd.f32 %v2335_v36, %v2921_v55  ;;  %2520 = vmatprep.mubr.bf16.mxu1 %v1191_v34  ;;  %v1159_v42 = vmax.f32 %v1085_v37, 0.0 }
 0x22e   :  { %v1087_v39 = vpop.f32.mrf.mxu1  ;;  %2521 = vmatmul.mubr.bf16.vlgmr.msra.gmra.mxu1 %v1192_v35 }
 0x22f   :  { %v1088_v40 = vadd.f32 %v2921_v55, %v1087_v39  ;;  %v1162_v41 = vmax.f32 %v1096_v19, 0.0 }
 0x231   :  { %v1160_v43 = vmax.f32 %v1088_v40, 0.0  ;;  %v1194_v46 = vpack.c.bf16 %v1162_v41, %v1161_v44 }
 0x233   :  { %v1193_v45 = vpack.c.bf16 %v1160_v43, %v1159_v42 }
 0x235   :  { %2524 = vmatprep.mubr.bf16.mxu1 %v1193_v45 }
 0x236   :  { %2525 = vmatmul.mubr.bf16.gmra.mxu1 %v1194_v46 }
 0x27e   :  { %v2354_v27 = vpop.f32.mrf.mxu0 }
 0x280   :  { %v1294_v47 = vpop.f32.mrf.mxu0 }
 0x282   :  { %v2355_v50 = vpop.f32.mrf.mxu0 }
 0x284   :  { %v1297_v51 = vpop.f32.mrf.mxu0 }
 0x286   :  { %v3076_v53 = vpop.f32.mrf.mxu0 }
 0x288   :  { %v3078_v56 = vpop.f32.mrf.mxu0 }
 0x28a   :  { %v3080_v52 = vpop.f32.mrf.mxu0 }
 0x28c   :  { %v3082_v48 = vpop.f32.mrf.mxu0 }
 0x28e   :  { %v2378_v54 = vpop.f32.mrf.mxu1 }
 0x28f   :  { %v1392_v58 = vmax.f32 %v2354_v27, %v2378_v54 }
 0x290   :  { %v1359_v57 = vpop.f32.mrf.mxu1 }
 0x291   :  { %v1390_v34 = vmax.f32 %v1294_v47, %v1359_v57 }
 0x292   :  { %v2379_v55 = vpop.f32.mrf.mxu1 }
 0x293   :  { %v1393_v36 = vmax.f32 %v2355_v50, %v2379_v55 }
 0x294   :  { %v1362_v60 = vpop.f32.mrf.mxu1 }
 0x295   :  { %v1391_v40 = vmax.f32 %v1297_v51, %v1362_v60 }
 0x296   :  { %v2382_v62 = vpop.f32.mrf.mxu1 }
 0x297   :  { %v1396_v44 = vmax.f32 %v3076_v53, %v2382_v62 }
 0x298   :  { %v1375_v0 = vpop.f32.mrf.mxu1 }
 0x29a   :  { %v3084_v2 = vpop.f32.mrf.mxu1 }
 0x29b   :  { %v1397_v51 = vmax.f32 %v3080_v52, %v3084_v2 }
 0x29c   :  { %v3086_v5 = vpop.f32.mrf.mxu1 }
 0x29e   :  { %v2402_v61 = vpop.f32.mrf.mxu0 }
 0x29f   :  { %v1465_v35 = vmax.f32 %v1392_v58, %v2402_v61 }
 0x2a0   :  { %v1432_v63 = vpop.f32.mrf.mxu0 }
 0x2a1   :  { %v1463_v37 = vmax.f32 %v1390_v34, %v1432_v63 }
 0x2a2   :  { %v2403_v1 = vpop.f32.mrf.mxu0 }
 0x2a3   :  { %v1466_v41 = vmax.f32 %v1393_v36, %v2403_v1 }
 0x2a4   :  { %v1435_v4 = vpop.f32.mrf.mxu0 }
 0x2a5   :  { %v1464_v45 = vmax.f32 %v1391_v40, %v1435_v4 }
 0x2a6   :  { %v2406_v6 = vpop.f32.mrf.mxu0 }
 0x2a7   :  { %v1469_v47 = vmax.f32 %v1396_v44, %v2406_v6 }
 0x2a8   :  { %v1448_v8 = vpop.f32.mrf.mxu0 }
 0x2aa   :  { %v2407_v10 = vpop.f32.mrf.mxu0 }
 0x2ac   :  { %v3088_v13 = vpop.f32.mrf.mxu0 }
 0x2ae   :  { %v2426_v7 = vpop.f32.mrf.mxu1 }
 0x2af   :  { %v1538_v19 = vmax.f32 %v1465_v35, %v2426_v7 }
 0x2b0   :  { %v1505_v9 = vpop.f32.mrf.mxu1 }
 0x2b1   :  { %v1536_v42 = vmax.f32 %v1463_v37, %v1505_v9 }
 0x2b2   :  { %v2427_v12 = vpop.f32.mrf.mxu1 }
 0x2b3   :  { %v1539_v46 = vmax.f32 %v1466_v41, %v2427_v12 }
 0x2b4   :  { %v1508_v14 = vpop.f32.mrf.mxu1 }
 0x2b5   :  { %v1537_v55 = vmax.f32 %v1464_v45, %v1508_v14 }
 0x2b6   :  { %v2430_v59 = vpop.f32.mrf.mxu1 }
 0x2b7   :  { %v1542_v1 = vmax.f32 %v1469_v47, %v2430_v59 }
 0x2b8   :  { %v3090_v17 = vpop.f32.mrf.mxu1 }
 0x2ba   :  { %v3092_v20 = vpop.f32.mrf.mxu1 }
 0x2bc   :  { %v3094_v22 = vpop.f32.mrf.mxu1 }
 0x2be   :  { %v2450_v15 = vpop.f32.mrf.mxu0 }
 0x2bf   :  { %v1611_v43 = vmax.f32 %v1538_v19, %v2450_v15  ;;  %v1960_v15 = vld [vmem:[%s3136_s6] ss:$0 sm:$0xff] }
 0x2c0   :  { %v1578_v16 = vpop.f32.mrf.mxu0 }
 0x2c1   :  { %v1609_v27 = vmax.f32 %v1536_v42, %v1578_v16 }
 0x2c2   :  { %v2451_v18 = vpop.f32.mrf.mxu0 }
 0x2c3   :  { %v1612_v61 = vmax.f32 %v1539_v46, %v2451_v18 }
 0x2c4   :  { %v1581_v21 = vpop.f32.mrf.mxu0 }
 0x2c5   :  { %v1610_v53 = vmax.f32 %v1537_v55, %v1581_v21 }
 0x2c6   :  { %v2454_v23 = vpop.f32.mrf.mxu0 }
 0x2c7   :  { %v1615_v52 = vmax.f32 %v1542_v1, %v2454_v23 }
 0x2c8   :  { %v1594_v3 = vpop.f32.mrf.mxu0 }
 0x2ca   :  { %v2455_v49 = vpop.f32.mrf.mxu0 }
 0x2cc   :  { %v3096_v28 = vpop.f32.mrf.mxu0 }
 0x2cd   :  { %3138 = vst [vmem:[#allocation2_spill] sm:$0xff] %v3096_v28  ;;  %v1394_v28 = vmax.f32 %v3078_v56, %v1375_v0  ;;  %v1395_v56 = vmax.f32 %v3082_v48, %v3086_v5  ;;  %v1470_v0 = vmax.f32 %v1397_v51, %v2407_v10 }
 0x2ce   :  { %v2474_v24 = vpop.f32.mrf.mxu1 }
 0x2cf   :  { %v1684_v54 = vmax.f32 %v1611_v43, %v2474_v24  ;;  %v1467_v60 = vmax.f32 %v1394_v28, %v1448_v8  ;;  %v1468_v18 = vmax.f32 %v1395_v56, %v3088_v13  ;;  %v1543_v21 = vmax.f32 %v1470_v0, %v3092_v20 }
 0x2d0   :  { %v1651_v25 = vpop.f32.mrf.mxu1 }
 0x2d1   :  { %v1682_v63 = vmax.f32 %v1609_v27, %v1651_v25  ;;  %v1540_v6 = vmax.f32 %v1467_v60, %v3090_v17  ;;  %v1616_v28 = vmax.f32 %v1543_v21, %v2455_v49 }
 0x2d2   :  { %v2475_v26 = vpop.f32.mrf.mxu1 }
 0x2d3   :  { %v1685_v62 = vmax.f32 %v1612_v61, %v2475_v26  ;;  %v1613_v24 = vmax.f32 %v1540_v6, %v1594_v3  ;;  %v1541_v26 = vmax.f32 %v1468_v18, %v3094_v22 }
 0x2d4   :  { %v1654_v29 = vpop.f32.mrf.mxu1  ;;  %v3139_v13 = vld [vmem:[#allocation2_spill] sm:$0xff] }
 0x2d5   :  { %v1683_v2 = vmax.f32 %v1610_v53, %v1654_v29  ;;  %v1614_v35 = vmax.f32 %v1541_v26, %v3139_v13 }
 0x2d6   :  { %v2478_v30 = vpop.f32.mrf.mxu1 }
 0x2d7   :  { %v1688_v48 = vmax.f32 %v1615_v52, %v2478_v30 }
 0x2d8   :  { %v3098_v32 = vpop.f32.mrf.mxu1 }
 0x2da   :  { %v3100_v38 = vpop.f32.mrf.mxu1 }
 0x2db   :  { %v1689_v20 = vmax.f32 %v1616_v28, %v3100_v38 }
 0x2dc   :  { %v1670_v57 = vpop.f32.mrf.mxu1 }
 0x2dd   :  { %v1687_v22 = vmax.f32 %v1614_v35, %v1670_v57 }
 0x2de   :  { %v2498_v11 = vpop.f32.mrf.mxu0 }
 0x2df   :  { %v1757_v7 = vmax.f32 %v1684_v54, %v2498_v11  ;;  %v1686_v11 = vmax.f32 %v1613_v24, %v3098_v32 }
 0x2e0   :  { %v1724_v31 = vpop.f32.mrf.mxu0 }
 0x2e1   :  { %v1755_v4 = vmax.f32 %v1682_v63, %v1724_v31 }
 0x2e2   :  { %v2499_v33 = vpop.f32.mrf.mxu0 }
 0x2e3   :  { %v1758_v8 = vmax.f32 %v1685_v62, %v2499_v33 }
 0x2e4   :  { %v1727_v39 = vpop.f32.mrf.mxu0 }
 0x2e5   :  { %v1756_v5 = vmax.f32 %v1683_v2, %v1727_v39 }
 0x2e6   :  { %v2502_v50 = vpop.f32.mrf.mxu0 }
 0x2e7   :  { %v1761_v29 = vmax.f32 %v1688_v48, %v2502_v50 }
 0x2e8   :  { %v1740_v14 = vpop.f32.mrf.mxu0 }
 0x2e9   :  { %v1759_v3 = vmax.f32 %v1686_v11, %v1740_v14 }
 0x2ea   :  { %v2503_v31 = vpop.f32.mrf.mxu0 }
 0x2eb   :  { %v1762_v49 = vmax.f32 %v1689_v20, %v2503_v31 }
 0x2ec   :  { %v1743_v40 = vpop.f32.mrf.mxu0 }
 0x2ed   :  { %v1760_v46 = vmax.f32 %v1687_v22, %v1743_v40 }
 0x2ee   :  { %v2522_v9 = vpop.f32.mrf.mxu1 }
 0x2ef   :  { %v1830_v12 = vmax.f32 %v1757_v7, %v2522_v9 }
 0x2f0   :  { %v1797_v16 = vpop.f32.mrf.mxu1 }
 0x2f1   :  { %v1828_v59 = vmax.f32 %v1755_v4, %v1797_v16  ;;  %v1844_v10 = vadd.f32 %v1960_v15, %v1830_v12 }
 0x2f2   :  { %v2523_v25 = vpop.f32.mrf.mxu1 }
 0x2f3   :  { %v1831_v17 = vmax.f32 %v1758_v8, %v2523_v25  ;;  %v1842_v58 = vadd.f32 %v1960_v15, %v1828_v59  ;;  %v1852_v36 = vmax.f32 %v1844_v10, 0.0 }
 0x2f4   :  { %v1800_v23 = vpop.f32.mrf.mxu1 }
 0x2f5   :  { %v1845_v33 = vadd.f32 %v1960_v15, %v1831_v17  ;;  %v1829_v34 = vmax.f32 %v1756_v5, %v1800_v23  ;;  %v1850_v41 = vmax.f32 %v1842_v58, 0.0 }
 0x2f6   :  { %v2526_v30 = vpop.f32.mrf.mxu1 }
 0x2f7   :  { %v1853_v37 = vmax.f32 %v1845_v33, 0.0  ;;  %v1843_v19 = vadd.f32 %v1960_v15, %v1829_v34  ;;  %v1834_v39 = vmax.f32 %v1761_v29, %v2526_v30 }
 0x2f8   :  { %v1813_v32 = vpop.f32.mrf.mxu1 }
 0x2f9   :  { %v1985_v42 = vpack.c.bf16 %v1853_v37, %v1852_v36  ;;  %v1851_v43 = vmax.f32 %v1843_v19, 0.0  ;;  %v1832_v44 = vmax.f32 %v1759_v3, %v1813_v32  ;;  %v1848_v27 = vadd.f32 %v1960_v15, %v1834_v39 }
 0x2fa   :  { %v2527_v45 = vpop.f32.mrf.mxu1 }
 0x2fb   :  { %1997 = vst [vmem:[%s3137_s7 + $0x8] sm:$0xff] %v1985_v42   ;;  %v1980_v38 = vpack.c.bf16 %v1851_v43, %v1850_v41  ;;  %v1835_v54 = vmax.f32 %v1762_v49, %v2527_v45  ;;  %v1846_v57 = vadd.f32 %v1960_v15, %v1832_v44  ;;  %v1856_v61 = vmax.f32 %v1848_v27, 0.0 }
 0x2fc   :  { %v1816_v47 = vpop.f32.mrf.mxu1 }
 0x2fd   :  { %1981 = vst [vmem:[%s3137_s7] sm:$0xff] %v1980_v38   ;;  %v1849_v50 = vadd.f32 %v1960_v15, %v1835_v54  ;;  %v1833_v55 = vmax.f32 %v1760_v46, %v1816_v47  ;;  %v1854_v51 = vmax.f32 %v1846_v57, 0.0 }
 0x2ff   :  { %v1857_v63 = vmax.f32 %v1849_v50, 0.0  ;;  %v1847_v7 = vadd.f32 %v1960_v15, %v1833_v55 }
 0x301   :  { %v1995_v60 = vpack.c.bf16 %v1857_v63, %v1856_v61  ;;  %v1855_v1 = vmax.f32 %v1847_v7, 0.0 }
 0x303   :  { %1999 = vst [vmem:[%s3137_s7 + $0x18] sm:$0xff] %v1995_v60   ;;  %v1990_v9 = vpack.c.bf16 %v1855_v1, %v1854_v51 }
 0x305   :  { %1998 = vst [vmem:[%s3137_s7 + $0x10] sm:$0xff] %v1990_v9  }

// kernel: custom-call.42
= control target key start
LH: loop header
LB: loop body
LE: loop exit
PB: predicated region body
PF: predicated region fallthrough
CT: control target
= control target key end

     0   :  { %s6_s0 = inlined_call_operand.vmem [shape: f32[2,16], index: 0, kind: output, shape index: {}]  }

// kernel: forward.9
= control target key start
LH: loop header
LB: loop body
LE: loop exit
PB: predicated region body
PF: predicated region fallthrough
CT: control target
= control target key end

     0   :  { %s2415_s1 = inlined_call_operand.vmem [shape: bf16[256,128], index: 1, kind: input, shape index: {}]   ;;  %s2416_s0 = inlined_call_operand.vmem [shape: bf16[256,256], index: 0, kind: input, shape index: {}]   ;;  %s2417_s3 = inlined_call_operand.vmem [shape: bf16[128,128], index: 3, kind: input, shape index: {}]   ;;  %s2418_s2 = inlined_call_operand.vmem [shape: f32[1,128], index: 2, kind: input, shape index: {}]   ;;  %s2419_s5 = inlined_call_operand.vmem [shape: bf16[128,128], index: 5, kind: input, shape index: {}]   ;;  %s2420_s4 = inlined_call_operand.vmem [shape: f32[1,128], index: 4, kind: input, shape index: {}]   ;;  %s2421_s6 = inlined_call_operand.vmem [shape: f32[1,128], index: 6, kind: input, shape index: {}]   ;;  %s2422_s7 = inlined_call_operand.vmem [shape: bf16[32,128], index: 7, kind: output, shape index: {}]  }
   0x1   :  { %v1876_v0 = vld [vmem:[%s2415_s1 + $0x78] sm:$0xff]   ;;  %v1878_v2 = vld [vmem:[%s2415_s1 + $0x70] sm:$0xff]   ;;  %v1880_v4 = vld [vmem:[%s2415_s1 + $0x68] sm:$0xff]  }
   0x2   :  { %v1877_v1 = vld [vmem:[%s2415_s1 + $0x38] sm:$0xff]   ;;  %1452 = vmatprep.subr.bf16.mxu0 %v1876_v0  ;;  %v1879_v3 = vld [vmem:[%s2415_s1 + $0x30] sm:$0xff]   ;;  %v1881_v5 = vld [vmem:[%s2415_s1 + $0x28] sm:$0xff]  }
   0x3   :  { %1453 = vmatpush3.bf16.msra.mxu0 %v1877_v1  ;;  %v1882_v6 = vld [vmem:[%s2415_s1 + $0x60] sm:$0xff]   ;;  %v1884_v8 = vld [vmem:[%s2415_s1 + $0x58] sm:$0xff]   ;;  %v1886_v10 = vld [vmem:[%s2415_s1 + $0x50] sm:$0xff]  }
   0x4   :  { %1454 = vmatprep.subr.bf16.mxu0 %v1878_v2  ;;  %v1883_v7 = vld [vmem:[%s2415_s1 + $0x20] sm:$0xff]   ;;  %v1885_v9 = vld [vmem:[%s2415_s1 + $0x18] sm:$0xff]   ;;  %v1887_v12 = vld [vmem:[%s2415_s1 + $0x10] sm:$0xff]  }
   0x5   :  { %v1894_v11 = vld [vmem:[%s2416_s0 + $0x4] ss:$8 sps:$4 sm:$0xff]   ;;  %v1892_v17 = vld [vmem:[%s2416_s0] ss:$8 sps:$4 sm:$0xff]   ;;  %v1895_v18 = vld [vmem:[%s2416_s0 + $0x14] ss:$8 sps:$4 sm:$0xff]  }
   0x6   :  { %386 = vmatprep.mubr.bf16.mxu0 %v1894_v11  ;;  %v1888_v13 = vld [vmem:[%s2415_s1 + $0x48] sm:$0xff]   ;;  %v1890_v15 = vld [vmem:[%s2415_s1 + $0x40] sm:$0xff]   ;;  %v1897_v19 = vld [vmem:[%s2416_s0 + $0x10] ss:$8 sps:$4 sm:$0xff]  }
   0x7   :  { %1455 = vmatpush3.bf16.msra.mxu0 %v1879_v3  ;;  %v1889_v14 = vld [vmem:[%s2415_s1 + $0x8] sm:$0xff]   ;;  %v1891_v16 = vld [vmem:[%s2415_s1] sm:$0xff]   ;;  %v1940_v21 = vld [vmem:[%s2417_s3 + $0x38] sm:$0xff]  }
   0x8   :  { %1456 = vmatprep.subr.bf16.mxu0 %v1880_v4  ;;  %v1898_v20 = vld [vmem:[%s2416_s0 + $0x24] ss:$8 sps:$4 sm:$0xff]   ;;  %v1941_v22 = vld [vmem:[%s2417_s3 + $0x30] sm:$0xff]   ;;  %1668 = vmatprep.subr.bf16.mxu1 %v1940_v21  ;;  %v1900_v24 = vld [vmem:[%s2416_s0 + $0x20] ss:$8 sps:$4 sm:$0xff]  }
   0x9   :  { %v1942_v23 = vld [vmem:[%s2417_s3 + $0x28] sm:$0xff]   ;;  %1669 = vmatpush3.bf16.msra.mxu1 %v1940_v21  ;;  %v1901_v25 = vld [vmem:[%s2416_s0 + $0x34] ss:$8 sps:$4 sm:$0xff]   ;;  %v1903_v26 = vld [vmem:[%s2416_s0 + $0x30] ss:$8 sps:$4 sm:$0xff]  }
   0xa   :  { %1670 = vmatprep.subr.bf16.mxu1 %v1941_v22  ;;  %v1904_v27 = vld [vmem:[%s2416_s0 + $0x44] ss:$8 sps:$4 sm:$0xff]   ;;  %v1906_v28 = vld [vmem:[%s2416_s0 + $0x40] ss:$8 sps:$4 sm:$0xff]   ;;  %v1907_v29 = vld [vmem:[%s2416_s0 + $0x54] ss:$8 sps:$4 sm:$0xff]  }
   0xb   :  { %1457 = vmatpush3.bf16.msra.mxu0 %v1881_v5  ;;  %v1909_v30 = vld [vmem:[%s2416_s0 + $0x50] ss:$8 sps:$4 sm:$0xff]   ;;  %v1910_v31 = vld [vmem:[%s2416_s0 + $0x64] ss:$8 sps:$4 sm:$0xff]   ;;  %v1912_v32 = vld [vmem:[%s2416_s0 + $0x60] ss:$8 sps:$4 sm:$0xff]  }
   0xc   :  { %1458 = vmatprep.subr.bf16.mxu0 %v1882_v6  ;;  %v1913_v33 = vld [vmem:[%s2416_s0 + $0x74] ss:$8 sps:$4 sm:$0xff]   ;;  %v1915_v34 = vld [vmem:[%s2416_s0 + $0x70] ss:$8 sps:$4 sm:$0xff]   ;;  %v1916_v35 = vld [vmem:[%s2416_s0 + $0x84] ss:$8 sps:$4 sm:$0xff]  }
   0xd   :  { %1671 = vmatpush3.bf16.msra.mxu1 %v1941_v22  ;;  %v1918_v36 = vld [vmem:[%s2416_s0 + $0x80] ss:$8 sps:$4 sm:$0xff]   ;;  %v1919_v37 = vld [vmem:[%s2416_s0 + $0x94] ss:$8 sps:$4 sm:$0xff]   ;;  %v1921_v39 = vld [vmem:[%s2416_s0 + $0x90] ss:$8 sps:$4 sm:$0xff]  }
   0xe   :  { %1672 = vmatprep.subr.bf16.mxu1 %v1942_v23  ;;  %v1943_v38 = vld [vmem:[%s2417_s3 + $0x20] sm:$0xff]   ;;  %v1944_v41 = vld [vmem:[%s2417_s3 + $0x18] sm:$0xff]   ;;  %v1945_v42 = vld [vmem:[%s2417_s3 + $0x10] sm:$0xff]  }
   0xf   :  { %1459 = vmatpush3.bf16.msra.mxu0 %v1883_v7  ;;  %v1922_v40 = vld [vmem:[%s2416_s0 + $0xa4] ss:$8 sps:$4 sm:$0xff]   ;;  %v1924_v43 = vld [vmem:[%s2416_s0 + $0xa0] ss:$8 sps:$4 sm:$0xff]   ;;  %v1925_v44 = vld [vmem:[%s2416_s0 + $0xb4] ss:$8 sps:$4 sm:$0xff]  }
  0x10   :  { %1460 = vmatprep.subr.bf16.mxu0 %v1884_v8  ;;  %v1946_v45 = vld [vmem:[%s2417_s3 + $0x8] sm:$0xff]   ;;  %v1947_v46 = vld [vmem:[%s2417_s3] sm:$0xff]   ;;  %v1927_v47 = vld [vmem:[%s2416_s0 + $0xb0] ss:$8 sps:$4 sm:$0xff]  }
  0x11   :  { %1673 = vmatpush3.bf16.msra.mxu1 %v1942_v23  ;;  %v1928_v48 = vld [vmem:[%s2416_s0 + $0xc4] ss:$8 sps:$4 sm:$0xff]   ;;  %v1930_v49 = vld [vmem:[%s2416_s0 + $0xc0] ss:$8 sps:$4 sm:$0xff]   ;;  %v1931_v50 = vld [vmem:[%s2416_s0 + $0xd4] ss:$8 sps:$4 sm:$0xff]  }
  0x12   :  { %1674 = vmatprep.subr.bf16.mxu1 %v1943_v38  ;;  %v1933_v51 = vld [vmem:[%s2416_s0 + $0xd0] ss:$8 sps:$4 sm:$0xff]   ;;  %v1934_v52 = vld [vmem:[%s2416_s0 + $0xe4] ss:$8 sps:$4 sm:$0xff]   ;;  %v1936_v53 = vld [vmem:[%s2416_s0 + $0xe0] ss:$8 sps:$4 sm:$0xff]  }
  0x13   :  { %1461 = vmatpush3.bf16.msra.mxu0 %v1885_v9  ;;  %v1937_v54 = vld [vmem:[%s2416_s0 + $0xf4] ss:$8 sps:$4 sm:$0xff]   ;;  %v1939_v55 = vld [vmem:[%s2416_s0 + $0xf0] ss:$8 sps:$4 sm:$0xff]   ;;  %v2167_v60 = vld [vmem:[%s2418_s2] ss:$0 sm:$0xff] }
  0x14   :  { %1462 = vmatprep.subr.bf16.mxu0 %v1886_v10  ;;  %v2173_v1 = vld [vmem:[%s2419_s5 + $0x38] sm:$0xff]   ;;  %v2181_v4 = vld [vmem:[%s2419_s5 + $0x30] sm:$0xff]   ;;  %v2188_v11 = vld [vmem:[%s2419_s5 + $0x28] sm:$0xff]  }
  0x15   :  { %1675 = vmatpush3.bf16.msra.mxu1 %v1943_v38  ;;  %v2225_v38 = vld [vmem:[%s2419_s5 + $0x8] sm:$0xff]  }
  0x16   :  { %1676 = vmatprep.subr.bf16.mxu1 %v1944_v41 }
  0x17   :  { %1463 = vmatpush3.bf16.msra.mxu0 %v1887_v12 }
  0x18   :  { %1464 = vmatprep.subr.bf16.mxu0 %v1888_v13 }
  0x19   :  { %1677 = vmatpush3.bf16.msra.mxu1 %v1944_v41 }
  0x1a   :  { %1678 = vmatprep.subr.bf16.mxu1 %v1945_v42 }
  0x1b   :  { %1465 = vmatpush3.bf16.msra.mxu0 %v1889_v14 }
  0x1c   :  { %1466 = vmatprep.subr.bf16.mxu0 %v1890_v15 }
  0x1d   :  { %1679 = vmatpush3.bf16.msra.mxu1 %v1945_v42 }
  0x1e   :  { %1680 = vmatprep.subr.bf16.mxu1 %v1946_v45 }
  0x1f   :  { %1467 = vmatpush3.bf16.msra.mxu0 %v1891_v16 }
  0x20   :  { %1756 = vmatprep.subr.bf16.mxu0 %v2173_v1 }
  0x21   :  { %1681 = vmatpush3.bf16.msra.mxu1 %v1946_v45 }
  0x22   :  { %387 = vmatmul.mubr.bf16.vlgmr.msra.gmra.mxu0 %v1892_v17  ;;  %1682 = vmatprep.subr.bf16.mxu1 %v1947_v46  ;;  %v2197_v17 = vld [vmem:[%s2419_s5 + $0x20] sm:$0xff]  }
  0x23   :  { %394 = vmatprep.mubr.bf16.mxu0 %v1895_v18  ;;  %1757 = vmatpush3.bf16.msra.mxu0 %v2173_v1 }
  0x24   :  { %1758 = vmatprep.subr.bf16.mxu0 %v2181_v4 }
  0x25   :  { %1683 = vmatpush3.bf16.msra.mxu1 %v1947_v46 }
  0x26   :  { %1716 = vmatprep.subr.bf16.mxu1 %v2173_v1 }
  0x27   :  { %1759 = vmatpush3.bf16.msra.mxu0 %v2181_v4 }
  0x28   :  { %1760 = vmatprep.subr.bf16.mxu0 %v2188_v11 }
  0x2a   :  { %395 = vmatmul.mubr.bf16.gmra.mxu0 %v1897_v19 }
  0x2b   :  { %402 = vmatprep.mubr.bf16.mxu0 %v1898_v20  ;;  %1761 = vmatpush3.bf16.msra.mxu0 %v2188_v11 }
  0x2c   :  { %1762 = vmatprep.subr.bf16.mxu0 %v2197_v17 }
  0x2f   :  { %1763 = vmatpush3.bf16.msra.mxu0 %v2197_v17 }
  0x32   :  { %403 = vmatmul.mubr.bf16.gmra.mxu0 %v1900_v24 }
  0x33   :  { %410 = vmatprep.mubr.bf16.mxu0 %v1901_v25  ;;  %v2205_v25 = vld [vmem:[%s2419_s5 + $0x18] sm:$0xff]  }
  0x34   :  { %1764 = vmatprep.subr.bf16.mxu0 %v2205_v25 }
  0x35   :  { %1765 = vmatpush3.bf16.msra.mxu0 %v2205_v25 }
  0x3a   :  { %411 = vmatmul.mubr.bf16.gmra.mxu0 %v1903_v26 }
  0x3b   :  { %418 = vmatprep.mubr.bf16.mxu0 %v1904_v27 }
  0x42   :  { %419 = vmatmul.mubr.bf16.gmra.mxu0 %v1906_v28 }
  0x43   :  { %426 = vmatprep.mubr.bf16.mxu0 %v1907_v29 }
  0x4a   :  { %427 = vmatmul.mubr.bf16.gmra.mxu0 %v1909_v30 }
  0x4b   :  { %434 = vmatprep.mubr.bf16.mxu0 %v1910_v31  ;;  %v2215_v31 = vld [vmem:[%s2419_s5 + $0x10] sm:$0xff]  }
  0x4c   :  { %1766 = vmatprep.subr.bf16.mxu0 %v2215_v31 }
  0x4d   :  { %1767 = vmatpush3.bf16.msra.mxu0 %v2215_v31 }
  0x4e   :  { %1768 = vmatprep.subr.bf16.mxu0 %v2225_v38 }
  0x51   :  { %1769 = vmatpush3.bf16.msra.mxu0 %v2225_v38 }
  0x52   :  { %435 = vmatmul.mubr.bf16.gmra.mxu0 %v1912_v32 }
  0x53   :  { %442 = vmatprep.mubr.bf16.mxu0 %v1913_v33 }
  0x5a   :  { %443 = vmatmul.mubr.bf16.gmra.mxu0 %v1915_v34 }
  0x5b   :  { %450 = vmatprep.mubr.bf16.mxu0 %v1916_v35 }
  0x62   :  { %451 = vmatmul.mubr.bf16.gmra.mxu0 %v1918_v36 }
  0x63   :  { %458 = vmatprep.mubr.bf16.mxu0 %v1919_v37 }
  0x6a   :  { %459 = vmatmul.mubr.bf16.gmra.mxu0 %v1921_v39 }
  0x6b   :  { %466 = vmatprep.mubr.bf16.mxu0 %v1922_v40 }
  0x72   :  { %467 = vmatmul.mubr.bf16.gmra.mxu0 %v1924_v43 }
  0x73   :  { %474 = vmatprep.mubr.bf16.mxu0 %v1925_v44 }
  0x7a   :  { %475 = vmatmul.mubr.bf16.gmra.mxu0 %v1927_v47 }
  0x7b   :  { %482 = vmatprep.mubr.bf16.mxu0 %v1928_v48 }
  0x82   :  { %483 = vmatmul.mubr.bf16.gmra.mxu0 %v1930_v49 }
  0x83   :  { %490 = vmatprep.mubr.bf16.mxu0 %v1931_v50 }
  0x8a   :  { %491 = vmatmul.mubr.bf16.gmra.mxu0 %v1933_v51 }
  0x8b   :  { %498 = vmatprep.mubr.bf16.mxu0 %v1934_v52 }
  0x92   :  { %499 = vmatmul.mubr.bf16.gmra.mxu0 %v1936_v53 }
  0x93   :  { %506 = vmatprep.mubr.bf16.mxu0 %v1937_v54 }
  0x9a   :  { %507 = vmatmul.mubr.bf16.gmra.mxu0 %v1939_v55 }
  0xe2   :  { %v1468_v56 = vpop.f32.mrf.mxu0 }
  0xe4   :  { %v1469_v57 = vpop.f32.mrf.mxu0 }
  0xe5   :  { %v1470_v58 = vadd.f32 %v1469_v57, %v1468_v56 }
  0xe6   :  { %v1471_v59 = vpop.f32.mrf.mxu0 }
  0xe7   :  { %v389_v63 = vadd.f32 %v1470_v58, %v2167_v60 }
  0xe8   :  { %v1472_v61 = vpop.f32.mrf.mxu0 }
  0xe9   :  { %v1473_v62 = vadd.f32 %v1472_v61, %v1471_v59  ;;  %v515_v6 = vmax.f32 %v389_v63, 0.0 }
  0xea   :  { %v1474_v0 = vpop.f32.mrf.mxu0 }
  0xeb   :  { %v392_v2 = vadd.f32 %v1473_v62, %v2167_v60 }
  0xec   :  { %v1475_v3 = vpop.f32.mrf.mxu0 }
  0xed   :  { %v1476_v5 = vadd.f32 %v1475_v3, %v1474_v0  ;;  %v516_v7 = vmax.f32 %v392_v2, 0.0 }
  0xee   :  { %v1477_v8 = vpop.f32.mrf.mxu0 }
  0xef   :  { %v547_v9 = vpack.c.bf16 %v516_v7, %v515_v6  ;;  %v397_v12 = vadd.f32 %v1476_v5, %v2167_v60 }
  0xf0   :  { %v1478_v10 = vpop.f32.mrf.mxu0 }
  0xf1   :  { %v1479_v13 = vadd.f32 %v1478_v10, %v1477_v8  ;;  %1684 = vmatprep.mubr.bf16.mxu1 %v547_v9  ;;  %v517_v18 = vmax.f32 %v397_v12, 0.0 }
  0xf2   :  { %v1480_v14 = vpop.f32.mrf.mxu0 }
  0xf3   :  { %v400_v15 = vadd.f32 %v1479_v13, %v2167_v60 }
  0xf4   :  { %v1481_v16 = vpop.f32.mrf.mxu0 }
  0xf5   :  { %v518_v19 = vmax.f32 %v400_v15, 0.0  ;;  %v1482_v20 = vadd.f32 %v1481_v16, %v1480_v14 }
  0xf6   :  { %v1483_v21 = vpop.f32.mrf.mxu0 }
  0xf7   :  { %v405_v22 = vadd.f32 %v1482_v20, %v2167_v60  ;;  %v548_v23 = vpack.c.bf16 %v518_v19, %v517_v18 }
  0xf8   :  { %v1484_v24 = vpop.f32.mrf.mxu0 }
  0xf9   :  { %v1485_v26 = vadd.f32 %v1484_v24, %v1483_v21  ;;  %1685 = vmatmul.mubr.bf16.vlgmr.msra.gmra.mxu1 %v548_v23  ;;  %v519_v28 = vmax.f32 %v405_v22, 0.0 }
  0xfa   :  { %v1486_v27 = vpop.f32.mrf.mxu0  ;;  %1717 = vmatpush3.bf16.msra.mxu1 %v2173_v1 }
  0xfb   :  { %v408_v29 = vadd.f32 %v1485_v26, %v2167_v60  ;;  %1718 = vmatprep.subr.bf16.mxu1 %v2181_v4 }
  0xfc   :  { %v1487_v30 = vpop.f32.mrf.mxu0 }
  0xfd   :  { %v520_v32 = vmax.f32 %v408_v29, 0.0  ;;  %v1488_v33 = vadd.f32 %v1487_v30, %v1486_v27 }
  0xfe   :  { %v1489_v34 = vpop.f32.mrf.mxu0  ;;  %1719 = vmatpush3.bf16.msra.mxu1 %v2181_v4 }
  0xff   :  { %v413_v35 = vadd.f32 %v1488_v33, %v2167_v60  ;;  %v549_v36 = vpack.c.bf16 %v520_v32, %v519_v28  ;;  %1720 = vmatprep.subr.bf16.mxu1 %v2188_v11 }
 0x100   :  { %v1490_v37 = vpop.f32.mrf.mxu0 }
 0x101   :  { %v1491_v39 = vadd.f32 %v1490_v37, %v1489_v34  ;;  %1688 = vmatprep.mubr.bf16.mxu1 %v549_v36  ;;  %v521_v41 = vmax.f32 %v413_v35, 0.0 }
 0x102   :  { %v1492_v40 = vpop.f32.mrf.mxu0  ;;  %1721 = vmatpush3.bf16.msra.mxu1 %v2188_v11 }
 0x103   :  { %v416_v42 = vadd.f32 %v1491_v39, %v2167_v60  ;;  %1722 = vmatprep.subr.bf16.mxu1 %v2197_v17 }
 0x104   :  { %v1493_v43 = vpop.f32.mrf.mxu0 }
 0x105   :  { %v522_v44 = vmax.f32 %v416_v42, 0.0  ;;  %v1494_v45 = vadd.f32 %v1493_v43, %v1492_v40 }
 0x106   :  { %v1495_v46 = vpop.f32.mrf.mxu0  ;;  %1723 = vmatpush3.bf16.msra.mxu1 %v2197_v17 }
 0x107   :  { %v421_v47 = vadd.f32 %v1494_v45, %v2167_v60  ;;  %v550_v48 = vpack.c.bf16 %v522_v44, %v521_v41  ;;  %1724 = vmatprep.subr.bf16.mxu1 %v2205_v25 }
 0x108   :  { %v1496_v49 = vpop.f32.mrf.mxu0 }
 0x109   :  { %v1497_v50 = vadd.f32 %v1496_v49, %v1495_v46  ;;  %1689 = vmatmul.mubr.bf16.gmra.mxu1 %v550_v48  ;;  %v523_v52 = vmax.f32 %v421_v47, 0.0 }
 0x10a   :  { %v1498_v51 = vpop.f32.mrf.mxu0  ;;  %1725 = vmatpush3.bf16.msra.mxu1 %v2205_v25 }
 0x10b   :  { %v424_v53 = vadd.f32 %v1497_v50, %v2167_v60  ;;  %1726 = vmatprep.subr.bf16.mxu1 %v2215_v31 }
 0x10c   :  { %v1499_v54 = vpop.f32.mrf.mxu0 }
 0x10d   :  { %v524_v55 = vmax.f32 %v424_v53, 0.0  ;;  %v1500_v56 = vadd.f32 %v1499_v54, %v1498_v51 }
 0x10e   :  { %v1501_v57 = vpop.f32.mrf.mxu0  ;;  %1727 = vmatpush3.bf16.msra.mxu1 %v2215_v31 }
 0x10f   :  { %v429_v58 = vadd.f32 %v1500_v56, %v2167_v60  ;;  %v551_v59 = vpack.c.bf16 %v524_v55, %v523_v52  ;;  %1728 = vmatprep.subr.bf16.mxu1 %v2225_v38 }
 0x110   :  { %v1502_v61 = vpop.f32.mrf.mxu0 }
 0x111   :  { %v1503_v62 = vadd.f32 %v1502_v61, %v1501_v57  ;;  %1692 = vmatprep.mubr.bf16.mxu1 %v551_v59  ;;  %v525_v0 = vmax.f32 %v429_v58, 0.0 }
 0x112   :  { %v1504_v63 = vpop.f32.mrf.mxu0  ;;  %1729 = vmatpush3.bf16.msra.mxu1 %v2225_v38 }
 0x113   :  { %v432_v2 = vadd.f32 %v1503_v62, %v2167_v60 }
 0x114   :  { %v1505_v3 = vpop.f32.mrf.mxu0 }
 0x115   :  { %v526_v5 = vmax.f32 %v432_v2, 0.0  ;;  %v1506_v6 = vadd.f32 %v1505_v3, %v1504_v63 }
 0x116   :  { %v1507_v7 = vpop.f32.mrf.mxu0 }
 0x117   :  { %v437_v8 = vadd.f32 %v1506_v6, %v2167_v60  ;;  %v552_v9 = vpack.c.bf16 %v526_v5, %v525_v0 }
 0x118   :  { %v1508_v10 = vpop.f32.mrf.mxu0 }
 0x119   :  { %v1509_v12 = vadd.f32 %v1508_v10, %v1507_v7  ;;  %1693 = vmatmul.mubr.bf16.gmra.mxu1 %v552_v9  ;;  %v527_v14 = vmax.f32 %v437_v8, 0.0  ;;  %v2258_v10 = vld [vmem:[%s2419_s5] sm:$0xff]  }
 0x11a   :  { %v1510_v13 = vpop.f32.mrf.mxu0  ;;  %1730 = vmatprep.subr.bf16.mxu1 %v2258_v10  ;;  %1770 = vmatprep.subr.bf16.mxu0 %v2258_v10 }
 0x11b   :  { %v440_v15 = vadd.f32 %v1509_v12, %v2167_v60  ;;  %1731 = vmatpush3.bf16.msra.mxu1 %v2258_v10  ;;  %1771 = vmatpush3.bf16.msra.mxu0 %v2258_v10 }
 0x11c   :  { %v1511_v16 = vpop.f32.mrf.mxu0  ;;  %1736 = vmatprep.subr.bf16.mxu1 %v2173_v1  ;;  %1796 = vmatprep.subr.bf16.mxu0 %v2173_v1 }
 0x11d   :  { %v528_v18 = vmax.f32 %v440_v15, 0.0  ;;  %v1512_v19 = vadd.f32 %v1511_v16, %v1510_v13 }
 0x11e   :  { %v1513_v20 = vpop.f32.mrf.mxu0 }
 0x11f   :  { %v445_v21 = vadd.f32 %v1512_v19, %v2167_v60  ;;  %v553_v22 = vpack.c.bf16 %v528_v18, %v527_v14 }
 0x120   :  { %v1514_v23 = vpop.f32.mrf.mxu0 }
 0x121   :  { %v1515_v24 = vadd.f32 %v1514_v23, %v1513_v20  ;;  %1696 = vmatprep.mubr.bf16.mxu1 %v553_v22  ;;  %v529_v27 = vmax.f32 %v445_v21, 0.0 }
 0x122   :  { %v1516_v26 = vpop.f32.mrf.mxu0 }
 0x123   :  { %v448_v28 = vadd.f32 %v1515_v24, %v2167_v60 }
 0x124   :  { %v1517_v29 = vpop.f32.mrf.mxu0 }
 0x125   :  { %v530_v30 = vmax.f32 %v448_v28, 0.0  ;;  %v1518_v32 = vadd.f32 %v1517_v29, %v1516_v26 }
 0x126   :  { %v1519_v33 = vpop.f32.mrf.mxu0 }
 0x127   :  { %v453_v34 = vadd.f32 %v1518_v32, %v2167_v60  ;;  %v554_v35 = vpack.c.bf16 %v530_v30, %v529_v27 }
 0x128   :  { %v1520_v36 = vpop.f32.mrf.mxu0 }
 0x129   :  { %v1521_v37 = vadd.f32 %v1520_v36, %v1519_v33  ;;  %1697 = vmatmul.mubr.bf16.gmra.mxu1 %v554_v35  ;;  %v531_v40 = vmax.f32 %v453_v34, 0.0 }
 0x12a   :  { %v1522_v39 = vpop.f32.mrf.mxu0 }
 0x12b   :  { %v456_v41 = vadd.f32 %v1521_v37, %v2167_v60 }
 0x12c   :  { %v1523_v42 = vpop.f32.mrf.mxu0 }
 0x12d   :  { %v532_v43 = vmax.f32 %v456_v41, 0.0  ;;  %v1524_v44 = vadd.f32 %v1523_v42, %v1522_v39 }
 0x12e   :  { %v1525_v45 = vpop.f32.mrf.mxu0 }
 0x12f   :  { %v461_v46 = vadd.f32 %v1524_v44, %v2167_v60  ;;  %v555_v47 = vpack.c.bf16 %v532_v43, %v531_v40 }
 0x130   :  { %v1526_v48 = vpop.f32.mrf.mxu0 }
 0x131   :  { %v1527_v49 = vadd.f32 %v1526_v48, %v1525_v45  ;;  %1700 = vmatprep.mubr.bf16.mxu1 %v555_v47  ;;  %v533_v51 = vmax.f32 %v461_v46, 0.0 }
 0x132   :  { %v1528_v50 = vpop.f32.mrf.mxu0 }
 0x133   :  { %v464_v52 = vadd.f32 %v1527_v49, %v2167_v60 }
 0x134   :  { %v1529_v53 = vpop.f32.mrf.mxu0 }
 0x135   :  { %v534_v54 = vmax.f32 %v464_v52, 0.0  ;;  %v1530_v55 = vadd.f32 %v1529_v53, %v1528_v50 }
 0x136   :  { %v1531_v56 = vpop.f32.mrf.mxu0 }
 0x137   :  { %v469_v57 = vadd.f32 %v1530_v55, %v2167_v60  ;;  %v556_v58 = vpack.c.bf16 %v534_v54, %v533_v51 }
 0x138   :  { %v1532_v59 = vpop.f32.mrf.mxu0 }
 0x139   :  { %v1533_v61 = vadd.f32 %v1532_v59, %v1531_v56  ;;  %1701 = vmatmul.mubr.bf16.gmra.mxu1 %v556_v58  ;;  %v535_v63 = vmax.f32 %v469_v57, 0.0 }
 0x13a   :  { %v1534_v62 = vpop.f32.mrf.mxu0 }
 0x13b   :  { %v472_v0 = vadd.f32 %v1533_v61, %v2167_v60 }
 0x13c   :  { %v1535_v2 = vpop.f32.mrf.mxu0 }
 0x13d   :  { %v536_v3 = vmax.f32 %v472_v0, 0.0  ;;  %v1536_v5 = vadd.f32 %v1535_v2, %v1534_v62 }
 0x13e   :  { %v1537_v6 = vpop.f32.mrf.mxu0 }
 0x13f   :  { %v477_v7 = vadd.f32 %v1536_v5, %v2167_v60  ;;  %v557_v8 = vpack.c.bf16 %v536_v3, %v535_v63 }
 0x140   :  { %v1538_v9 = vpop.f32.mrf.mxu0 }
 0x141   :  { %v1539_v12 = vadd.f32 %v1538_v9, %v1537_v6  ;;  %1704 = vmatprep.mubr.bf16.mxu1 %v557_v8  ;;  %v537_v14 = vmax.f32 %v477_v7, 0.0  ;;  %v2278_v6 = vld [vmem:[%s2420_s4] ss:$0 sm:$0xff] }
 0x142   :  { %v1540_v13 = vpop.f32.mrf.mxu0 }
 0x143   :  { %v480_v15 = vadd.f32 %v1539_v12, %v2167_v60 }
 0x144   :  { %v1541_v16 = vpop.f32.mrf.mxu0 }
 0x145   :  { %v538_v18 = vmax.f32 %v480_v15, 0.0  ;;  %v1542_v19 = vadd.f32 %v1541_v16, %v1540_v13 }
 0x146   :  { %v1543_v20 = vpop.f32.mrf.mxu0 }
 0x147   :  { %v485_v21 = vadd.f32 %v1542_v19, %v2167_v60  ;;  %v558_v22 = vpack.c.bf16 %v538_v18, %v537_v14 }
 0x148   :  { %v1544_v23 = vpop.f32.mrf.mxu0 }
 0x149   :  { %v1545_v24 = vadd.f32 %v1544_v23, %v1543_v20  ;;  %1705 = vmatmul.mubr.bf16.gmra.mxu1 %v558_v22  ;;  %v539_v27 = vmax.f32 %v485_v21, 0.0 }
 0x14a   :  { %v1546_v26 = vpop.f32.mrf.mxu0 }
 0x14b   :  { %v488_v28 = vadd.f32 %v1545_v24, %v2167_v60 }
 0x14c   :  { %v1547_v29 = vpop.f32.mrf.mxu0 }
 0x14d   :  { %v540_v30 = vmax.f32 %v488_v28, 0.0  ;;  %v1548_v32 = vadd.f32 %v1547_v29, %v1546_v26 }
 0x14e   :  { %v1549_v33 = vpop.f32.mrf.mxu0 }
 0x14f   :  { %v493_v34 = vadd.f32 %v1548_v32, %v2167_v60  ;;  %v559_v35 = vpack.c.bf16 %v540_v30, %v539_v27 }
 0x150   :  { %v1550_v36 = vpop.f32.mrf.mxu0 }
 0x151   :  { %v1551_v37 = vadd.f32 %v1550_v36, %v1549_v33  ;;  %1708 = vmatprep.mubr.bf16.mxu1 %v559_v35  ;;  %v541_v40 = vmax.f32 %v493_v34, 0.0 }
 0x152   :  { %v1552_v39 = vpop.f32.mrf.mxu0 }
 0x153   :  { %v496_v41 = vadd.f32 %v1551_v37, %v2167_v60 }
 0x154   :  { %v1553_v42 = vpop.f32.mrf.mxu0 }
 0x155   :  { %v542_v43 = vmax.f32 %v496_v41, 0.0  ;;  %v1554_v44 = vadd.f32 %v1553_v42, %v1552_v39 }
 0x156   :  { %v1555_v45 = vpop.f32.mrf.mxu0 }
 0x157   :  { %v501_v46 = vadd.f32 %v1554_v44, %v2167_v60  ;;  %v560_v47 = vpack.c.bf16 %v542_v43, %v541_v40 }
 0x158   :  { %v1556_v48 = vpop.f32.mrf.mxu0 }
 0x159   :  { %1709 = vmatmul.mubr.bf16.gmra.mxu1 %v560_v47  ;;  %v1557_v49 = vadd.f32 %v1556_v48, %v1555_v45  ;;  %v543_v51 = vmax.f32 %v501_v46, 0.0 }
 0x15a   :  { %v1558_v50 = vpop.f32.mrf.mxu0 }
 0x15b   :  { %v504_v52 = vadd.f32 %v1557_v49, %v2167_v60 }
 0x15c   :  { %v1559_v53 = vpop.f32.mrf.mxu0 }
 0x15d   :  { %v544_v54 = vmax.f32 %v504_v52, 0.0  ;;  %v1560_v55 = vadd.f32 %v1559_v53, %v1558_v50 }
 0x15e   :  { %v1561_v56 = vpop.f32.mrf.mxu0 }
 0x15f   :  { %v509_v57 = vadd.f32 %v1560_v55, %v2167_v60  ;;  %v561_v58 = vpack.c.bf16 %v544_v54, %v543_v51 }
 0x160   :  { %v1562_v59 = vpop.f32.mrf.mxu0 }
 0x161   :  { %v1563_v61 = vadd.f32 %v1562_v59, %v1561_v56  ;;  %1712 = vmatprep.mubr.bf16.mxu1 %v561_v58  ;;  %v545_v62 = vmax.f32 %v509_v57, 0.0 }
 0x163   :  { %v512_v63 = vadd.f32 %v1563_v61, %v2167_v60 }
 0x165   :  { %v546_v0 = vmax.f32 %v512_v63, 0.0 }
 0x167   :  { %v562_v2 = vpack.c.bf16 %v546_v0, %v545_v62 }
 0x169   :  { %1713 = vmatmul.mubr.bf16.gmra.mxu1 %v562_v2 }
 0x1b9   :  { %v1686_v3 = vpop.f32.mrf.mxu1 }
 0x1ba   :  { %v677_v12 = vadd.f32 %v1686_v3, %v2278_v6 }
 0x1bb   :  { %v668_v5 = vpop.f32.mrf.mxu1 }
 0x1bc   :  { %v669_v8 = vadd.f32 %v2278_v6, %v668_v5  ;;  %v797_v18 = vmax.f32 %v677_v12, 0.0 }
 0x1bd   :  { %v1687_v7 = vpop.f32.mrf.mxu1 }
 0x1be   :  { %v680_v9 = vadd.f32 %v1687_v7, %v2278_v6  ;;  %v795_v15 = vmax.f32 %v669_v8, 0.0 }
 0x1bf   :  { %v671_v13 = vpop.f32.mrf.mxu1 }
 0x1c0   :  { %v672_v60 = vadd.f32 %v2278_v6, %v671_v13  ;;  %v798_v14 = vmax.f32 %v680_v9, 0.0 }
 0x1c2   :  { %v796_v16 = vmax.f32 %v672_v60, 0.0  ;;  %v828_v20 = vpack.c.bf16 %v798_v14, %v797_v18 }
 0x1c4   :  { %v827_v19 = vpack.c.bf16 %v796_v16, %v795_v15 }
 0x1c6   :  { %1732 = vmatprep.mubr.bf16.mxu1 %v827_v19 }
 0x1c7   :  { %1733 = vmatmul.mubr.bf16.vlgmr.msra.gmra.mxu1 %v828_v20 }
 0x1c8   :  { %1737 = vmatpush3.bf16.msra.mxu1 %v2173_v1 }
 0x1c9   :  { %1738 = vmatprep.subr.bf16.mxu1 %v2181_v4  ;;  %v1690_v21 = vpop.f32.mrf.mxu1 }
 0x1ca   :  { %v693_v36 = vadd.f32 %v1690_v21, %v2278_v6 }
 0x1cb   :  { %v684_v22 = vpop.f32.mrf.mxu1 }
 0x1cc   :  { %1739 = vmatpush3.bf16.msra.mxu1 %v2181_v4  ;;  %v685_v23 = vadd.f32 %v2278_v6, %v684_v22  ;;  %v801_v46 = vmax.f32 %v693_v36, 0.0 }
 0x1cd   :  { %1740 = vmatprep.subr.bf16.mxu1 %v2188_v11  ;;  %v1691_v24 = vpop.f32.mrf.mxu1 }
 0x1ce   :  { %v799_v27 = vmax.f32 %v685_v23, 0.0  ;;  %v696_v37 = vadd.f32 %v1691_v24, %v2278_v6 }
 0x1cf   :  { %v687_v26 = vpop.f32.mrf.mxu1 }
 0x1d0   :  { %1741 = vmatpush3.bf16.msra.mxu1 %v2188_v11  ;;  %v688_v28 = vadd.f32 %v2278_v6, %v687_v26  ;;  %v802_v47 = vmax.f32 %v696_v37, 0.0 }
 0x1d1   :  { %1742 = vmatprep.subr.bf16.mxu1 %v2197_v17 }
 0x1d2   :  { %v800_v29 = vmax.f32 %v688_v28, 0.0  ;;  %v830_v51 = vpack.c.bf16 %v802_v47, %v801_v46 }
 0x1d4   :  { %v829_v30 = vpack.c.bf16 %v800_v29, %v799_v27  ;;  %1743 = vmatpush3.bf16.msra.mxu1 %v2197_v17 }
 0x1d5   :  { %1744 = vmatprep.subr.bf16.mxu1 %v2205_v25 }
 0x1d6   :  { %1752 = vmatprep.mubr.bf16.mxu1 %v829_v30 }
 0x1d8   :  { %1745 = vmatpush3.bf16.msra.mxu1 %v2205_v25 }
 0x1d9   :  { %v1694_v32 = vpop.f32.mrf.mxu1  ;;  %1746 = vmatprep.subr.bf16.mxu1 %v2215_v31 }
 0x1da   :  { %v709_v33 = vadd.f32 %v1694_v32, %v2278_v6 }
 0x1db   :  { %v700_v34 = vpop.f32.mrf.mxu1 }
 0x1dc   :  { %v701_v35 = vadd.f32 %v2278_v6, %v700_v34  ;;  %1747 = vmatpush3.bf16.msra.mxu1 %v2215_v31  ;;  %v805_v41 = vmax.f32 %v709_v33, 0.0 }
 0x1dd   :  { %v1695_v39 = vpop.f32.mrf.mxu1  ;;  %1748 = vmatprep.subr.bf16.mxu1 %v2225_v38 }
 0x1de   :  { %v712_v40 = vadd.f32 %v1695_v39, %v2278_v6  ;;  %v803_v43 = vmax.f32 %v701_v35, 0.0 }
 0x1df   :  { %v703_v42 = vpop.f32.mrf.mxu1 }
 0x1e0   :  { %v806_v44 = vmax.f32 %v712_v40, 0.0  ;;  %v704_v45 = vadd.f32 %v2278_v6, %v703_v42  ;;  %1749 = vmatpush3.bf16.msra.mxu1 %v2225_v38 }
 0x1e1   :  { %1750 = vmatprep.subr.bf16.mxu1 %v2258_v10 }
 0x1e2   :  { %v804_v48 = vmax.f32 %v704_v45, 0.0  ;;  %v832_v49 = vpack.c.bf16 %v806_v44, %v805_v41 }
 0x1e4   :  { %v831_v50 = vpack.c.bf16 %v804_v48, %v803_v43  ;;  %1751 = vmatpush3.bf16.msra.mxu1 %v2258_v10 }
 0x1e5   :  { %1776 = vmatprep.subr.bf16.mxu1 %v2173_v1 }
 0x1e6   :  { %1772 = vmatprep.mubr.bf16.mxu0 %v831_v50 }
 0x1e7   :  { %1753 = vmatmul.mubr.bf16.vlgmr.msra.gmra.mxu1 %v830_v51  ;;  %1773 = vmatmul.mubr.bf16.vlgmr.msra.gmra.mxu0 %v832_v49 }
 0x1e8   :  { %1777 = vmatpush3.bf16.msra.mxu1 %v2173_v1  ;;  %1797 = vmatpush3.bf16.msra.mxu0 %v2173_v1 }
 0x1e9   :  { %1778 = vmatprep.subr.bf16.mxu1 %v2181_v4  ;;  %1798 = vmatprep.subr.bf16.mxu0 %v2181_v4  ;;  %v1698_v52 = vpop.f32.mrf.mxu1 }
 0x1ea   :  { %v725_v3 = vadd.f32 %v1698_v52, %v2278_v6 }
 0x1eb   :  { %v716_v53 = vpop.f32.mrf.mxu1 }
 0x1ec   :  { %1779 = vmatpush3.bf16.msra.mxu1 %v2181_v4  ;;  %1799 = vmatpush3.bf16.msra.mxu0 %v2181_v4  ;;  %v717_v54 = vadd.f32 %v2278_v6, %v716_v53  ;;  %v809_v15 = vmax.f32 %v725_v3, 0.0 }
 0x1ed   :  { %1780 = vmatprep.subr.bf16.mxu1 %v2188_v11  ;;  %1800 = vmatprep.subr.bf16.mxu0 %v2188_v11  ;;  %v1699_v55 = vpop.f32.mrf.mxu1 }
 0x1ee   :  { %v807_v57 = vmax.f32 %v717_v54, 0.0  ;;  %v728_v5 = vadd.f32 %v1699_v55, %v2278_v6 }
 0x1ef   :  { %v719_v56 = vpop.f32.mrf.mxu1 }
 0x1f0   :  { %1781 = vmatpush3.bf16.msra.mxu1 %v2188_v11  ;;  %1801 = vmatpush3.bf16.msra.mxu0 %v2188_v11  ;;  %v720_v58 = vadd.f32 %v2278_v6, %v719_v56  ;;  %v810_v16 = vmax.f32 %v728_v5, 0.0 }
 0x1f1   :  { %1782 = vmatprep.subr.bf16.mxu1 %v2197_v17  ;;  %1802 = vmatprep.subr.bf16.mxu0 %v2197_v17 }
 0x1f2   :  { %v808_v59 = vmax.f32 %v720_v58, 0.0  ;;  %v834_v21 = vpack.c.bf16 %v810_v16, %v809_v15 }
 0x1f4   :  { %v833_v61 = vpack.c.bf16 %v808_v59, %v807_v57  ;;  %1783 = vmatpush3.bf16.msra.mxu1 %v2197_v17  ;;  %1803 = vmatpush3.bf16.msra.mxu0 %v2197_v17 }
 0x1f5   :  { %1784 = vmatprep.subr.bf16.mxu1 %v2205_v25  ;;  %1804 = vmatprep.subr.bf16.mxu0 %v2205_v25 }
 0x1f6   :  { %1792 = vmatprep.mubr.bf16.mxu1 %v833_v61 }
 0x1f8   :  { %1785 = vmatpush3.bf16.msra.mxu1 %v2205_v25  ;;  %1805 = vmatpush3.bf16.msra.mxu0 %v2205_v25 }
 0x1f9   :  { %v1702_v62 = vpop.f32.mrf.mxu1  ;;  %1786 = vmatprep.subr.bf16.mxu1 %v2215_v31  ;;  %1806 = vmatprep.subr.bf16.mxu0 %v2215_v31 }
 0x1fa   :  { %v741_v63 = vadd.f32 %v1702_v62, %v2278_v6 }
 0x1fb   :  { %v732_v0 = vpop.f32.mrf.mxu1 }
 0x1fc   :  { %v733_v2 = vadd.f32 %v2278_v6, %v732_v0  ;;  %1787 = vmatpush3.bf16.msra.mxu1 %v2215_v31  ;;  %1807 = vmatpush3.bf16.msra.mxu0 %v2215_v31  ;;  %v813_v9 = vmax.f32 %v741_v63, 0.0 }
 0x1fd   :  { %v1703_v7 = vpop.f32.mrf.mxu1  ;;  %1788 = vmatprep.subr.bf16.mxu1 %v2225_v38  ;;  %1808 = vmatprep.subr.bf16.mxu0 %v2225_v38 }
 0x1fe   :  { %v744_v8 = vadd.f32 %v1703_v7, %v2278_v6  ;;  %v811_v13 = vmax.f32 %v733_v2, 0.0 }
 0x1ff   :  { %v735_v12 = vpop.f32.mrf.mxu1 }
 0x200   :  { %v814_v60 = vmax.f32 %v744_v8, 0.0  ;;  %v736_v14 = vadd.f32 %v2278_v6, %v735_v12  ;;  %1789 = vmatpush3.bf16.msra.mxu1 %v2225_v38  ;;  %1809 = vmatpush3.bf16.msra.mxu0 %v2225_v38 }
 0x201   :  { %1790 = vmatprep.subr.bf16.mxu1 %v2258_v10  ;;  %1810 = vmatprep.subr.bf16.mxu0 %v2258_v10 }
 0x202   :  { %v812_v18 = vmax.f32 %v736_v14, 0.0  ;;  %v836_v19 = vpack.c.bf16 %v814_v60, %v813_v9 }
 0x204   :  { %v835_v20 = vpack.c.bf16 %v812_v18, %v811_v13  ;;  %1791 = vmatpush3.bf16.msra.mxu1 %v2258_v10  ;;  %1811 = vmatpush3.bf16.msra.mxu0 %v2258_v10 }
 0x205   :  { %1816 = vmatprep.subr.bf16.mxu1 %v2173_v1  ;;  %1836 = vmatprep.subr.bf16.mxu0 %v2173_v1 }
 0x206   :  { %1812 = vmatprep.mubr.bf16.mxu0 %v835_v20 }
 0x207   :  { %1793 = vmatmul.mubr.bf16.vlgmr.msra.gmra.mxu1 %v834_v21  ;;  %1813 = vmatmul.mubr.bf16.vlgmr.msra.gmra.mxu0 %v836_v19 }
 0x208   :  { %1817 = vmatpush3.bf16.msra.mxu1 %v2173_v1  ;;  %1837 = vmatpush3.bf16.msra.mxu0 %v2173_v1 }
 0x209   :  { %1818 = vmatprep.subr.bf16.mxu1 %v2181_v4  ;;  %1838 = vmatprep.subr.bf16.mxu0 %v2181_v4  ;;  %v1706_v22 = vpop.f32.mrf.mxu1 }
 0x20a   :  { %v757_v37 = vadd.f32 %v1706_v22, %v2278_v6 }
 0x20b   :  { %v748_v23 = vpop.f32.mrf.mxu1 }
 0x20c   :  { %1819 = vmatpush3.bf16.msra.mxu1 %v2181_v4  ;;  %1839 = vmatpush3.bf16.msra.mxu0 %v2181_v4  ;;  %v749_v24 = vadd.f32 %v2278_v6, %v748_v23  ;;  %v817_v47 = vmax.f32 %v757_v37, 0.0 }
 0x20d   :  { %1820 = vmatprep.subr.bf16.mxu1 %v2188_v11  ;;  %1840 = vmatprep.subr.bf16.mxu0 %v2188_v11  ;;  %v1707_v26 = vpop.f32.mrf.mxu1 }
 0x20e   :  { %v815_v28 = vmax.f32 %v749_v24, 0.0  ;;  %v760_v39 = vadd.f32 %v1707_v26, %v2278_v6 }
 0x20f   :  { %v751_v27 = vpop.f32.mrf.mxu1 }
 0x210   :  { %1821 = vmatpush3.bf16.msra.mxu1 %v2188_v11  ;;  %1841 = vmatpush3.bf16.msra.mxu0 %v2188_v11  ;;  %v752_v29 = vadd.f32 %v2278_v6, %v751_v27  ;;  %v818_v48 = vmax.f32 %v760_v39, 0.0 }
 0x211   :  { %1822 = vmatprep.subr.bf16.mxu1 %v2197_v17  ;;  %1842 = vmatprep.subr.bf16.mxu0 %v2197_v17 }
 0x212   :  { %v816_v30 = vmax.f32 %v752_v29, 0.0  ;;  %v838_v52 = vpack.c.bf16 %v818_v48, %v817_v47 }
 0x214   :  { %v837_v32 = vpack.c.bf16 %v816_v30, %v815_v28  ;;  %1823 = vmatpush3.bf16.msra.mxu1 %v2197_v17  ;;  %1843 = vmatpush3.bf16.msra.mxu0 %v2197_v17 }
 0x215   :  { %1824 = vmatprep.subr.bf16.mxu1 %v2205_v25  ;;  %1844 = vmatprep.subr.bf16.mxu0 %v2205_v25 }
 0x216   :  { %1832 = vmatprep.mubr.bf16.mxu1 %v837_v32 }
 0x218   :  { %1825 = vmatpush3.bf16.msra.mxu1 %v2205_v25  ;;  %1845 = vmatpush3.bf16.msra.mxu0 %v2205_v25 }
 0x219   :  { %v1710_v33 = vpop.f32.mrf.mxu1  ;;  %1826 = vmatprep.subr.bf16.mxu1 %v2215_v31  ;;  %1846 = vmatprep.subr.bf16.mxu0 %v2215_v31 }
 0x21a   :  { %v773_v34 = vadd.f32 %v1710_v33, %v2278_v6 }
 0x21b   :  { %v764_v35 = vpop.f32.mrf.mxu1 }
 0x21c   :  { %v765_v36 = vadd.f32 %v2278_v6, %v764_v35  ;;  %1827 = vmatpush3.bf16.msra.mxu1 %v2215_v31  ;;  %1847 = vmatpush3.bf16.msra.mxu0 %v2215_v31  ;;  %v821_v42 = vmax.f32 %v773_v34, 0.0 }
 0x21d   :  { %v1711_v40 = vpop.f32.mrf.mxu1  ;;  %1828 = vmatprep.subr.bf16.mxu1 %v2225_v38  ;;  %1848 = vmatprep.subr.bf16.mxu0 %v2225_v38 }
 0x21e   :  { %v776_v41 = vadd.f32 %v1711_v40, %v2278_v6  ;;  %v819_v44 = vmax.f32 %v765_v36, 0.0 }
 0x21f   :  { %v767_v43 = vpop.f32.mrf.mxu1 }
 0x220   :  { %v822_v45 = vmax.f32 %v776_v41, 0.0  ;;  %v768_v46 = vadd.f32 %v2278_v6, %v767_v43  ;;  %1829 = vmatpush3.bf16.msra.mxu1 %v2225_v38  ;;  %1849 = vmatpush3.bf16.msra.mxu0 %v2225_v38 }
 0x221   :  { %1830 = vmatprep.subr.bf16.mxu1 %v2258_v10  ;;  %1850 = vmatprep.subr.bf16.mxu0 %v2258_v10 }
 0x222   :  { %v820_v49 = vmax.f32 %v768_v46, 0.0  ;;  %v840_v50 = vpack.c.bf16 %v822_v45, %v821_v42 }
 0x224   :  { %v839_v51 = vpack.c.bf16 %v820_v49, %v819_v44  ;;  %1831 = vmatpush3.bf16.msra.mxu1 %v2258_v10  ;;  %1851 = vmatpush3.bf16.msra.mxu0 %v2258_v10 }
 0x225   :  { %1856 = vmatprep.subr.bf16.mxu1 %v2173_v1 }
 0x226   :  { %1852 = vmatprep.mubr.bf16.mxu0 %v839_v51 }
 0x227   :  { %1833 = vmatmul.mubr.bf16.vlgmr.msra.gmra.mxu1 %v838_v52  ;;  %1853 = vmatmul.mubr.bf16.vlgmr.msra.gmra.mxu0 %v840_v50 }
 0x228   :  { %1857 = vmatpush3.bf16.msra.mxu1 %v2173_v1 }
 0x229   :  { %1858 = vmatprep.subr.bf16.mxu1 %v2181_v4  ;;  %v1714_v53 = vpop.f32.mrf.mxu1 }
 0x22b   :  { %v780_v54 = vpop.f32.mrf.mxu1 }
 0x22c   :  { %1859 = vmatpush3.bf16.msra.mxu1 %v2181_v4  ;;  %v781_v55 = vadd.f32 %v2278_v6, %v780_v54  ;;  %v789_v4 = vadd.f32 %v1714_v53, %v2278_v6 }
 0x22d   :  { %1860 = vmatprep.subr.bf16.mxu1 %v2188_v11  ;;  %v1715_v56 = vpop.f32.mrf.mxu1 }
 0x22e   :  { %v823_v58 = vmax.f32 %v781_v55, 0.0  ;;  %v825_v62 = vmax.f32 %v789_v4, 0.0  ;;  %v1432_v55 = vld [vmem:[%s2421_s6] ss:$0 sm:$0xff] }
 0x22f   :  { %v783_v57 = vpop.f32.mrf.mxu1 }
 0x230   :  { %1861 = vmatpush3.bf16.msra.mxu1 %v2188_v11  ;;  %v784_v59 = vadd.f32 %v2278_v6, %v783_v57  ;;  %v792_v11 = vadd.f32 %v1715_v56, %v2278_v6 }
 0x231   :  { %1862 = vmatprep.subr.bf16.mxu1 %v2197_v17 }
 0x232   :  { %v824_v1 = vmax.f32 %v784_v59, 0.0  ;;  %v826_v63 = vmax.f32 %v792_v11, 0.0 }
 0x234   :  { %v841_v61 = vpack.c.bf16 %v824_v1, %v823_v58  ;;  %1863 = vmatpush3.bf16.msra.mxu1 %v2197_v17  ;;  %v842_v17 = vpack.c.bf16 %v826_v63, %v825_v62 }
 0x235   :  { %1864 = vmatprep.subr.bf16.mxu1 %v2205_v25 }
 0x236   :  { %1872 = vmatprep.mubr.bf16.mxu1 %v841_v61 }
 0x238   :  { %1865 = vmatpush3.bf16.msra.mxu1 %v2205_v25 }
 0x239   :  { %1866 = vmatprep.subr.bf16.mxu1 %v2215_v31 }
 0x23c   :  { %1867 = vmatpush3.bf16.msra.mxu1 %v2215_v31 }
 0x23d   :  { %1868 = vmatprep.subr.bf16.mxu1 %v2225_v38 }
 0x240   :  { %1869 = vmatpush3.bf16.msra.mxu1 %v2225_v38 }
 0x241   :  { %1870 = vmatprep.subr.bf16.mxu1 %v2258_v10 }
 0x244   :  { %1871 = vmatpush3.bf16.msra.mxu1 %v2258_v10 }
 0x247   :  { %1873 = vmatmul.mubr.bf16.vlgmr.msra.gmra.mxu1 %v842_v17 }
 0x287   :  { %v1734_v25 = vpop.f32.mrf.mxu1 }
 0x289   :  { %v942_v0 = vpop.f32.mrf.mxu1 }
 0x28b   :  { %v1735_v2 = vpop.f32.mrf.mxu1 }
 0x28d   :  { %v945_v31 = vpop.f32.mrf.mxu1 }
 0x2a7   :  { %v1754_v3 = vpop.f32.mrf.mxu1  ;;  %v1774_v5 = vpop.f32.mrf.mxu0 }
 0x2a8   :  { %v1008_v10 = vmax.f32 %v1734_v25, %v1754_v3 }
 0x2a9   :  { %v991_v7 = vpop.f32.mrf.mxu1  ;;  %v1044_v6 = vpop.f32.mrf.mxu0 }
 0x2aa   :  { %v1006_v20 = vmax.f32 %v942_v0, %v991_v7  ;;  %v1061_v22 = vmax.f32 %v1008_v10, %v1774_v5 }
 0x2ab   :  { %v1755_v8 = vpop.f32.mrf.mxu1  ;;  %v1775_v9 = vpop.f32.mrf.mxu0 }
 0x2ac   :  { %v1009_v23 = vmax.f32 %v1735_v2, %v1755_v8  ;;  %v1059_v26 = vmax.f32 %v1006_v20, %v1044_v6 }
 0x2ad   :  { %v994_v12 = vpop.f32.mrf.mxu1  ;;  %v1047_v13 = vpop.f32.mrf.mxu0 }
 0x2ae   :  { %v1007_v27 = vmax.f32 %v945_v31, %v994_v12  ;;  %v1062_v32 = vmax.f32 %v1009_v23, %v1775_v9 }
 0x2b0   :  { %v1060_v34 = vmax.f32 %v1007_v27, %v1047_v13 }
 0x2c7   :  { %v1794_v38 = vpop.f32.mrf.mxu1  ;;  %v1814_v60 = vpop.f32.mrf.mxu0 }
 0x2c8   :  { %v1114_v28 = vmax.f32 %v1061_v22, %v1794_v38 }
 0x2c9   :  { %v1097_v14 = vpop.f32.mrf.mxu1  ;;  %v1150_v15 = vpop.f32.mrf.mxu0 }
 0x2ca   :  { %v1112_v33 = vmax.f32 %v1059_v26, %v1097_v14  ;;  %v1167_v35 = vmax.f32 %v1114_v28, %v1814_v60 }
 0x2cb   :  { %v1795_v16 = vpop.f32.mrf.mxu1  ;;  %v1815_v18 = vpop.f32.mrf.mxu0 }
 0x2cc   :  { %v1115_v36 = vmax.f32 %v1062_v32, %v1795_v16  ;;  %v1165_v40 = vmax.f32 %v1112_v33, %v1150_v15 }
 0x2cd   :  { %v1100_v19 = vpop.f32.mrf.mxu1  ;;  %v1153_v24 = vpop.f32.mrf.mxu0 }
 0x2ce   :  { %v1113_v41 = vmax.f32 %v1060_v34, %v1100_v19  ;;  %v1168_v43 = vmax.f32 %v1115_v36, %v1815_v18 }
 0x2d0   :  { %v1166_v47 = vmax.f32 %v1113_v41, %v1153_v24 }
 0x2e7   :  { %v1834_v21 = vpop.f32.mrf.mxu1  ;;  %v1854_v29 = vpop.f32.mrf.mxu0 }
 0x2e8   :  { %v1220_v42 = vmax.f32 %v1167_v35, %v1834_v21 }
 0x2e9   :  { %v1203_v30 = vpop.f32.mrf.mxu1  ;;  %v1256_v37 = vpop.f32.mrf.mxu0 }
 0x2ea   :  { %v1218_v44 = vmax.f32 %v1165_v40, %v1203_v30  ;;  %v1273_v48 = vmax.f32 %v1220_v42, %v1854_v29 }
 0x2eb   :  { %v1835_v39 = vpop.f32.mrf.mxu1  ;;  %v1855_v45 = vpop.f32.mrf.mxu0 }
 0x2ec   :  { %v1221_v49 = vmax.f32 %v1168_v43, %v1835_v39  ;;  %v1271_v51 = vmax.f32 %v1218_v44, %v1256_v37 }
 0x2ed   :  { %v1206_v46 = vpop.f32.mrf.mxu1  ;;  %v1259_v54 = vpop.f32.mrf.mxu0 }
 0x2ee   :  { %v1219_v52 = vmax.f32 %v1166_v47, %v1206_v46  ;;  %v1274_v57 = vmax.f32 %v1221_v49, %v1855_v45 }
 0x2f0   :  { %v1272_v1 = vmax.f32 %v1219_v52, %v1259_v54 }
 0x307   :  { %v1874_v50 = vpop.f32.mrf.mxu1 }
 0x308   :  { %v1326_v53 = vmax.f32 %v1273_v48, %v1874_v50 }
 0x309   :  { %v1309_v56 = vpop.f32.mrf.mxu1 }
 0x30a   :  { %v1324_v58 = vmax.f32 %v1271_v51, %v1309_v56  ;;  %v1336_v61 = vadd.f32 %v1432_v55, %v1326_v53 }
 0x30b   :  { %v1875_v59 = vpop.f32.mrf.mxu1 }
 0x30c   :  { %v1327_v4 = vmax.f32 %v1274_v57, %v1875_v59  ;;  %v1334_v62 = vadd.f32 %v1432_v55, %v1324_v58  ;;  %v1340_v25 = vmax.f32 %v1336_v61, 0.0 }
 0x30d   :  { %v1312_v11 = vpop.f32.mrf.mxu1 }
 0x30e   :  { %v1337_v63 = vadd.f32 %v1432_v55, %v1327_v4  ;;  %v1325_v17 = vmax.f32 %v1272_v1, %v1312_v11  ;;  %v1338_v31 = vmax.f32 %v1334_v62, 0.0 }
 0x310   :  { %v1341_v0 = vmax.f32 %v1337_v63, 0.0  ;;  %v1335_v2 = vadd.f32 %v1432_v55, %v1325_v17 }
 0x312   :  { %v1449_v3 = vpack.c.bf16 %v1341_v0, %v1340_v25  ;;  %v1339_v5 = vmax.f32 %v1335_v2, 0.0 }
 0x314   :  { %1451 = vst [vmem:[%s2422_s7 + $0x8] sm:$0xff] %v1449_v3   ;;  %v1444_v7 = vpack.c.bf16 %v1339_v5, %v1338_v31 }
 0x316   :  { %1445 = vst [vmem:[%s2422_s7] sm:$0xff] %v1444_v7  }

// kernel: custom-call.43
= control target key start
LH: loop header
LB: loop body
LE: loop exit
PB: predicated region body
PF: predicated region fallthrough
CT: control target
= control target key end

     0   :  { %s6_s0 = inlined_call_operand.vmem [shape: f32[2,8], index: 0, kind: output, shape index: {}]  }

// kernel: forward.10
= control target key start
LH: loop header
LB: loop body
LE: loop exit
PB: predicated region body
PF: predicated region fallthrough
CT: control target
= control target key end

     0   :  { %v1464_v40 = vmov 0.0   ;;  %vm1465_vm0 = vmmov 0   ;;  %s1858_s1 = inlined_call_operand.vmem [shape: bf16[256,128], index: 1, kind: input, shape index: {}]   ;;  %s1859_s0 = inlined_call_operand.vmem [shape: bf16[128,256], index: 0, kind: input, shape index: {}]   ;;  %s1860_s3 = inlined_call_operand.vmem [shape: bf16[128,128], index: 3, kind: input, shape index: {}]   ;;  %s1861_s5 = inlined_call_operand.vmem [shape: bf16[128,128], index: 5, kind: input, shape index: {}]   ;;  %s1862_s2 = inlined_call_operand.vmem [shape: f32[1,128], index: 2, kind: input, shape index: {}]   ;;  %s1863_s4 = inlined_call_operand.vmem [shape: f32[1,128], index: 4, kind: input, shape index: {}]   ;;  %s1864_s6 = inlined_call_operand.vmem [shape: f32[1,128], index: 6, kind: input, shape index: {}]   ;;  %s1865_s7 = inlined_call_operand.vmem [shape: bf16[16,128], index: 7, kind: output, shape index: {}]  }
   0x1   :  { %v1408_v0 = vld [vmem:[%s1858_s1 + $0x78] sm:$0xff]   ;;  %v1410_v2 = vld [vmem:[%s1858_s1 + $0x70] sm:$0xff]   ;;  %v1412_v4 = vld [vmem:[%s1858_s1 + $0x68] sm:$0xff]  }
   0x2   :  { %v1409_v1 = vld [vmem:[%s1858_s1 + $0x38] sm:$0xff]   ;;  %1062 = vmatprep.subr.bf16.mxu0 %v1408_v0  ;;  %v1411_v3 = vld [vmem:[%s1858_s1 + $0x30] sm:$0xff]   ;;  %v1413_v5 = vld [vmem:[%s1858_s1 + $0x28] sm:$0xff]  }
   0x3   :  { %1063 = vmatpush3.bf16.msra.mxu0 %v1409_v1  ;;  %v1414_v6 = vld [vmem:[%s1858_s1 + $0x60] sm:$0xff]   ;;  %v1416_v8 = vld [vmem:[%s1858_s1 + $0x58] sm:$0xff]   ;;  %v1418_v10 = vld [vmem:[%s1858_s1 + $0x50] sm:$0xff]  }
   0x4   :  { %1064 = vmatprep.subr.bf16.mxu0 %v1410_v2  ;;  %v1415_v7 = vld [vmem:[%s1858_s1 + $0x20] sm:$0xff]   ;;  %v1417_v9 = vld [vmem:[%s1858_s1 + $0x18] sm:$0xff]   ;;  %v1419_v12 = vld [vmem:[%s1858_s1 + $0x10] sm:$0xff]  }
   0x5   :  { %v1426_v11 = vld [vmem:[%s1859_s0 + $0x4] ss:$8 sps:$4 sm:$0xff]   ;;  %v1448_v17 = vld [vmem:[%s1860_s3 + $0x38] sm:$0xff]   ;;  %v1424_v18 = vld [vmem:[%s1859_s0] ss:$8 sps:$4 sm:$0xff]  }
   0x6   :  { %290 = vmatprep.mubr.bf16.mxu0 %v1426_v11  ;;  %v1420_v13 = vld [vmem:[%s1858_s1 + $0x48] sm:$0xff]   ;;  %v1422_v15 = vld [vmem:[%s1858_s1 + $0x40] sm:$0xff]   ;;  %v1449_v19 = vld [vmem:[%s1860_s3 + $0x30] sm:$0xff]   ;;  %1214 = vmatprep.subr.bf16.mxu1 %v1448_v17 }
   0x7   :  { %1065 = vmatpush3.bf16.msra.mxu0 %v1411_v3  ;;  %v1421_v14 = vld [vmem:[%s1858_s1 + $0x8] sm:$0xff]   ;;  %v1423_v16 = vld [vmem:[%s1858_s1] sm:$0xff]   ;;  %v1427_v20 = vld [vmem:[%s1859_s0 + $0x14] ss:$8 sps:$4 sm:$0xff]   ;;  %1215 = vmatpush3.bf16.msra.mxu1 %v1448_v17 }
   0x8   :  { %1066 = vmatprep.subr.bf16.mxu0 %v1412_v4  ;;  %v1450_v21 = vld [vmem:[%s1860_s3 + $0x28] sm:$0xff]   ;;  %1216 = vmatprep.subr.bf16.mxu1 %v1449_v19  ;;  %v1429_v22 = vld [vmem:[%s1859_s0 + $0x10] ss:$8 sps:$4 sm:$0xff]   ;;  %v1433_v25 = vld [vmem:[%s1859_s0 + $0x34] ss:$8 sps:$4 sm:$0xff]  }
   0x9   :  { %v1430_v23 = vld [vmem:[%s1859_s0 + $0x24] ss:$8 sps:$4 sm:$0xff]   ;;  %v1432_v24 = vld [vmem:[%s1859_s0 + $0x20] ss:$8 sps:$4 sm:$0xff]   ;;  %v1435_v26 = vld [vmem:[%s1859_s0 + $0x30] ss:$8 sps:$4 sm:$0xff]  }
   0xa   :  { %v1436_v27 = vld [vmem:[%s1859_s0 + $0x44] ss:$8 sps:$4 sm:$0xff]   ;;  %v1438_v28 = vld [vmem:[%s1859_s0 + $0x40] ss:$8 sps:$4 sm:$0xff]   ;;  %v1439_v29 = vld [vmem:[%s1859_s0 + $0x54] ss:$8 sps:$4 sm:$0xff]  }
   0xb   :  { %1067 = vmatpush3.bf16.msra.mxu0 %v1413_v5  ;;  %1217 = vmatpush3.bf16.msra.mxu1 %v1449_v19  ;;  %v1441_v30 = vld [vmem:[%s1859_s0 + $0x50] ss:$8 sps:$4 sm:$0xff]   ;;  %v1442_v31 = vld [vmem:[%s1859_s0 + $0x64] ss:$8 sps:$4 sm:$0xff]   ;;  %v1444_v32 = vld [vmem:[%s1859_s0 + $0x60] ss:$8 sps:$4 sm:$0xff]  }
   0xc   :  { %1068 = vmatprep.subr.bf16.mxu0 %v1414_v6  ;;  %1218 = vmatprep.subr.bf16.mxu1 %v1450_v21  ;;  %v1445_v33 = vld [vmem:[%s1859_s0 + $0x74] ss:$8 sps:$4 sm:$0xff]   ;;  %v1447_v34 = vld [vmem:[%s1859_s0 + $0x70] ss:$8 sps:$4 sm:$0xff]   ;;  %v1451_v35 = vld [vmem:[%s1860_s3 + $0x20] sm:$0xff]  }
   0xd   :  { %v1452_v36 = vld [vmem:[%s1860_s3 + $0x18] sm:$0xff]   ;;  %v1453_v37 = vld [vmem:[%s1860_s3 + $0x10] sm:$0xff]   ;;  %v1454_v38 = vld [vmem:[%s1860_s3 + $0x8] sm:$0xff]  }
   0xe   :  { %v1455_v39 = vld [vmem:[%s1860_s3] sm:$0xff]   ;;  %v1630_v41 = vld [vmem:[%s1861_s5 + $0x38] sm:$0xff]   ;;  %v1637_v42 = vld [vmem:[%s1861_s5 + $0x30] sm:$0xff]  }
   0xf   :  { %1069 = vmatpush3.bf16.msra.mxu0 %v1415_v7  ;;  %1219 = vmatpush3.bf16.msra.mxu1 %v1450_v21  ;;  %v1644_v43 = vld [vmem:[%s1861_s5 + $0x28] sm:$0xff]   ;;  %v1651_v44 = vld [vmem:[%s1861_s5 + $0x20] sm:$0xff]   ;;  %v1658_v45 = vld [vmem:[%s1861_s5 + $0x18] sm:$0xff]  }
  0x10   :  { %1070 = vmatprep.subr.bf16.mxu0 %v1416_v8  ;;  %1220 = vmatprep.subr.bf16.mxu1 %v1451_v35  ;;  %v1665_v46 = vld [vmem:[%s1861_s5 + $0x10] sm:$0xff]   ;;  %v1672_v47 = vld [vmem:[%s1861_s5 + $0x8] sm:$0xff]   ;;  %v1680_v52 = vld [vmem:[%s1862_s2] ss:$0 sm:$0xff] }
  0x13   :  { %1071 = vmatpush3.bf16.msra.mxu0 %v1417_v9  ;;  %1221 = vmatpush3.bf16.msra.mxu1 %v1451_v35 }
  0x14   :  { %1072 = vmatprep.subr.bf16.mxu0 %v1418_v10  ;;  %1222 = vmatprep.subr.bf16.mxu1 %v1452_v36 }
  0x17   :  { %1073 = vmatpush3.bf16.msra.mxu0 %v1419_v12  ;;  %1223 = vmatpush3.bf16.msra.mxu1 %v1452_v36 }
  0x18   :  { %1074 = vmatprep.subr.bf16.mxu0 %v1420_v13  ;;  %1224 = vmatprep.subr.bf16.mxu1 %v1453_v37 }
  0x1b   :  { %1075 = vmatpush3.bf16.msra.mxu0 %v1421_v14  ;;  %1225 = vmatpush3.bf16.msra.mxu1 %v1453_v37 }
  0x1c   :  { %1076 = vmatprep.subr.bf16.mxu0 %v1422_v15  ;;  %1226 = vmatprep.subr.bf16.mxu1 %v1454_v38 }
  0x1f   :  { %1077 = vmatpush3.bf16.msra.mxu0 %v1423_v16  ;;  %1227 = vmatpush3.bf16.msra.mxu1 %v1454_v38 }
  0x20   :  { %1228 = vmatprep.subr.bf16.mxu1 %v1455_v39  ;;  %1266 = vmatprep.subr.bf16.mxu0 %v1464_v40 }
  0x22   :  { %291 = vmatmul.mubr.bf16.vlgmr.msra.gmra.mxu0 %v1424_v18 }
  0x23   :  { %298 = vmatprep.mubr.bf16.mxu0 %v1427_v20  ;;  %1229 = vmatpush3.bf16.msra.mxu1 %v1455_v39 }
  0x24   :  { %1246 = vmatprep.subr.bf16.mxu1 %v1464_v40  ;;  %1267 = vmatpush3.bf16.msra.mxu0 %v1630_v41 }
  0x25   :  { %1268 = vmatprep.subr.bf16.mxu0 %v1464_v40 }
  0x28   :  { %1269 = vmatpush3.bf16.msra.mxu0 %v1637_v42 }
  0x29   :  { %1270 = vmatprep.subr.bf16.mxu0 %v1464_v40 }
  0x2a   :  { %299 = vmatmul.mubr.bf16.gmra.mxu0 %v1429_v22 }
  0x2b   :  { %306 = vmatprep.mubr.bf16.mxu0 %v1430_v23 }
  0x2c   :  { %1271 = vmatpush3.bf16.msra.mxu0 %v1644_v43 }
  0x2d   :  { %1272 = vmatprep.subr.bf16.mxu0 %v1464_v40 }
  0x30   :  { %1273 = vmatpush3.bf16.msra.mxu0 %v1651_v44 }
  0x31   :  { %1274 = vmatprep.subr.bf16.mxu0 %v1464_v40 }
  0x32   :  { %307 = vmatmul.mubr.bf16.gmra.mxu0 %v1432_v24 }
  0x33   :  { %314 = vmatprep.mubr.bf16.mxu0 %v1433_v25 }
  0x34   :  { %1275 = vmatpush3.bf16.msra.mxu0 %v1658_v45 }
  0x35   :  { %1276 = vmatprep.subr.bf16.mxu0 %v1464_v40 }
  0x38   :  { %1277 = vmatpush3.bf16.msra.mxu0 %v1665_v46 }
  0x39   :  { %1278 = vmatprep.subr.bf16.mxu0 %v1464_v40 }
  0x3a   :  { %315 = vmatmul.mubr.bf16.gmra.mxu0 %v1435_v26 }
  0x3b   :  { %322 = vmatprep.mubr.bf16.mxu0 %v1436_v27 }
  0x3c   :  { %1279 = vmatpush3.bf16.msra.mxu0 %v1672_v47 }
  0x3d   :  { %1280 = vmatprep.subr.bf16.mxu0 %v1464_v40 }
  0x42   :  { %323 = vmatmul.mubr.bf16.gmra.mxu0 %v1438_v28 }
  0x43   :  { %330 = vmatprep.mubr.bf16.mxu0 %v1439_v29 }
  0x4a   :  { %331 = vmatmul.mubr.bf16.gmra.mxu0 %v1441_v30 }
  0x4b   :  { %338 = vmatprep.mubr.bf16.mxu0 %v1442_v31 }
  0x52   :  { %339 = vmatmul.mubr.bf16.gmra.mxu0 %v1444_v32 }
  0x53   :  { %346 = vmatprep.mubr.bf16.mxu0 %v1445_v33 }
  0x5a   :  { %347 = vmatmul.mubr.bf16.gmra.mxu0 %v1447_v34 }
  0x5b   :  { %1282 = vmatprep.mubr.msk.bf16.mxu0 %vm1465_vm0, %v1464_v40 }
  0xe2   :  { %v1078_v48 = vpop.f32.mrf.mxu0 }
  0xe4   :  { %v1079_v49 = vpop.f32.mrf.mxu0 }
  0xe5   :  { %v1080_v50 = vadd.f32 %v1079_v49, %v1078_v48 }
  0xe6   :  { %v1081_v51 = vpop.f32.mrf.mxu0 }
  0xe7   :  { %v293_v55 = vadd.f32 %v1080_v50, %v1680_v52 }
  0xe8   :  { %v1082_v53 = vpop.f32.mrf.mxu0 }
  0xe9   :  { %v1083_v54 = vadd.f32 %v1082_v53, %v1081_v51  ;;  %v355_v60 = vmax.f32 %v293_v55, 0.0 }
  0xea   :  { %v1084_v56 = vpop.f32.mrf.mxu0 }
  0xeb   :  { %v296_v57 = vadd.f32 %v1083_v54, %v1680_v52 }
  0xec   :  { %v1085_v58 = vpop.f32.mrf.mxu0 }
  0xed   :  { %v1086_v59 = vadd.f32 %v1085_v58, %v1084_v56  ;;  %v356_v61 = vmax.f32 %v296_v57, 0.0 }
  0xee   :  { %v1087_v62 = vpop.f32.mrf.mxu0 }
  0xef   :  { %v371_v63 = vpack.c.bf16 %v356_v61, %v355_v60  ;;  %v301_v1 = vadd.f32 %v1086_v59, %v1680_v52 }
  0xf0   :  { %v1088_v0 = vpop.f32.mrf.mxu0 }
  0xf1   :  { %v1089_v2 = vadd.f32 %v1088_v0, %v1087_v62  ;;  %1230 = vmatprep.mubr.bf16.mxu1 %v371_v63  ;;  %v357_v6 = vmax.f32 %v301_v1, 0.0 }
  0xf2   :  { %v1090_v3 = vpop.f32.mrf.mxu0 }
  0xf3   :  { %v304_v4 = vadd.f32 %v1089_v2, %v1680_v52 }
  0xf4   :  { %v1091_v5 = vpop.f32.mrf.mxu0 }
  0xf5   :  { %v358_v7 = vmax.f32 %v304_v4, 0.0  ;;  %v1092_v8 = vadd.f32 %v1091_v5, %v1090_v3 }
  0xf6   :  { %v1093_v9 = vpop.f32.mrf.mxu0 }
  0xf7   :  { %v309_v10 = vadd.f32 %v1092_v8, %v1680_v52  ;;  %v372_v11 = vpack.c.bf16 %v358_v7, %v357_v6 }
  0xf8   :  { %v1094_v12 = vpop.f32.mrf.mxu0 }
  0xf9   :  { %1231 = vmatmul.mubr.bf16.vlgmr.msra.gmra.mxu1 %v372_v11  ;;  %v1095_v13 = vadd.f32 %v1094_v12, %v1093_v9  ;;  %v359_v15 = vmax.f32 %v309_v10, 0.0 }
  0xfa   :  { %v1096_v14 = vpop.f32.mrf.mxu0  ;;  %1247 = vmatpush3.bf16.msra.mxu1 %v1630_v41 }
  0xfb   :  { %v312_v16 = vadd.f32 %v1095_v13, %v1680_v52  ;;  %1248 = vmatprep.subr.bf16.mxu1 %v1464_v40 }
  0xfc   :  { %v1097_v17 = vpop.f32.mrf.mxu0 }
  0xfd   :  { %v360_v18 = vmax.f32 %v312_v16, 0.0  ;;  %v1098_v19 = vadd.f32 %v1097_v17, %v1096_v14 }
  0xfe   :  { %v1099_v20 = vpop.f32.mrf.mxu0  ;;  %1249 = vmatpush3.bf16.msra.mxu1 %v1637_v42 }
  0xff   :  { %v317_v21 = vadd.f32 %v1098_v19, %v1680_v52  ;;  %v373_v22 = vpack.c.bf16 %v360_v18, %v359_v15  ;;  %1250 = vmatprep.subr.bf16.mxu1 %v1464_v40  ;;  %v1715_v18 = vld [vmem:[%s1861_s5] sm:$0xff]  }
 0x100   :  { %v1100_v23 = vpop.f32.mrf.mxu0  ;;  %1281 = vmatpush3.bf16.msra.mxu0 %v1715_v18  ;;  %v1728_v19 = vld [vmem:[%s1863_s4] ss:$0 sm:$0xff] }
 0x101   :  { %v1101_v24 = vadd.f32 %v1100_v23, %v1099_v20  ;;  %1234 = vmatprep.mubr.bf16.mxu1 %v373_v22  ;;  %v361_v26 = vmax.f32 %v317_v21, 0.0  ;;  %1306 = vmatprep.subr.bf16.mxu0 %v1464_v40 }
 0x102   :  { %v1102_v25 = vpop.f32.mrf.mxu0  ;;  %1251 = vmatpush3.bf16.msra.mxu1 %v1644_v43 }
 0x103   :  { %v320_v27 = vadd.f32 %v1101_v24, %v1680_v52  ;;  %1252 = vmatprep.subr.bf16.mxu1 %v1464_v40 }
 0x104   :  { %v1103_v28 = vpop.f32.mrf.mxu0 }
 0x105   :  { %v362_v29 = vmax.f32 %v320_v27, 0.0  ;;  %v1104_v30 = vadd.f32 %v1103_v28, %v1102_v25 }
 0x106   :  { %v1105_v31 = vpop.f32.mrf.mxu0  ;;  %1253 = vmatpush3.bf16.msra.mxu1 %v1651_v44 }
 0x107   :  { %v374_v32 = vpack.c.bf16 %v362_v29, %v361_v26  ;;  %v325_v33 = vadd.f32 %v1104_v30, %v1680_v52  ;;  %1254 = vmatprep.subr.bf16.mxu1 %v1464_v40 }
 0x108   :  { %v1106_v34 = vpop.f32.mrf.mxu0 }
 0x109   :  { %1235 = vmatmul.mubr.bf16.gmra.mxu1 %v374_v32  ;;  %v1107_v35 = vadd.f32 %v1106_v34, %v1105_v31  ;;  %v363_v37 = vmax.f32 %v325_v33, 0.0 }
 0x10a   :  { %v1108_v36 = vpop.f32.mrf.mxu0  ;;  %1255 = vmatpush3.bf16.msra.mxu1 %v1658_v45 }
 0x10b   :  { %v328_v38 = vadd.f32 %v1107_v35, %v1680_v52  ;;  %1256 = vmatprep.subr.bf16.mxu1 %v1464_v40 }
 0x10c   :  { %v1109_v39 = vpop.f32.mrf.mxu0 }
 0x10d   :  { %v364_v48 = vmax.f32 %v328_v38, 0.0  ;;  %v1110_v49 = vadd.f32 %v1109_v39, %v1108_v36 }
 0x10e   :  { %v1111_v50 = vpop.f32.mrf.mxu0  ;;  %1257 = vmatpush3.bf16.msra.mxu1 %v1665_v46 }
 0x10f   :  { %v333_v51 = vadd.f32 %v1110_v49, %v1680_v52  ;;  %v375_v53 = vpack.c.bf16 %v364_v48, %v363_v37  ;;  %1258 = vmatprep.subr.bf16.mxu1 %v1464_v40 }
 0x110   :  { %v1112_v54 = vpop.f32.mrf.mxu0 }
 0x111   :  { %v1113_v55 = vadd.f32 %v1112_v54, %v1111_v50  ;;  %1238 = vmatprep.mubr.bf16.mxu1 %v375_v53  ;;  %v365_v57 = vmax.f32 %v333_v51, 0.0 }
 0x112   :  { %v1114_v56 = vpop.f32.mrf.mxu0  ;;  %1259 = vmatpush3.bf16.msra.mxu1 %v1672_v47 }
 0x113   :  { %v336_v58 = vadd.f32 %v1113_v55, %v1680_v52  ;;  %1260 = vmatprep.subr.bf16.mxu1 %v1464_v40 }
 0x114   :  { %v1115_v59 = vpop.f32.mrf.mxu0 }
 0x115   :  { %v366_v60 = vmax.f32 %v336_v58, 0.0  ;;  %v1116_v61 = vadd.f32 %v1115_v59, %v1114_v56 }
 0x116   :  { %v1117_v62 = vpop.f32.mrf.mxu0  ;;  %1261 = vmatpush3.bf16.msra.mxu1 %v1715_v18 }
 0x117   :  { %v376_v63 = vpack.c.bf16 %v366_v60, %v365_v57  ;;  %v341_v0 = vadd.f32 %v1116_v61, %v1680_v52  ;;  %1286 = vmatprep.subr.bf16.mxu1 %v1464_v40 }
 0x118   :  { %v1118_v1 = vpop.f32.mrf.mxu0 }
 0x119   :  { %1239 = vmatmul.mubr.bf16.gmra.mxu1 %v376_v63  ;;  %v1119_v2 = vadd.f32 %v1118_v1, %v1117_v62  ;;  %v367_v4 = vmax.f32 %v341_v0, 0.0 }
 0x11a   :  { %v1120_v3 = vpop.f32.mrf.mxu0 }
 0x11b   :  { %v344_v5 = vadd.f32 %v1119_v2, %v1680_v52 }
 0x11c   :  { %v1121_v6 = vpop.f32.mrf.mxu0 }
 0x11d   :  { %v368_v7 = vmax.f32 %v344_v5, 0.0  ;;  %v1122_v8 = vadd.f32 %v1121_v6, %v1120_v3 }
 0x11e   :  { %v1123_v9 = vpop.f32.mrf.mxu0 }
 0x11f   :  { %v349_v10 = vadd.f32 %v1122_v8, %v1680_v52  ;;  %v377_v11 = vpack.c.bf16 %v368_v7, %v367_v4 }
 0x120   :  { %v1124_v12 = vpop.f32.mrf.mxu0 }
 0x121   :  { %v1125_v13 = vadd.f32 %v1124_v12, %v1123_v9  ;;  %1242 = vmatprep.mubr.bf16.mxu1 %v377_v11  ;;  %v369_v14 = vmax.f32 %v349_v10, 0.0 }
 0x123   :  { %v352_v15 = vadd.f32 %v1125_v13, %v1680_v52 }
 0x125   :  { %v370_v16 = vmax.f32 %v352_v15, 0.0 }
 0x127   :  { %v378_v17 = vpack.c.bf16 %v370_v16, %v369_v14 }
 0x129   :  { %1243 = vmatmul.mubr.bf16.gmra.mxu1 %v378_v17 }
 0x12a   :  { %1262 = vmatprep.mubr.msk.bf16.mxu1 %vm1465_vm0, %v1464_v40 }
 0x1b9   :  { %v1232_v52 = vpop.f32.mrf.mxu1 }
 0x1ba   :  { %v493_v21 = vadd.f32 %v1232_v52, %v1728_v19 }
 0x1bb   :  { %v484_v20 = vpop.f32.mrf.mxu1 }
 0x1bc   :  { %v485_v23 = vadd.f32 %v1728_v19, %v484_v20  ;;  %v549_v26 = vmax.f32 %v493_v21, 0.0 }
 0x1bd   :  { %v1233_v22 = vpop.f32.mrf.mxu1 }
 0x1be   :  { %v496_v24 = vadd.f32 %v1233_v22, %v1728_v19  ;;  %v547_v29 = vmax.f32 %v485_v23, 0.0 }
 0x1bf   :  { %v487_v25 = vpop.f32.mrf.mxu1 }
 0x1c0   :  { %v550_v27 = vmax.f32 %v496_v24, 0.0  ;;  %v488_v28 = vadd.f32 %v1728_v19, %v487_v25 }
 0x1c2   :  { %v564_v30 = vpack.c.bf16 %v550_v27, %v549_v26  ;;  %v548_v31 = vmax.f32 %v488_v28, 0.0 }
 0x1c4   :  { %v563_v32 = vpack.c.bf16 %v548_v31, %v547_v29  ;;  %1283 = vmatmul.mubr.bf16.vlgmr.msra.gmra.mxu0 %v564_v30 }
 0x1c5   :  { %1307 = vmatpush3.bf16.msra.mxu0 %v1630_v41  ;;  %1322 = vmatprep.mubr.msk.bf16.mxu0 %vm1465_vm0, %v1464_v40 }
 0x1c6   :  { %1263 = vmatmul.mubr.bf16.vlgmr.msra.gmra.mxu1 %v563_v32  ;;  %1308 = vmatprep.subr.bf16.mxu0 %v1464_v40 }
 0x1c7   :  { %1287 = vmatpush3.bf16.msra.mxu1 %v1630_v41  ;;  %1302 = vmatprep.mubr.msk.bf16.mxu1 %vm1465_vm0, %v1464_v40 }
 0x1c8   :  { %1288 = vmatprep.subr.bf16.mxu1 %v1464_v40 }
 0x1c9   :  { %1309 = vmatpush3.bf16.msra.mxu0 %v1637_v42  ;;  %v1236_v33 = vpop.f32.mrf.mxu1 }
 0x1ca   :  { %1310 = vmatprep.subr.bf16.mxu0 %v1464_v40  ;;  %v509_v37 = vadd.f32 %v1236_v33, %v1728_v19 }
 0x1cb   :  { %1289 = vmatpush3.bf16.msra.mxu1 %v1637_v42  ;;  %v500_v34 = vpop.f32.mrf.mxu1 }
 0x1cc   :  { %1290 = vmatprep.subr.bf16.mxu1 %v1464_v40  ;;  %v501_v39 = vadd.f32 %v1728_v19, %v500_v34  ;;  %v553_v49 = vmax.f32 %v509_v37, 0.0 }
 0x1cd   :  { %1311 = vmatpush3.bf16.msra.mxu0 %v1644_v43  ;;  %v1237_v35 = vpop.f32.mrf.mxu1 }
 0x1ce   :  { %1312 = vmatprep.subr.bf16.mxu0 %v1464_v40  ;;  %v512_v38 = vadd.f32 %v1237_v35, %v1728_v19  ;;  %v551_v51 = vmax.f32 %v501_v39, 0.0 }
 0x1cf   :  { %1291 = vmatpush3.bf16.msra.mxu1 %v1644_v43  ;;  %v503_v36 = vpop.f32.mrf.mxu1 }
 0x1d0   :  { %1292 = vmatprep.subr.bf16.mxu1 %v1464_v40  ;;  %v504_v48 = vadd.f32 %v1728_v19, %v503_v36  ;;  %v554_v50 = vmax.f32 %v512_v38, 0.0 }
 0x1d1   :  { %1313 = vmatpush3.bf16.msra.mxu0 %v1651_v44 }
 0x1d2   :  { %1314 = vmatprep.subr.bf16.mxu0 %v1464_v40  ;;  %v552_v53 = vmax.f32 %v504_v48, 0.0  ;;  %v566_v54 = vpack.c.bf16 %v554_v50, %v553_v49 }
 0x1d3   :  { %1293 = vmatpush3.bf16.msra.mxu1 %v1651_v44 }
 0x1d4   :  { %1294 = vmatprep.subr.bf16.mxu1 %v1464_v40  ;;  %v565_v55 = vpack.c.bf16 %v552_v53, %v551_v51 }
 0x1d5   :  { %1315 = vmatpush3.bf16.msra.mxu0 %v1658_v45 }
 0x1d6   :  { %1316 = vmatprep.subr.bf16.mxu0 %v1464_v40 }
 0x1d7   :  { %1295 = vmatpush3.bf16.msra.mxu1 %v1658_v45 }
 0x1d8   :  { %1296 = vmatprep.subr.bf16.mxu1 %v1464_v40 }
 0x1d9   :  { %1317 = vmatpush3.bf16.msra.mxu0 %v1665_v46  ;;  %v1240_v56 = vpop.f32.mrf.mxu1 }
 0x1da   :  { %1318 = vmatprep.subr.bf16.mxu0 %v1464_v40  ;;  %v525_v60 = vadd.f32 %v1240_v56, %v1728_v19 }
 0x1db   :  { %1297 = vmatpush3.bf16.msra.mxu1 %v1665_v46  ;;  %v516_v57 = vpop.f32.mrf.mxu1 }
 0x1dc   :  { %1298 = vmatprep.subr.bf16.mxu1 %v1464_v40  ;;  %v517_v62 = vadd.f32 %v1728_v19, %v516_v57  ;;  %v557_v0 = vmax.f32 %v525_v60, 0.0 }
 0x1dd   :  { %1319 = vmatpush3.bf16.msra.mxu0 %v1672_v47  ;;  %v1241_v58 = vpop.f32.mrf.mxu1 }
 0x1de   :  { %1320 = vmatprep.subr.bf16.mxu0 %v1464_v40  ;;  %v528_v61 = vadd.f32 %v1241_v58, %v1728_v19  ;;  %v555_v2 = vmax.f32 %v517_v62, 0.0 }
 0x1df   :  { %1299 = vmatpush3.bf16.msra.mxu1 %v1672_v47  ;;  %v519_v59 = vpop.f32.mrf.mxu1 }
 0x1e0   :  { %1300 = vmatprep.subr.bf16.mxu1 %v1464_v40  ;;  %v520_v63 = vadd.f32 %v1728_v19, %v519_v59  ;;  %v558_v1 = vmax.f32 %v528_v61, 0.0  ;;  %v1052_v61 = vld [vmem:[%s1864_s6] ss:$0 sm:$0xff] }
 0x1e1   :  { %1321 = vmatpush3.bf16.msra.mxu0 %v1715_v18 }
 0x1e2   :  { %1346 = vmatprep.subr.bf16.mxu0 %v1464_v40  ;;  %v556_v3 = vmax.f32 %v520_v63, 0.0  ;;  %v568_v4 = vpack.c.bf16 %v558_v1, %v557_v0 }
 0x1e3   :  { %1301 = vmatpush3.bf16.msra.mxu1 %v1715_v18 }
 0x1e4   :  { %1323 = vmatmul.mubr.bf16.vlgmr.msra.gmra.mxu0 %v566_v54  ;;  %1326 = vmatprep.subr.bf16.mxu1 %v1464_v40  ;;  %v567_v5 = vpack.c.bf16 %v556_v3, %v555_v2 }
 0x1e5   :  { %1347 = vmatpush3.bf16.msra.mxu0 %v1630_v41  ;;  %1362 = vmatprep.mubr.msk.bf16.mxu0 %vm1465_vm0, %v1464_v40 }
 0x1e6   :  { %1303 = vmatmul.mubr.bf16.vlgmr.msra.gmra.mxu1 %v565_v55  ;;  %1348 = vmatprep.subr.bf16.mxu0 %v1464_v40 }
 0x1e7   :  { %1327 = vmatpush3.bf16.msra.mxu1 %v1630_v41  ;;  %1342 = vmatprep.mubr.msk.bf16.mxu1 %vm1465_vm0, %v1464_v40 }
 0x1e8   :  { %1328 = vmatprep.subr.bf16.mxu1 %v1464_v40 }
 0x1e9   :  { %1349 = vmatpush3.bf16.msra.mxu0 %v1637_v42  ;;  %v1244_v6 = vpop.f32.mrf.mxu1 }
 0x1ea   :  { %1350 = vmatprep.subr.bf16.mxu0 %v1464_v40  ;;  %v541_v7 = vadd.f32 %v1244_v6, %v1728_v19 }
 0x1eb   :  { %1329 = vmatpush3.bf16.msra.mxu1 %v1637_v42 }
 0x1ec   :  { %1330 = vmatprep.subr.bf16.mxu1 %v1464_v40 }
 0x1ed   :  { %1351 = vmatpush3.bf16.msra.mxu0 %v1644_v43 }
 0x1ee   :  { %1352 = vmatprep.subr.bf16.mxu0 %v1464_v40 }
 0x1ef   :  { %1331 = vmatpush3.bf16.msra.mxu1 %v1644_v43 }
 0x1f0   :  { %1332 = vmatprep.subr.bf16.mxu1 %v1464_v40 }
 0x1f1   :  { %1353 = vmatpush3.bf16.msra.mxu0 %v1651_v44 }
 0x1f2   :  { %1354 = vmatprep.subr.bf16.mxu0 %v1464_v40 }
 0x1f3   :  { %1333 = vmatpush3.bf16.msra.mxu1 %v1651_v44 }
 0x1f4   :  { %1334 = vmatprep.subr.bf16.mxu1 %v1464_v40 }
 0x1f5   :  { %1355 = vmatpush3.bf16.msra.mxu0 %v1658_v45 }
 0x1f6   :  { %1356 = vmatprep.subr.bf16.mxu0 %v1464_v40 }
 0x1f7   :  { %1335 = vmatpush3.bf16.msra.mxu1 %v1658_v45 }
 0x1f8   :  { %1336 = vmatprep.subr.bf16.mxu1 %v1464_v40 }
 0x1f9   :  { %1357 = vmatpush3.bf16.msra.mxu0 %v1665_v46 }
 0x1fa   :  { %1358 = vmatprep.subr.bf16.mxu0 %v1464_v40 }
 0x1fb   :  { %1337 = vmatpush3.bf16.msra.mxu1 %v1665_v46 }
 0x1fc   :  { %1338 = vmatprep.subr.bf16.mxu1 %v1464_v40 }
 0x1fd   :  { %1359 = vmatpush3.bf16.msra.mxu0 %v1672_v47 }
 0x1fe   :  { %1360 = vmatprep.subr.bf16.mxu0 %v1464_v40 }
 0x1ff   :  { %1339 = vmatpush3.bf16.msra.mxu1 %v1672_v47 }
 0x200   :  { %1340 = vmatprep.subr.bf16.mxu1 %v1464_v40 }
 0x201   :  { %1361 = vmatpush3.bf16.msra.mxu0 %v1715_v18 }
 0x202   :  { %1386 = vmatprep.subr.bf16.mxu0 %v1464_v40 }
 0x203   :  { %1341 = vmatpush3.bf16.msra.mxu1 %v1715_v18 }
 0x204   :  { %1363 = vmatmul.mubr.bf16.vlgmr.msra.gmra.mxu0 %v568_v4  ;;  %1366 = vmatprep.subr.bf16.mxu1 %v1464_v40 }
 0x205   :  { %1387 = vmatpush3.bf16.msra.mxu0 %v1630_v41  ;;  %1402 = vmatprep.mubr.msk.bf16.mxu0 %vm1465_vm0, %v1464_v40 }
 0x206   :  { %1343 = vmatmul.mubr.bf16.vlgmr.msra.gmra.mxu1 %v567_v5  ;;  %1388 = vmatprep.subr.bf16.mxu0 %v1464_v40 }
 0x207   :  { %1367 = vmatpush3.bf16.msra.mxu1 %v1630_v41  ;;  %1382 = vmatprep.mubr.msk.bf16.mxu1 %vm1465_vm0, %v1464_v40  ;;  %v532_v41 = vpop.f32.mrf.mxu1 }
 0x208   :  { %1368 = vmatprep.subr.bf16.mxu1 %v1464_v40 }
 0x209   :  { %1389 = vmatpush3.bf16.msra.mxu0 %v1637_v42 }
 0x20a   :  { %1390 = vmatprep.subr.bf16.mxu0 %v1464_v40 }
 0x20b   :  { %1369 = vmatpush3.bf16.msra.mxu1 %v1637_v42  ;;  %v1245_v42 = vpop.f32.mrf.mxu1 }
 0x20c   :  { %1370 = vmatprep.subr.bf16.mxu1 %v1464_v40  ;;  %v544_v8 = vadd.f32 %v1245_v42, %v1728_v19 }
 0x20d   :  { %1391 = vmatpush3.bf16.msra.mxu0 %v1644_v43 }
 0x20e   :  { %1392 = vmatprep.subr.bf16.mxu0 %v1464_v40  ;;  %v562_v10 = vmax.f32 %v544_v8, 0.0 }
 0x20f   :  { %1371 = vmatpush3.bf16.msra.mxu1 %v1644_v43  ;;  %v535_v43 = vpop.f32.mrf.mxu1 }
 0x210   :  { %1372 = vmatprep.subr.bf16.mxu1 %v1464_v40  ;;  %v536_v9 = vadd.f32 %v1728_v19, %v535_v43 }
 0x211   :  { %1393 = vmatpush3.bf16.msra.mxu0 %v1651_v44 }
 0x212   :  { %1394 = vmatprep.subr.bf16.mxu0 %v1464_v40  ;;  %v560_v12 = vmax.f32 %v536_v9, 0.0 }
 0x213   :  { %1373 = vmatpush3.bf16.msra.mxu1 %v1651_v44  ;;  %v533_v44 = vadd.f32 %v1728_v19, %v532_v41 }
 0x214   :  { %1374 = vmatprep.subr.bf16.mxu1 %v1464_v40 }
 0x215   :  { %1395 = vmatpush3.bf16.msra.mxu0 %v1658_v45  ;;  %v559_v11 = vmax.f32 %v533_v44, 0.0 }
 0x216   :  { %1396 = vmatprep.subr.bf16.mxu0 %v1464_v40 }
 0x217   :  { %1375 = vmatpush3.bf16.msra.mxu1 %v1658_v45  ;;  %v561_v45 = vmax.f32 %v541_v7, 0.0  ;;  %v569_v13 = vpack.c.bf16 %v560_v12, %v559_v11 }
 0x218   :  { %1376 = vmatprep.subr.bf16.mxu1 %v1464_v40 }
 0x219   :  { %1397 = vmatpush3.bf16.msra.mxu0 %v1665_v46 }
 0x21a   :  { %1398 = vmatprep.subr.bf16.mxu0 %v1464_v40 }
 0x21b   :  { %1377 = vmatpush3.bf16.msra.mxu1 %v1665_v46  ;;  %v570_v46 = vpack.c.bf16 %v562_v10, %v561_v45 }
 0x21c   :  { %1378 = vmatprep.subr.bf16.mxu1 %v1464_v40 }
 0x21d   :  { %1399 = vmatpush3.bf16.msra.mxu0 %v1672_v47 }
 0x21e   :  { %1400 = vmatprep.subr.bf16.mxu0 %v1464_v40 }
 0x21f   :  { %1379 = vmatpush3.bf16.msra.mxu1 %v1672_v47 }
 0x220   :  { %1380 = vmatprep.subr.bf16.mxu1 %v1464_v40 }
 0x221   :  { %1401 = vmatpush3.bf16.msra.mxu0 %v1715_v18 }
 0x223   :  { %1381 = vmatpush3.bf16.msra.mxu1 %v1715_v18 }
 0x224   :  { %1403 = vmatmul.mubr.bf16.vlgmr.msra.gmra.mxu0 %v570_v46 }
 0x226   :  { %1383 = vmatmul.mubr.bf16.vlgmr.msra.gmra.mxu1 %v569_v13 }
 0x284   :  { %v711_v14 = vpop.f32.mrf.mxu0 }
 0x286   :  { %v670_v15 = vpop.f32.mrf.mxu1  ;;  %v1284_v16 = vpop.f32.mrf.mxu0 }
 0x287   :  { %v718_v17 = vmax.f32 %v670_v15, %v711_v14 }
 0x288   :  { %v1264_v52 = vpop.f32.mrf.mxu1  ;;  %v714_v19 = vpop.f32.mrf.mxu0 }
 0x28a   :  { %v673_v20 = vpop.f32.mrf.mxu1  ;;  %v1285_v47 = vpop.f32.mrf.mxu0 }
 0x28b   :  { %v719_v21 = vmax.f32 %v673_v20, %v714_v19 }
 0x28c   :  { %v1265_v22 = vpop.f32.mrf.mxu1 }
 0x2a4   :  { %v797_v23 = vpop.f32.mrf.mxu0 }
 0x2a6   :  { %v754_v40 = vpop.f32.mrf.mxu1  ;;  %v1324_v24 = vpop.f32.mrf.mxu0 }
 0x2a7   :  { %v761_v25 = vmax.f32 %v718_v17, %v754_v40 }
 0x2a8   :  { %v1304_v26 = vpop.f32.mrf.mxu1  ;;  %v800_v27 = vpop.f32.mrf.mxu0 }
 0x2a9   :  { %v804_v18 = vmax.f32 %v761_v25, %v797_v23 }
 0x2aa   :  { %v757_v28 = vpop.f32.mrf.mxu1  ;;  %v1325_v29 = vpop.f32.mrf.mxu0 }
 0x2ab   :  { %v762_v39 = vmax.f32 %v719_v21, %v757_v28 }
 0x2ac   :  { %v1305_v30 = vpop.f32.mrf.mxu1 }
 0x2ad   :  { %v805_v49 = vmax.f32 %v762_v39, %v800_v27 }
 0x2c4   :  { %v883_v31 = vpop.f32.mrf.mxu0 }
 0x2c6   :  { %v840_v32 = vpop.f32.mrf.mxu1  ;;  %v1364_v33 = vpop.f32.mrf.mxu0 }
 0x2c7   :  { %v847_v48 = vmax.f32 %v804_v18, %v840_v32 }
 0x2c8   :  { %v1344_v34 = vpop.f32.mrf.mxu1  ;;  %v886_v35 = vpop.f32.mrf.mxu0 }
 0x2c9   :  { %v890_v53 = vmax.f32 %v847_v48, %v883_v31 }
 0x2ca   :  { %v843_v36 = vpop.f32.mrf.mxu1  ;;  %v1365_v37 = vpop.f32.mrf.mxu0 }
 0x2cb   :  { %v848_v51 = vmax.f32 %v805_v49, %v843_v36 }
 0x2cc   :  { %v1345_v38 = vpop.f32.mrf.mxu1 }
 0x2cd   :  { %v891_v60 = vmax.f32 %v848_v51, %v886_v35 }
 0x2e4   :  { %v969_v50 = vpop.f32.mrf.mxu0 }
 0x2e6   :  { %v926_v54 = vpop.f32.mrf.mxu1  ;;  %v1404_v55 = vpop.f32.mrf.mxu0 }
 0x2e7   :  { %v933_v56 = vmax.f32 %v890_v53, %v926_v54 }
 0x2e8   :  { %v1384_v57 = vpop.f32.mrf.mxu1  ;;  %v972_v58 = vpop.f32.mrf.mxu0 }
 0x2e9   :  { %v976_v59 = vmax.f32 %v933_v56, %v969_v50 }
 0x2ea   :  { %v929_v62 = vpop.f32.mrf.mxu1  ;;  %v1405_v63 = vpop.f32.mrf.mxu0 }
 0x2eb   :  { %v934_v0 = vmax.f32 %v891_v60, %v929_v62  ;;  %v984_v2 = vadd.f32 %v1052_v61, %v976_v59 }
 0x2ec   :  { %v1385_v1 = vpop.f32.mrf.mxu1 }
 0x2ed   :  { %v977_v3 = vmax.f32 %v934_v0, %v972_v58  ;;  %v986_v5 = vmax.f32 %v984_v2, 0.0 }
 0x2ef   :  { %v985_v4 = vadd.f32 %v1052_v61, %v977_v3 }
 0x2f1   :  { %v987_v6 = vmax.f32 %v985_v4, 0.0 }
 0x2f3   :  { %v1060_v41 = vpack.c.bf16 %v987_v6, %v986_v5 }
 0x2f5   :  { %1061 = vst [vmem:[%s1865_s7] sm:$0xff] %v1060_v41  }

// kernel: forward.11
= control target key start
LH: loop header
LB: loop body
LE: loop exit
PB: predicated region body
PF: predicated region fallthrough
CT: control target
= control target key end

     0   :  { %s1039_s1 = inlined_call_operand.vmem [shape: bf16[256,128], index: 1, kind: input, shape index: {}]   ;;  %s1040_s0 = inlined_call_operand.vmem [shape: bf16[64,256], index: 0, kind: input, shape index: {}]   ;;  %s1041_s3 = inlined_call_operand.vmem [shape: bf16[128,128], index: 3, kind: input, shape index: {}]   ;;  %s1042_s5 = inlined_call_operand.vmem [shape: bf16[128,256], index: 5, kind: input, shape index: {}]   ;;  %s1043_s2 = inlined_call_operand.vmem [shape: f32[1,128], index: 2, kind: input, shape index: {}]   ;;  %s1044_s4 = inlined_call_operand.vmem [shape: f32[1,128], index: 4, kind: input, shape index: {}]   ;;  %s1045_s6 = inlined_call_operand.vmem [shape: f32[1,256], index: 6, kind: input, shape index: {}]   ;;  %s1046_s7 = inlined_call_operand.vmem [shape: f32[8,256], index: 7, kind: output, shape index: {}]  }
   0x1   :  { %v779_v0 = vld [vmem:[%s1039_s1 + $0x78] sm:$0xff]   ;;  %v781_v2 = vld [vmem:[%s1039_s1 + $0x70] sm:$0xff]   ;;  %v783_v4 = vld [vmem:[%s1039_s1 + $0x68] sm:$0xff]  }
   0x2   :  { %v780_v1 = vld [vmem:[%s1039_s1 + $0x38] sm:$0xff]   ;;  %702 = vmatprep.subr.bf16.mxu1 %v779_v0  ;;  %v782_v3 = vld [vmem:[%s1039_s1 + $0x30] sm:$0xff]   ;;  %v784_v5 = vld [vmem:[%s1039_s1 + $0x28] sm:$0xff]  }
   0x3   :  { %703 = vmatpush3.bf16.msra.mxu1 %v780_v1  ;;  %v785_v6 = vld [vmem:[%s1039_s1 + $0x60] sm:$0xff]   ;;  %v787_v8 = vld [vmem:[%s1039_s1 + $0x58] sm:$0xff]   ;;  %v789_v10 = vld [vmem:[%s1039_s1 + $0x50] sm:$0xff]  }
   0x4   :  { %704 = vmatprep.subr.bf16.mxu1 %v781_v2  ;;  %v786_v7 = vld [vmem:[%s1039_s1 + $0x20] sm:$0xff]   ;;  %v788_v9 = vld [vmem:[%s1039_s1 + $0x18] sm:$0xff]   ;;  %v790_v12 = vld [vmem:[%s1039_s1 + $0x10] sm:$0xff]  }
   0x5   :  { %v797_v11 = vld [vmem:[%s1040_s0 + $0x4] ss:$8 sps:$4 sm:$0xff]   ;;  %v807_v17 = vld [vmem:[%s1041_s3 + $0x38] sm:$0xff]   ;;  %v795_v18 = vld [vmem:[%s1040_s0] ss:$8 sps:$4 sm:$0xff]  }
   0x6   :  { %242 = vmatprep.mubr.bf16.mxu1 %v797_v11  ;;  %v791_v13 = vld [vmem:[%s1039_s1 + $0x48] sm:$0xff]   ;;  %v793_v15 = vld [vmem:[%s1039_s1 + $0x40] sm:$0xff]   ;;  %v798_v19 = vld [vmem:[%s1040_s0 + $0x14] ss:$8 sps:$4 sm:$0xff]  }
   0x7   :  { %705 = vmatpush3.bf16.msra.mxu1 %v782_v3  ;;  %v792_v14 = vld [vmem:[%s1039_s1 + $0x8] sm:$0xff]   ;;  %v794_v16 = vld [vmem:[%s1039_s1] sm:$0xff]   ;;  %v808_v20 = vld [vmem:[%s1041_s3 + $0x30] sm:$0xff]  }
   0x8   :  { %706 = vmatprep.subr.bf16.mxu1 %v783_v4  ;;  %v809_v21 = vld [vmem:[%s1041_s3 + $0x28] sm:$0xff]   ;;  %v800_v22 = vld [vmem:[%s1040_s0 + $0x10] ss:$8 sps:$4 sm:$0xff]   ;;  %v804_v25 = vld [vmem:[%s1040_s0 + $0x34] ss:$8 sps:$4 sm:$0xff]  }
   0x9   :  { %v801_v23 = vld [vmem:[%s1040_s0 + $0x24] ss:$8 sps:$4 sm:$0xff]   ;;  %v803_v24 = vld [vmem:[%s1040_s0 + $0x20] ss:$8 sps:$4 sm:$0xff]   ;;  %v806_v26 = vld [vmem:[%s1040_s0 + $0x30] ss:$8 sps:$4 sm:$0xff]  }
   0xa   :  { %v810_v27 = vld [vmem:[%s1041_s3 + $0x20] sm:$0xff]   ;;  %v811_v28 = vld [vmem:[%s1041_s3 + $0x18] sm:$0xff]   ;;  %v812_v29 = vld [vmem:[%s1041_s3 + $0x10] sm:$0xff]  }
   0xb   :  { %707 = vmatpush3.bf16.msra.mxu1 %v784_v5  ;;  %v813_v30 = vld [vmem:[%s1041_s3 + $0x8] sm:$0xff]   ;;  %v814_v31 = vld [vmem:[%s1041_s3] sm:$0xff]   ;;  %v815_v32 = vld [vmem:[%s1042_s5 + $0x74] ss:$8 sps:$4 sm:$0xff]  }
   0xc   :  { %708 = vmatprep.subr.bf16.mxu1 %v785_v6  ;;  %v817_v33 = vld [vmem:[%s1042_s5 + $0x70] ss:$8 sps:$4 sm:$0xff]   ;;  %543 = vmatprep.subr.bf16.mxu0 %v815_v32  ;;  %v818_v34 = vld [vmem:[%s1042_s5 + $0x64] ss:$8 sps:$4 sm:$0xff]   ;;  %v820_v35 = vld [vmem:[%s1042_s5 + $0x60] ss:$8 sps:$4 sm:$0xff]  }
   0xd   :  { %544 = vmatpush1.bf16.msra.mxu0 %v817_v33  ;;  %v821_v36 = vld [vmem:[%s1042_s5 + $0x54] ss:$8 sps:$4 sm:$0xff]   ;;  %v823_v37 = vld [vmem:[%s1042_s5 + $0x50] ss:$8 sps:$4 sm:$0xff]   ;;  %v824_v38 = vld [vmem:[%s1042_s5 + $0x44] ss:$8 sps:$4 sm:$0xff]  }
   0xe   :  { %545 = vmatprep.subr.bf16.mxu0 %v818_v34  ;;  %v826_v39 = vld [vmem:[%s1042_s5 + $0x40] ss:$8 sps:$4 sm:$0xff]   ;;  %v827_v40 = vld [vmem:[%s1042_s5 + $0x34] ss:$8 sps:$4 sm:$0xff]   ;;  %v829_v41 = vld [vmem:[%s1042_s5 + $0x30] ss:$8 sps:$4 sm:$0xff]  }
   0xf   :  { %709 = vmatpush3.bf16.msra.mxu1 %v786_v7  ;;  %v652_v45 = vld [vmem:[%s1043_s2] ss:$0 sm:$0xff] }
  0x10   :  { %710 = vmatprep.subr.bf16.mxu1 %v787_v8  ;;  %v677_v32 = vld [vmem:[%s1044_s4] ss:$0 sm:$0xff] }
  0x11   :  { %546 = vmatpush1.bf16.msra.mxu0 %v820_v35 }
  0x12   :  { %547 = vmatprep.subr.bf16.mxu0 %v821_v36 }
  0x13   :  { %711 = vmatpush3.bf16.msra.mxu1 %v788_v9 }
  0x14   :  { %712 = vmatprep.subr.bf16.mxu1 %v789_v10 }
  0x15   :  { %548 = vmatpush1.bf16.msra.mxu0 %v823_v37 }
  0x16   :  { %549 = vmatprep.subr.bf16.mxu0 %v824_v38 }
  0x17   :  { %713 = vmatpush3.bf16.msra.mxu1 %v790_v12 }
  0x18   :  { %714 = vmatprep.subr.bf16.mxu1 %v791_v13 }
  0x19   :  { %550 = vmatpush1.bf16.msra.mxu0 %v826_v39 }
  0x1a   :  { %551 = vmatprep.subr.bf16.mxu0 %v827_v40 }
  0x1b   :  { %715 = vmatpush3.bf16.msra.mxu1 %v792_v14 }
  0x1c   :  { %716 = vmatprep.subr.bf16.mxu1 %v793_v15 }
  0x1d   :  { %552 = vmatpush1.bf16.msra.mxu0 %v829_v41 }
  0x1f   :  { %717 = vmatpush3.bf16.msra.mxu1 %v794_v16 }
  0x20   :  { %754 = vmatprep.subr.bf16.mxu1 %v807_v17 }
  0x22   :  { %243 = vmatmul.mubr.bf16.vlgmr.msra.gmra.mxu1 %v795_v18 }
  0x23   :  { %250 = vmatprep.mubr.bf16.mxu1 %v798_v19  ;;  %755 = vmatpush3.bf16.msra.mxu1 %v807_v17 }
  0x24   :  { %756 = vmatprep.subr.bf16.mxu1 %v808_v20 }
  0x27   :  { %757 = vmatpush3.bf16.msra.mxu1 %v808_v20 }
  0x28   :  { %758 = vmatprep.subr.bf16.mxu1 %v809_v21 }
  0x2a   :  { %251 = vmatmul.mubr.bf16.gmra.mxu1 %v800_v22 }
  0x2b   :  { %258 = vmatprep.mubr.bf16.mxu1 %v801_v23  ;;  %759 = vmatpush3.bf16.msra.mxu1 %v809_v21  ;;  %v830_v23 = vld [vmem:[%s1042_s5 + $0x24] ss:$8 sps:$4 sm:$0xff]  }
  0x2c   :  { %760 = vmatprep.subr.bf16.mxu1 %v810_v27  ;;  %553 = vmatprep.subr.bf16.mxu0 %v830_v23 }
  0x2f   :  { %761 = vmatpush3.bf16.msra.mxu1 %v810_v27  ;;  %v836_v27 = vld [vmem:[%s1042_s5 + $0x4] ss:$8 sps:$4 sm:$0xff]  }
  0x30   :  { %762 = vmatprep.subr.bf16.mxu1 %v811_v28 }
  0x32   :  { %259 = vmatmul.mubr.bf16.gmra.mxu1 %v803_v24  ;;  %v832_v24 = vld [vmem:[%s1042_s5 + $0x20] ss:$8 sps:$4 sm:$0xff]  }
  0x33   :  { %266 = vmatprep.mubr.bf16.mxu1 %v804_v25  ;;  %763 = vmatpush3.bf16.msra.mxu1 %v811_v28  ;;  %v833_v25 = vld [vmem:[%s1042_s5 + $0x14] ss:$8 sps:$4 sm:$0xff]   ;;  %v838_v28 = vld [vmem:[%s1042_s5] ss:$8 sps:$4 sm:$0xff]  }
  0x34   :  { %764 = vmatprep.subr.bf16.mxu1 %v812_v29  ;;  %554 = vmatpush1.bf16.msra.mxu0 %v832_v24 }
  0x35   :  { %555 = vmatprep.subr.bf16.mxu0 %v833_v25 }
  0x37   :  { %765 = vmatpush3.bf16.msra.mxu1 %v812_v29  ;;  %v839_v29 = vmov 0  }
  0x38   :  { %766 = vmatprep.subr.bf16.mxu1 %v813_v30  ;;  %575 = vmatprep.mubr.bf16.mxu0 %v839_v29 }
  0x3a   :  { %267 = vmatmul.mubr.bf16.gmra.mxu1 %v806_v26  ;;  %v835_v26 = vld [vmem:[%s1042_s5 + $0x10] ss:$8 sps:$4 sm:$0xff]  }
  0x3b   :  { %767 = vmatpush3.bf16.msra.mxu1 %v813_v30  ;;  %556 = vmatpush1.bf16.msra.mxu0 %v835_v26 }
  0x3c   :  { %768 = vmatprep.subr.bf16.mxu1 %v814_v31  ;;  %557 = vmatprep.subr.bf16.mxu0 %v836_v27 }
  0x3f   :  { %769 = vmatpush3.bf16.msra.mxu1 %v814_v31  ;;  %558 = vmatpush1.bf16.msra.mxu0 %v838_v28 }
  0xe2   :  { %v718_v42 = vpop.f32.mrf.mxu1 }
  0xe4   :  { %v719_v43 = vpop.f32.mrf.mxu1 }
  0xe5   :  { %v720_v44 = vadd.f32 %v719_v43, %v718_v42 }
  0xe6   :  { %v721_v46 = vpop.f32.mrf.mxu1 }
  0xe7   :  { %v245_v48 = vadd.f32 %v720_v44, %v652_v45 }
  0xe8   :  { %v722_v47 = vpop.f32.mrf.mxu1 }
  0xe9   :  { %v723_v49 = vadd.f32 %v722_v47, %v721_v46  ;;  %v275_v53 = vmax.f32 %v245_v48, 0.0 }
  0xea   :  { %v724_v50 = vpop.f32.mrf.mxu1 }
  0xeb   :  { %v248_v51 = vadd.f32 %v723_v49, %v652_v45 }
  0xec   :  { %v725_v52 = vpop.f32.mrf.mxu1 }
  0xed   :  { %v276_v54 = vmax.f32 %v248_v51, 0.0  ;;  %v726_v55 = vadd.f32 %v725_v52, %v724_v50 }
  0xee   :  { %v727_v56 = vpop.f32.mrf.mxu1 }
  0xef   :  { %v283_v57 = vpack.c.bf16 %v276_v54, %v275_v53  ;;  %v253_v59 = vadd.f32 %v726_v55, %v652_v45 }
  0xf0   :  { %v728_v58 = vpop.f32.mrf.mxu1 }
  0xf1   :  { %v729_v60 = vadd.f32 %v728_v58, %v727_v56  ;;  %770 = vmatprep.mubr.bf16.mxu1 %v283_v57  ;;  %v277_v0 = vmax.f32 %v253_v59, 0.0  ;;  %v453_v59 = vlaneseq }
  0xf2   :  { %v730_v61 = vpop.f32.mrf.mxu1 }
  0xf3   :  { %v256_v62 = vadd.f32 %v729_v60, %v652_v45 }
  0xf4   :  { %v731_v63 = vpop.f32.mrf.mxu1 }
  0xf5   :  { %v278_v1 = vmax.f32 %v256_v62, 0.0  ;;  %v732_v2 = vadd.f32 %v731_v63, %v730_v61  ;;  %v454_v62 = vshrl.u32 %v453_v59, 7 }
  0xf6   :  { %v733_v3 = vpop.f32.mrf.mxu1 }
  0xf7   :  { %v284_v4 = vpack.c.bf16 %v278_v1, %v277_v0  ;;  %v261_v6 = vadd.f32 %v732_v2, %v652_v45  ;;  %v455_v1 = vsub.s32 0, %v454_v62  ;;  %v451_v2 = vld [vmem:[%s1045_s6] sm:$0x3] }
  0xf8   :  { %v734_v5 = vpop.f32.mrf.mxu1 }
  0xf9   :  { %v735_v7 = vadd.f32 %v734_v5, %v733_v3  ;;  %771 = vmatmul.mubr.bf16.vlgmr.msra.gmra.mxu1 %v284_v4  ;;  %v279_v11 = vmax.f32 %v261_v6, 0.0  ;;  %v459_v3 = vsub.s32 1, %v454_v62  ;;  %v456_v6 = vrot.slane %v451_v2, %v455_v1 }
  0xfa   :  { %v736_v8 = vpop.f32.mrf.mxu1 }
  0xfb   :  { %v264_v9 = vadd.f32 %v735_v7, %v652_v45  ;;  %v460_v7 = vrot.slane %v451_v2, %v459_v3 }
  0xfc   :  { %v737_v10 = vpop.f32.mrf.mxu1 }
  0xfd   :  { %v280_v12 = vmax.f32 %v264_v9, 0.0  ;;  %v738_v13 = vadd.f32 %v737_v10, %v736_v8 }
  0xfe   :  { %v739_v14 = vpop.f32.mrf.mxu1 }
  0xff   :  { %v285_v15 = vpack.c.bf16 %v280_v12, %v279_v11  ;;  %v269_v17 = vadd.f32 %v738_v13, %v652_v45 }
 0x100   :  { %v740_v16 = vpop.f32.mrf.mxu1 }
 0x101   :  { %v741_v18 = vadd.f32 %v740_v16, %v739_v14  ;;  %774 = vmatprep.mubr.bf16.mxu1 %v285_v15  ;;  %v281_v20 = vmax.f32 %v269_v17, 0.0 }
 0x103   :  { %v272_v19 = vadd.f32 %v741_v18, %v652_v45 }
 0x105   :  { %v282_v21 = vmax.f32 %v272_v19, 0.0 }
 0x107   :  { %v286_v22 = vpack.c.bf16 %v282_v21, %v281_v20 }
 0x109   :  { %775 = vmatmul.mubr.bf16.gmra.mxu1 %v286_v22 }
 0x1b9   :  { %v772_v30 = vpop.f32.mrf.mxu1 }
 0x1ba   :  { %v401_v41 = vadd.f32 %v772_v30, %v677_v32 }
 0x1bb   :  { %v392_v31 = vpop.f32.mrf.mxu1 }
 0x1bc   :  { %v393_v34 = vadd.f32 %v677_v32, %v392_v31  ;;  %v425_v44 = vmax.f32 %v401_v41, 0.0 }
 0x1bd   :  { %v773_v33 = vpop.f32.mrf.mxu1 }
 0x1be   :  { %v423_v37 = vmax.f32 %v393_v34, 0.0  ;;  %v404_v39 = vadd.f32 %v773_v33, %v677_v32 }
 0x1bf   :  { %v395_v35 = vpop.f32.mrf.mxu1 }
 0x1c0   :  { %v396_v36 = vadd.f32 %v677_v32, %v395_v35  ;;  %v426_v42 = vmax.f32 %v404_v39, 0.0 }
 0x1c2   :  { %v424_v38 = vmax.f32 %v396_v36, 0.0  ;;  %v432_v46 = vpack.c.bf16 %v426_v42, %v425_v44 }
 0x1c4   :  { %v431_v40 = vpack.c.bf16 %v424_v38, %v423_v37 }
 0x1c6   :  { %576 = vmatmul.mubr.bf16.vlgmr.msra.gmra.mxu0 %v431_v40 }
 0x1c7   :  { %585 = vmatprep.mubr.bf16.mxu0 %v839_v29 }
 0x1c9   :  { %v776_v43 = vpop.f32.mrf.mxu1 }
 0x1ca   :  { %v417_v55 = vadd.f32 %v776_v43, %v677_v32 }
 0x1cb   :  { %v408_v45 = vpop.f32.mrf.mxu1 }
 0x1cc   :  { %v409_v48 = vadd.f32 %v677_v32, %v408_v45  ;;  %v429_v57 = vmax.f32 %v417_v55, 0.0 }
 0x1cd   :  { %v777_v47 = vpop.f32.mrf.mxu1 }
 0x1ce   :  { %586 = vmatmul.mubr.bf16.gmra.mxu0 %v432_v46  ;;  %v427_v51 = vmax.f32 %v409_v48, 0.0  ;;  %v420_v53 = vadd.f32 %v777_v47, %v677_v32 }
 0x1cf   :  { %v411_v49 = vpop.f32.mrf.mxu1  ;;  %595 = vmatprep.mubr.bf16.mxu0 %v839_v29 }
 0x1d0   :  { %v412_v50 = vadd.f32 %v677_v32, %v411_v49  ;;  %v430_v56 = vmax.f32 %v420_v53, 0.0 }
 0x1d2   :  { %v428_v52 = vmax.f32 %v412_v50, 0.0  ;;  %v434_v58 = vpack.c.bf16 %v430_v56, %v429_v57 }
 0x1d4   :  { %v433_v54 = vpack.c.bf16 %v428_v52, %v427_v51 }
 0x1d6   :  { %596 = vmatmul.mubr.bf16.gmra.mxu0 %v433_v54 }
 0x1d7   :  { %605 = vmatprep.mubr.bf16.mxu0 %v839_v29 }
 0x1de   :  { %606 = vmatmul.mubr.bf16.gmra.mxu0 %v434_v58 }
 0x286   :  { %v577_v60 = vpop.f32.mrf.mxu0 }
 0x287   :  { %v578_v12 = vadd.f32 %v577_v60, %v456_v6 }
 0x288   :  { %v579_v61 = vpop.f32.mrf.mxu0 }
 0x289   :  { %v580_v14 = vadd.f32 %v579_v61, %v460_v7  ;;  %v616_v22 = vmax.f32 %v578_v12, 0.0 }
 0x28a   :  { %v581_v63 = vpop.f32.mrf.mxu0 }
 0x28b   :  { %v582_v9 = vadd.f32 %v581_v63, %v456_v6  ;;  %v617_v25 = vmax.f32 %v580_v14, 0.0 }
 0x28c   :  { %v583_v0 = vpop.f32.mrf.mxu0 }
 0x28d   :  { %v584_v10 = vadd.f32 %v583_v0, %v460_v7  ;;  %v618_v17 = vmax.f32 %v582_v9, 0.0 }
 0x28e   :  { %v587_v4 = vpop.f32.mrf.mxu0 }
 0x28f   :  { %v588_v13 = vadd.f32 %v587_v4, %v456_v6  ;;  %v619_v19 = vmax.f32 %v584_v10, 0.0  ;;  %v632_v28 = vmax.f32 %v616_v22, %v618_v17 }
 0x290   :  { %v589_v5 = vpop.f32.mrf.mxu0 }
 0x291   :  { %v590_v15 = vadd.f32 %v589_v5, %v460_v7  ;;  %v620_v23 = vmax.f32 %v588_v13, 0.0  ;;  %v633_v32 = vmax.f32 %v617_v25, %v619_v19 }
 0x292   :  { %v591_v8 = vpop.f32.mrf.mxu0 }
 0x293   :  { %v592_v18 = vadd.f32 %v591_v8, %v456_v6  ;;  %v621_v26 = vmax.f32 %v590_v15, 0.0  ;;  %v634_v35 = vmax.f32 %v632_v28, %v620_v23 }
 0x294   :  { %v593_v11 = vpop.f32.mrf.mxu0 }
 0x295   :  { %v594_v20 = vadd.f32 %v593_v11, %v460_v7  ;;  %v622_v29 = vmax.f32 %v592_v18, 0.0  ;;  %v635_v38 = vmax.f32 %v633_v32, %v621_v26 }
 0x296   :  { %v597_v16 = vpop.f32.mrf.mxu0 }
 0x297   :  { %v598_v24 = vadd.f32 %v597_v16, %v456_v6  ;;  %v623_v33 = vmax.f32 %v594_v20, 0.0  ;;  %v636_v40 = vmax.f32 %v634_v35, %v622_v29 }
 0x298   :  { %v599_v21 = vpop.f32.mrf.mxu0 }
 0x299   :  { %v600_v30 = vadd.f32 %v599_v21, %v460_v7  ;;  %v624_v36 = vmax.f32 %v598_v24, 0.0  ;;  %v637_v44 = vmax.f32 %v635_v38, %v623_v33 }
 0x29a   :  { %v601_v27 = vpop.f32.mrf.mxu0 }
 0x29b   :  { %v602_v31 = vadd.f32 %v601_v27, %v456_v6  ;;  %v625_v41 = vmax.f32 %v600_v30, 0.0  ;;  %v638_v46 = vmax.f32 %v636_v40, %v624_v36 }
 0x29c   :  { %v603_v34 = vpop.f32.mrf.mxu0 }
 0x29d   :  { %v604_v37 = vadd.f32 %v603_v34, %v460_v7  ;;  %v626_v42 = vmax.f32 %v602_v31, 0.0  ;;  %v639_v51 = vmax.f32 %v637_v44, %v625_v41 }
 0x29e   :  { %v607_v39 = vpop.f32.mrf.mxu0 }
 0x29f   :  { %v608_v43 = vadd.f32 %v607_v39, %v456_v6  ;;  %v627_v47 = vmax.f32 %v604_v37, 0.0  ;;  %v640_v52 = vmax.f32 %v638_v46, %v626_v42 }
 0x2a0   :  { %v609_v45 = vpop.f32.mrf.mxu0 }
 0x2a1   :  { %v628_v48 = vmax.f32 %v608_v43, 0.0  ;;  %v610_v49 = vadd.f32 %v609_v45, %v460_v7  ;;  %v641_v56 = vmax.f32 %v639_v51, %v627_v47 }
 0x2a2   :  { %v611_v50 = vpop.f32.mrf.mxu0 }
 0x2a3   :  { %v629_v53 = vmax.f32 %v610_v49, 0.0  ;;  %v612_v54 = vadd.f32 %v611_v50, %v456_v6  ;;  %v642_v57 = vmax.f32 %v640_v52, %v628_v48 }
 0x2a4   :  { %v613_v55 = vpop.f32.mrf.mxu0 }
 0x2a5   :  { %v630_v58 = vmax.f32 %v612_v54, 0.0  ;;  %v614_v59 = vadd.f32 %v613_v55, %v460_v7  ;;  %v643_v60 = vmax.f32 %v641_v56, %v629_v53 }
 0x2a7   :  { %v644_v61 = vmax.f32 %v642_v57, %v630_v58  ;;  %v631_v62 = vmax.f32 %v614_v59, 0.0 }
 0x2a9   :  { %646 = vst [vmem:[%s1046_s7] sm:$0xff] %v644_v61  ;;  %v645_v63 = vmax.f32 %v643_v60, %v631_v62 }
 0x2ab   :  { %647 = vst [vmem:[%s1046_s7 + $0x8] sm:$0xff] %v645_v63 }

// kernel: forward.12
= control target key start
LH: loop header
LB: loop body
LE: loop exit
PB: predicated region body
PF: predicated region fallthrough
CT: control target
= control target key end

     0   :  { %v817_v1 = vmov 0   ;;  %s1058_s1 = inlined_call_operand.vmem [shape: bf16[384,256], index: 1, kind: input, shape index: {}]   ;;  %s1059_s0 = inlined_call_operand.vmem [shape: bf16[16,384], index: 0, kind: input, shape index: {}]   ;;  %s1060_s3 = inlined_call_operand.vmem [shape: bf16[256,128], index: 3, kind: input, shape index: {}]   ;;  %s1061_s2 = inlined_call_operand.vmem [shape: f32[1,256], index: 2, kind: input, shape index: {}]   ;;  %s1062_s4 = inlined_call_operand.vmem [shape: f32[1,128], index: 4, kind: input, shape index: {}]   ;;  %s1063_s5 = inlined_call_operand.vmem [shape: bf16[16,128], index: 5, kind: output, shape index: {}]  }
   0x1   :  { %v725_v0 = vld [vmem:[%s1058_s1 + $0x74] ss:$8 sps:$4 sm:$0xff]   ;;  %416 = vmatprep.mubr.bf16.mxu1 %v817_v1  ;;  %v727_v2 = vld [vmem:[%s1058_s1 + $0x70] ss:$8 sps:$4 sm:$0xff]   ;;  %v728_v3 = vld [vmem:[%s1058_s1 + $0x64] ss:$8 sps:$4 sm:$0xff]  }
   0x2   :  { %341 = vmatprep.subr.bf16.mxu0 %v725_v0  ;;  %v730_v4 = vld [vmem:[%s1058_s1 + $0x60] ss:$8 sps:$4 sm:$0xff]   ;;  %v731_v5 = vld [vmem:[%s1058_s1 + $0x54] ss:$8 sps:$4 sm:$0xff]   ;;  %v733_v6 = vld [vmem:[%s1058_s1 + $0x50] ss:$8 sps:$4 sm:$0xff]  }
   0x3   :  { %342 = vmatpush1.bf16.msra.mxu0 %v727_v2  ;;  %v734_v7 = vld [vmem:[%s1058_s1 + $0x44] ss:$8 sps:$4 sm:$0xff]   ;;  %v736_v8 = vld [vmem:[%s1058_s1 + $0x40] ss:$8 sps:$4 sm:$0xff]   ;;  %v748_v9 = vld [vmem:[%s1058_s1 + $0x174] ss:$8 sps:$4 sm:$0xff]  }
   0x4   :  { %343 = vmatprep.subr.bf16.mxu0 %v728_v3  ;;  %v751_v10 = vld [vmem:[%s1058_s1 + $0x170] ss:$8 sps:$4 sm:$0xff]   ;;  %v737_v11 = vld [vmem:[%s1058_s1 + $0x34] ss:$8 sps:$4 sm:$0xff]   ;;  %384 = vmatprep.subr.bf16.mxu1 %v748_v9  ;;  %v754_v12 = vld [vmem:[%s1058_s1 + $0x164] ss:$8 sps:$4 sm:$0xff]  }
   0x5   :  { %385 = vmatpush1.bf16.msra.mxu1 %v751_v10  ;;  %v757_v13 = vld [vmem:[%s1058_s1 + $0x160] ss:$8 sps:$4 sm:$0xff]   ;;  %v739_v14 = vld [vmem:[%s1058_s1 + $0x30] ss:$8 sps:$4 sm:$0xff]   ;;  %v740_v15 = vld [vmem:[%s1058_s1 + $0x24] ss:$8 sps:$4 sm:$0xff]  }
   0x6   :  { %386 = vmatprep.subr.bf16.mxu1 %v754_v12  ;;  %v760_v16 = vld [vmem:[%s1058_s1 + $0x154] ss:$8 sps:$4 sm:$0xff]   ;;  %v763_v17 = vld [vmem:[%s1058_s1 + $0x150] ss:$8 sps:$4 sm:$0xff]   ;;  %v742_v18 = vld [vmem:[%s1058_s1 + $0x20] ss:$8 sps:$4 sm:$0xff]  }
   0x7   :  { %344 = vmatpush1.bf16.msra.mxu0 %v730_v4  ;;  %v766_v19 = vld [vmem:[%s1058_s1 + $0x144] ss:$8 sps:$4 sm:$0xff]   ;;  %v743_v20 = vld [vmem:[%s1058_s1 + $0x14] ss:$8 sps:$4 sm:$0xff]   ;;  %v745_v21 = vld [vmem:[%s1058_s1 + $0x10] ss:$8 sps:$4 sm:$0xff]   ;;  %v75_v4 = vlaneseq }
   0x8   :  { %345 = vmatprep.subr.bf16.mxu0 %v731_v5  ;;  %v769_v22 = vld [vmem:[%s1058_s1 + $0x140] ss:$8 sps:$4 sm:$0xff]   ;;  %v772_v23 = vld [vmem:[%s1058_s1 + $0x134] ss:$8 sps:$4 sm:$0xff]   ;;  %v746_v24 = vld [vmem:[%s1058_s1 + $0x4] ss:$8 sps:$4 sm:$0xff]  }
   0x9   :  { %387 = vmatpush1.bf16.msra.mxu1 %v757_v13  ;;  %v775_v25 = vld [vmem:[%s1058_s1 + $0x130] ss:$8 sps:$4 sm:$0xff]   ;;  %v750_v26 = vld [vmem:[%s1058_s1] ss:$8 sps:$4 sm:$0xff]   ;;  %v778_v27 = vld [vmem:[%s1058_s1 + $0x124] ss:$8 sps:$4 sm:$0xff]  }
   0xa   :  { %388 = vmatprep.subr.bf16.mxu1 %v760_v16  ;;  %v752_v28 = vld [vmem:[%s1058_s1 + $0xf4] ss:$8 sps:$4 sm:$0xff]   ;;  %v756_v29 = vld [vmem:[%s1058_s1 + $0xf0] ss:$8 sps:$4 sm:$0xff]   ;;  %v781_v30 = vld [vmem:[%s1058_s1 + $0x120] ss:$8 sps:$4 sm:$0xff]  }
   0xb   :  { %346 = vmatpush1.bf16.msra.mxu0 %v733_v6  ;;  %v784_v31 = vld [vmem:[%s1058_s1 + $0x114] ss:$8 sps:$4 sm:$0xff]   ;;  %v758_v32 = vld [vmem:[%s1058_s1 + $0xe4] ss:$8 sps:$4 sm:$0xff]   ;;  %v762_v33 = vld [vmem:[%s1058_s1 + $0xe0] ss:$8 sps:$4 sm:$0xff]  }
   0xc   :  { %347 = vmatprep.subr.bf16.mxu0 %v734_v7  ;;  %v787_v34 = vld [vmem:[%s1058_s1 + $0x110] ss:$8 sps:$4 sm:$0xff]   ;;  %v790_v36 = vld [vmem:[%s1058_s1 + $0x104] ss:$8 sps:$4 sm:$0xff]   ;;  %v764_v37 = vld [vmem:[%s1058_s1 + $0xd4] ss:$8 sps:$4 sm:$0xff]  }
   0xd   :  { %389 = vmatpush1.bf16.msra.mxu1 %v763_v17  ;;  %v800_v35 = vld [vmem:[%s1059_s0 + $0x4] ss:$12 sps:$4 sm:$0xff]   ;;  %v793_v40 = vld [vmem:[%s1058_s1 + $0x100] ss:$8 sps:$4 sm:$0xff]   ;;  %v801_v42 = vld [vmem:[%s1060_s3 + $0x78] sm:$0xff]   ;;  %v76_v5 = vshrl.u32 %v75_v4, 7 }
   0xe   :  { %390 = vmatprep.subr.bf16.mxu1 %v766_v19  ;;  %373 = vmatprep.mubr.bf16.mxu0 %v800_v35  ;;  %v768_v38 = vld [vmem:[%s1058_s1 + $0xd0] ss:$8 sps:$4 sm:$0xff]   ;;  %v770_v39 = vld [vmem:[%s1058_s1 + $0xc4] ss:$8 sps:$4 sm:$0xff]   ;;  %v796_v41 = vld [vmem:[%s1059_s0 + $0x8] ss:$12 sps:$4 sm:$0xff]  }
   0xf   :  { %348 = vmatpush1.bf16.msra.mxu0 %v736_v8  ;;  %v802_v43 = vld [vmem:[%s1060_s3 + $0x38] sm:$0xff]   ;;  %v774_v44 = vld [vmem:[%s1058_s1 + $0xc0] ss:$8 sps:$4 sm:$0xff]   ;;  %v803_v45 = vld [vmem:[%s1060_s3 + $0x70] sm:$0xff]   ;;  %v81_v6 = vsub.s32 1, %v76_v5  ;;  %v77_v8 = vsub.s32 0, %v76_v5 }
  0x10   :  { %349 = vmatprep.subr.bf16.mxu0 %v737_v11  ;;  %v776_v46 = vld [vmem:[%s1058_s1 + $0xb4] ss:$8 sps:$4 sm:$0xff]   ;;  %v780_v48 = vld [vmem:[%s1058_s1 + $0xb0] ss:$8 sps:$4 sm:$0xff]   ;;  %v805_v49 = vld [vmem:[%s1060_s3 + $0x68] sm:$0xff]  }
  0x11   :  { %391 = vmatpush1.bf16.msra.mxu1 %v769_v22  ;;  %v804_v47 = vld [vmem:[%s1060_s3 + $0x30] sm:$0xff]   ;;  %v782_v50 = vld [vmem:[%s1058_s1 + $0xa4] ss:$8 sps:$4 sm:$0xff]   ;;  %v786_v52 = vld [vmem:[%s1058_s1 + $0xa0] ss:$8 sps:$4 sm:$0xff]  }
  0x12   :  { %392 = vmatprep.subr.bf16.mxu1 %v772_v23  ;;  %v806_v51 = vld [vmem:[%s1060_s3 + $0x28] sm:$0xff]   ;;  %v788_v53 = vld [vmem:[%s1058_s1 + $0x94] ss:$8 sps:$4 sm:$0xff]   ;;  %v792_v54 = vld [vmem:[%s1058_s1 + $0x90] ss:$8 sps:$4 sm:$0xff]  }
  0x13   :  { %350 = vmatpush1.bf16.msra.mxu0 %v739_v14  ;;  %v794_v55 = vld [vmem:[%s1058_s1 + $0x84] ss:$8 sps:$4 sm:$0xff]   ;;  %v797_v56 = vld [vmem:[%s1058_s1 + $0x80] ss:$8 sps:$4 sm:$0xff]   ;;  %v809_v60 = vld [vmem:[%s1060_s3 + $0x58] sm:$0xff]  }
  0x14   :  { %351 = vmatprep.subr.bf16.mxu0 %v740_v15  ;;  %v798_v57 = vld [vmem:[%s1059_s0] ss:$12 sps:$4 sm:$0xff]   ;;  %v810_v61 = vld [vmem:[%s1060_s3 + $0x18] sm:$0xff]   ;;  %v811_v62 = vld [vmem:[%s1060_s3 + $0x50] sm:$0xff]  }
  0x15   :  { %393 = vmatpush1.bf16.msra.mxu1 %v775_v25  ;;  %v807_v58 = vld [vmem:[%s1060_s3 + $0x60] sm:$0xff]   ;;  %v812_v63 = vld [vmem:[%s1060_s3 + $0x10] sm:$0xff]   ;;  %v813_v0 = vld [vmem:[%s1060_s3 + $0x48] sm:$0xff]  }
  0x16   :  { %394 = vmatprep.subr.bf16.mxu1 %v778_v27  ;;  %v808_v59 = vld [vmem:[%s1060_s3 + $0x20] sm:$0xff]   ;;  %v814_v1 = vld [vmem:[%s1060_s3 + $0x8] sm:$0xff]  }
  0x17   :  { %352 = vmatpush1.bf16.msra.mxu0 %v742_v18  ;;  %v815_v2 = vld [vmem:[%s1060_s3 + $0x40] sm:$0xff]  }
  0x18   :  { %353 = vmatprep.subr.bf16.mxu0 %v743_v20  ;;  %v816_v3 = vld [vmem:[%s1060_s3] sm:$0xff]  }
  0x19   :  { %395 = vmatpush1.bf16.msra.mxu1 %v781_v30  ;;  %v73_v9 = vld [vmem:[%s1061_s2] sm:$0x3] }
  0x1a   :  { %396 = vmatprep.subr.bf16.mxu1 %v784_v31  ;;  %v82_v10 = vrot.slane %v73_v9, %v81_v6  ;;  %v78_v12 = vrot.slane %v73_v9, %v77_v8 }
  0x1b   :  { %354 = vmatpush1.bf16.msra.mxu0 %v745_v21 }
  0x1c   :  { %355 = vmatprep.subr.bf16.mxu0 %v746_v24 }
  0x1d   :  { %397 = vmatpush1.bf16.msra.mxu1 %v787_v34 }
  0x1e   :  { %398 = vmatprep.subr.bf16.mxu1 %v790_v36  ;;  %v676_v36 = vld [vmem:[%s1062_s4] ss:$0 sm:$0xff] }
  0x1f   :  { %356 = vmatpush1.bf16.msra.mxu0 %v750_v26 }
  0x20   :  { %357 = vmatprep.subr.bf16.mxu0 %v752_v28 }
  0x21   :  { %399 = vmatpush1.bf16.msra.mxu1 %v793_v40 }
  0x22   :  { %702 = vmatprep.subr.bf16.mxu1 %v801_v42 }
  0x23   :  { %358 = vmatpush2.bf16.msra.mxu0 %v756_v29 }
  0x24   :  { %359 = vmatprep.subr.bf16.mxu0 %v758_v32  ;;  %417 = vmatmul.mubr.bf16.vlgmr.msra.gmra.mxu1 %v796_v41 }
  0x25   :  { %703 = vmatpush3.bf16.msra.mxu1 %v802_v43 }
  0x26   :  { %704 = vmatprep.subr.bf16.mxu1 %v803_v45 }
  0x27   :  { %360 = vmatpush2.bf16.msra.mxu0 %v762_v33 }
  0x28   :  { %361 = vmatprep.subr.bf16.mxu0 %v764_v37 }
  0x29   :  { %705 = vmatpush3.bf16.msra.mxu1 %v804_v47 }
  0x2a   :  { %706 = vmatprep.subr.bf16.mxu1 %v805_v49 }
  0x2b   :  { %362 = vmatpush2.bf16.msra.mxu0 %v768_v38 }
  0x2c   :  { %363 = vmatprep.subr.bf16.mxu0 %v770_v39 }
  0x2d   :  { %707 = vmatpush3.bf16.msra.mxu1 %v806_v51 }
  0x2e   :  { %708 = vmatprep.subr.bf16.mxu1 %v807_v58 }
  0x2f   :  { %364 = vmatpush2.bf16.msra.mxu0 %v774_v44 }
  0x30   :  { %365 = vmatprep.subr.bf16.mxu0 %v776_v46 }
  0x31   :  { %709 = vmatpush3.bf16.msra.mxu1 %v808_v59 }
  0x32   :  { %710 = vmatprep.subr.bf16.mxu1 %v809_v60 }
  0x33   :  { %366 = vmatpush2.bf16.msra.mxu0 %v780_v48 }
  0x34   :  { %367 = vmatprep.subr.bf16.mxu0 %v782_v50 }
  0x35   :  { %711 = vmatpush3.bf16.msra.mxu1 %v810_v61 }
  0x36   :  { %712 = vmatprep.subr.bf16.mxu1 %v811_v62 }
  0x37   :  { %368 = vmatpush2.bf16.msra.mxu0 %v786_v52 }
  0x38   :  { %369 = vmatprep.subr.bf16.mxu0 %v788_v53 }
  0x39   :  { %713 = vmatpush3.bf16.msra.mxu1 %v812_v63 }
  0x3a   :  { %714 = vmatprep.subr.bf16.mxu1 %v813_v0 }
  0x3b   :  { %370 = vmatpush2.bf16.msra.mxu0 %v792_v54 }
  0x3c   :  { %371 = vmatprep.subr.bf16.mxu0 %v794_v55 }
  0x3d   :  { %715 = vmatpush3.bf16.msra.mxu1 %v814_v1 }
  0x3e   :  { %716 = vmatprep.subr.bf16.mxu1 %v815_v2 }
  0x3f   :  { %372 = vmatpush2.bf16.msra.mxu0 %v797_v56 }
  0x41   :  { %717 = vmatpush3.bf16.msra.mxu1 %v816_v3 }
  0x42   :  { %374 = vmatmul.mubr.bf16.vlgmr.msra.gmra.mxu0 %v798_v57 }
  0xe4   :  { %v418_v7 = vpop.f32.mrf.mxu1 }
  0xe6   :  { %v420_v11 = vpop.f32.mrf.mxu1 }
  0xe8   :  { %v422_v17 = vpop.f32.mrf.mxu1 }
  0xea   :  { %v424_v25 = vpop.f32.mrf.mxu1 }
 0x102   :  { %v375_v13 = vpop.f32.mrf.mxu0 }
 0x103   :  { %v376_v16 = vadd.f32 %v375_v13, %v78_v12 }
 0x104   :  { %v377_v14 = vpop.f32.mrf.mxu0 }
 0x105   :  { %v378_v15 = vadd.f32 %v377_v14, %v82_v10  ;;  %v419_v24 = vadd.f32 %v418_v7, %v376_v16 }
 0x106   :  { %v379_v18 = vpop.f32.mrf.mxu0 }
 0x107   :  { %v380_v19 = vadd.f32 %v379_v18, %v78_v12  ;;  %v421_v21 = vadd.f32 %v420_v11, %v378_v15  ;;  %v427_v30 = vmax.f32 %v419_v24, 0.0 }
 0x108   :  { %v381_v20 = vpop.f32.mrf.mxu0 }
 0x109   :  { %v423_v22 = vadd.f32 %v422_v17, %v380_v19  ;;  %v382_v23 = vadd.f32 %v381_v20, %v82_v10  ;;  %v428_v28 = vmax.f32 %v421_v21, 0.0 }
 0x10b   :  { %v425_v26 = vadd.f32 %v424_v25, %v382_v23  ;;  %v429_v27 = vmax.f32 %v423_v22, 0.0 }
 0x10d   :  { %v430_v29 = vmax.f32 %v425_v26, 0.0  ;;  %v431_v32 = vpack.c.bf16 %v429_v27, %v427_v30 }
 0x10f   :  { %v432_v31 = vpack.c.bf16 %v430_v29, %v428_v28 }
 0x111   :  { %600 = vmatprep.mubr.bf16.mxu1 %v432_v31 }
 0x112   :  { %601 = vmatmul.mubr.bf16.vlgmr.msra.gmra.mxu1 %v431_v32 }
 0x1d2   :  { %v718_v33 = vpop.f32.mrf.mxu1 }
 0x1d4   :  { %v719_v34 = vpop.f32.mrf.mxu1 }
 0x1d5   :  { %v720_v35 = vadd.f32 %v719_v34, %v718_v33 }
 0x1d6   :  { %v721_v37 = vpop.f32.mrf.mxu1 }
 0x1d7   :  { %v603_v39 = vadd.f32 %v720_v35, %v676_v36 }
 0x1d8   :  { %v722_v38 = vpop.f32.mrf.mxu1 }
 0x1d9   :  { %v723_v40 = vadd.f32 %v722_v38, %v721_v37  ;;  %v609_v42 = vmax.f32 %v603_v39, 0.0 }
 0x1db   :  { %v606_v41 = vadd.f32 %v723_v40, %v676_v36 }
 0x1dd   :  { %v610_v43 = vmax.f32 %v606_v41, 0.0 }
 0x1df   :  { %v700_v44 = vpack.c.bf16 %v610_v43, %v609_v42 }
 0x1e1   :  { %701 = vst [vmem:[%s1063_s5] sm:$0xff] %v700_v44  }

// kernel: forward.13
= control target key start
LH: loop header
LB: loop body
LE: loop exit
PB: predicated region body
PF: predicated region fallthrough
CT: control target
= control target key end

     0   :  { %s646_s1 = inlined_call_operand.vmem [shape: bf16[256,128], index: 1, kind: input, shape index: {}]   ;;  %s647_s0 = inlined_call_operand.vmem [shape: bf16[32,256], index: 0, kind: input, shape index: {}]   ;;  %s648_s3 = inlined_call_operand.vmem [shape: bf16[128,128], index: 3, kind: input, shape index: {}]   ;;  %s649_s2 = inlined_call_operand.vmem [shape: f32[1,128], index: 2, kind: input, shape index: {}]   ;;  %s650_s4 = inlined_call_operand.vmem [shape: f32[1,128], index: 4, kind: input, shape index: {}]   ;;  %s651_s5 = inlined_call_operand.vmem [shape: bf16[32,128], index: 5, kind: output, shape index: {}]  }
   0x1   :  { %v490_v0 = vld [vmem:[%s646_s1 + $0x78] sm:$0xff]   ;;  %v492_v2 = vld [vmem:[%s646_s1 + $0x70] sm:$0xff]   ;;  %v494_v4 = vld [vmem:[%s646_s1 + $0x68] sm:$0xff]  }
   0x2   :  { %v491_v1 = vld [vmem:[%s646_s1 + $0x38] sm:$0xff]   ;;  %432 = vmatprep.subr.bf16.mxu0 %v490_v0  ;;  %v493_v3 = vld [vmem:[%s646_s1 + $0x30] sm:$0xff]   ;;  %v495_v5 = vld [vmem:[%s646_s1 + $0x28] sm:$0xff]  }
   0x3   :  { %433 = vmatpush3.bf16.msra.mxu0 %v491_v1  ;;  %v496_v6 = vld [vmem:[%s646_s1 + $0x60] sm:$0xff]   ;;  %v498_v8 = vld [vmem:[%s646_s1 + $0x58] sm:$0xff]   ;;  %v500_v10 = vld [vmem:[%s646_s1 + $0x50] sm:$0xff]  }
   0x4   :  { %434 = vmatprep.subr.bf16.mxu0 %v492_v2  ;;  %v497_v7 = vld [vmem:[%s646_s1 + $0x20] sm:$0xff]   ;;  %v499_v9 = vld [vmem:[%s646_s1 + $0x18] sm:$0xff]   ;;  %v501_v12 = vld [vmem:[%s646_s1 + $0x10] sm:$0xff]  }
   0x5   :  { %v508_v11 = vld [vmem:[%s647_s0 + $0x4] ss:$8 sps:$4 sm:$0xff]   ;;  %v512_v14 = vld [vmem:[%s648_s3 + $0x38] sm:$0xff]   ;;  %v513_v15 = vld [vmem:[%s648_s3 + $0x30] sm:$0xff]  }
   0x6   :  { %v502_v13 = vld [vmem:[%s646_s1 + $0x48] sm:$0xff]   ;;  %212 = vmatprep.mubr.bf16.mxu0 %v508_v11  ;;  %470 = vmatprep.subr.bf16.mxu1 %v512_v14  ;;  %v504_v18 = vld [vmem:[%s646_s1 + $0x40] sm:$0xff]   ;;  %v509_v21 = vld [vmem:[%s647_s0 + $0x14] ss:$8 sps:$4 sm:$0xff]  }
   0x7   :  { %435 = vmatpush3.bf16.msra.mxu0 %v493_v3  ;;  %v503_v16 = vld [vmem:[%s646_s1 + $0x8] sm:$0xff]   ;;  %471 = vmatpush3.bf16.msra.mxu1 %v512_v14  ;;  %v505_v19 = vld [vmem:[%s646_s1] sm:$0xff]   ;;  %v511_v22 = vld [vmem:[%s647_s0 + $0x10] ss:$8 sps:$4 sm:$0xff]  }
   0x8   :  { %436 = vmatprep.subr.bf16.mxu0 %v494_v4  ;;  %v514_v17 = vld [vmem:[%s648_s3 + $0x28] sm:$0xff]   ;;  %472 = vmatprep.subr.bf16.mxu1 %v513_v15  ;;  %v515_v23 = vld [vmem:[%s648_s3 + $0x20] sm:$0xff]   ;;  %v516_v24 = vld [vmem:[%s648_s3 + $0x18] sm:$0xff]  }
   0x9   :  { %v506_v20 = vld [vmem:[%s647_s0] ss:$8 sps:$4 sm:$0xff]   ;;  %v517_v25 = vld [vmem:[%s648_s3 + $0x10] sm:$0xff]  }
   0xa   :  { %v518_v26 = vld [vmem:[%s648_s3 + $0x8] sm:$0xff]   ;;  %v519_v27 = vld [vmem:[%s648_s3] sm:$0xff]  }
   0xb   :  { %437 = vmatpush3.bf16.msra.mxu0 %v495_v5  ;;  %473 = vmatpush3.bf16.msra.mxu1 %v513_v15  ;;  %v383_v32 = vld [vmem:[%s649_s2] ss:$0 sm:$0xff] }
   0xc   :  { %438 = vmatprep.subr.bf16.mxu0 %v496_v6  ;;  %474 = vmatprep.subr.bf16.mxu1 %v514_v17  ;;  %v404_v52 = vld [vmem:[%s650_s4] ss:$0 sm:$0xff] }
   0xf   :  { %439 = vmatpush3.bf16.msra.mxu0 %v497_v7  ;;  %475 = vmatpush3.bf16.msra.mxu1 %v514_v17 }
  0x10   :  { %440 = vmatprep.subr.bf16.mxu0 %v498_v8  ;;  %476 = vmatprep.subr.bf16.mxu1 %v515_v23 }
  0x13   :  { %441 = vmatpush3.bf16.msra.mxu0 %v499_v9  ;;  %477 = vmatpush3.bf16.msra.mxu1 %v515_v23 }
  0x14   :  { %442 = vmatprep.subr.bf16.mxu0 %v500_v10  ;;  %478 = vmatprep.subr.bf16.mxu1 %v516_v24 }
  0x17   :  { %443 = vmatpush3.bf16.msra.mxu0 %v501_v12  ;;  %479 = vmatpush3.bf16.msra.mxu1 %v516_v24 }
  0x18   :  { %444 = vmatprep.subr.bf16.mxu0 %v502_v13  ;;  %480 = vmatprep.subr.bf16.mxu1 %v517_v25 }
  0x1b   :  { %445 = vmatpush3.bf16.msra.mxu0 %v503_v16  ;;  %481 = vmatpush3.bf16.msra.mxu1 %v517_v25 }
  0x1c   :  { %446 = vmatprep.subr.bf16.mxu0 %v504_v18  ;;  %482 = vmatprep.subr.bf16.mxu1 %v518_v26 }
  0x1f   :  { %447 = vmatpush3.bf16.msra.mxu0 %v505_v19  ;;  %483 = vmatpush3.bf16.msra.mxu1 %v518_v26 }
  0x20   :  { %484 = vmatprep.subr.bf16.mxu1 %v519_v27 }
  0x22   :  { %213 = vmatmul.mubr.bf16.vlgmr.msra.gmra.mxu0 %v506_v20 }
  0x23   :  { %220 = vmatprep.mubr.bf16.mxu0 %v509_v21  ;;  %485 = vmatpush3.bf16.msra.mxu1 %v519_v27 }
  0x2a   :  { %221 = vmatmul.mubr.bf16.gmra.mxu0 %v511_v22 }
  0xe2   :  { %v448_v28 = vpop.f32.mrf.mxu0 }
  0xe4   :  { %v449_v29 = vpop.f32.mrf.mxu0 }
  0xe5   :  { %v450_v30 = vadd.f32 %v449_v29, %v448_v28 }
  0xe6   :  { %v451_v31 = vpop.f32.mrf.mxu0 }
  0xe7   :  { %v215_v35 = vadd.f32 %v450_v30, %v383_v32 }
  0xe8   :  { %v452_v33 = vpop.f32.mrf.mxu0 }
  0xe9   :  { %v453_v34 = vadd.f32 %v452_v33, %v451_v31  ;;  %v229_v40 = vmax.f32 %v215_v35, 0.0 }
  0xea   :  { %v454_v36 = vpop.f32.mrf.mxu0 }
  0xeb   :  { %v218_v37 = vadd.f32 %v453_v34, %v383_v32 }
  0xec   :  { %v455_v38 = vpop.f32.mrf.mxu0 }
  0xed   :  { %v456_v39 = vadd.f32 %v455_v38, %v454_v36  ;;  %v230_v41 = vmax.f32 %v218_v37, 0.0 }
  0xee   :  { %v457_v42 = vpop.f32.mrf.mxu0 }
  0xef   :  { %v233_v43 = vpack.c.bf16 %v230_v41, %v229_v40  ;;  %v223_v45 = vadd.f32 %v456_v39, %v383_v32 }
  0xf0   :  { %v458_v44 = vpop.f32.mrf.mxu0 }
  0xf1   :  { %v459_v46 = vadd.f32 %v458_v44, %v457_v42  ;;  %486 = vmatprep.mubr.bf16.mxu1 %v233_v43  ;;  %v231_v48 = vmax.f32 %v223_v45, 0.0 }
  0xf3   :  { %v226_v47 = vadd.f32 %v459_v46, %v383_v32 }
  0xf5   :  { %v232_v49 = vmax.f32 %v226_v47, 0.0 }
  0xf7   :  { %v234_v50 = vpack.c.bf16 %v232_v49, %v231_v48 }
  0xf9   :  { %487 = vmatmul.mubr.bf16.vlgmr.msra.gmra.mxu1 %v234_v50 }
 0x1b9   :  { %v488_v51 = vpop.f32.mrf.mxu1 }
 0x1ba   :  { %v349_v54 = vadd.f32 %v488_v51, %v404_v52 }
 0x1bb   :  { %v340_v53 = vpop.f32.mrf.mxu1 }
 0x1bc   :  { %v341_v56 = vadd.f32 %v404_v52, %v340_v53  ;;  %v357_v59 = vmax.f32 %v349_v54, 0.0 }
 0x1bd   :  { %v489_v55 = vpop.f32.mrf.mxu1 }
 0x1be   :  { %v352_v57 = vadd.f32 %v489_v55, %v404_v52  ;;  %v355_v62 = vmax.f32 %v341_v56, 0.0 }
 0x1bf   :  { %v343_v58 = vpop.f32.mrf.mxu1 }
 0x1c0   :  { %v358_v60 = vmax.f32 %v352_v57, 0.0  ;;  %v344_v61 = vadd.f32 %v404_v52, %v343_v58 }
 0x1c2   :  { %v429_v63 = vpack.c.bf16 %v358_v60, %v357_v59  ;;  %v356_v0 = vmax.f32 %v344_v61, 0.0 }
 0x1c4   :  { %431 = vst [vmem:[%s651_s5 + $0x8] sm:$0xff] %v429_v63   ;;  %v424_v1 = vpack.c.bf16 %v356_v0, %v355_v62 }
 0x1c6   :  { %425 = vst [vmem:[%s651_s5] sm:$0xff] %v424_v1  }

// kernel: forward.14
= control target key start
LH: loop header
LB: loop body
LE: loop exit
PB: predicated region body
PF: predicated region fallthrough
CT: control target
= control target key end

     0   :  { %s798_s1 = inlined_call_operand.vmem [shape: bf16[256,128], index: 1, kind: input, shape index: {}]   ;;  %s799_s0 = inlined_call_operand.vmem [shape: bf16[64,256], index: 0, kind: input, shape index: {}]   ;;  %s800_s3 = inlined_call_operand.vmem [shape: bf16[128,128], index: 3, kind: input, shape index: {}]   ;;  %s801_s2 = inlined_call_operand.vmem [shape: f32[1,128], index: 2, kind: input, shape index: {}]   ;;  %s802_s4 = inlined_call_operand.vmem [shape: f32[1,128], index: 4, kind: input, shape index: {}]   ;;  %s803_s5 = inlined_call_operand.vmem [shape: bf16[64,128], index: 5, kind: output, shape index: {}]  }
   0x1   :  { %v618_v0 = vld [vmem:[%s798_s1 + $0x78] sm:$0xff]   ;;  %v620_v2 = vld [vmem:[%s798_s1 + $0x70] sm:$0xff]   ;;  %v622_v4 = vld [vmem:[%s798_s1 + $0x68] sm:$0xff]  }
   0x2   :  { %v619_v1 = vld [vmem:[%s798_s1 + $0x38] sm:$0xff]   ;;  %542 = vmatprep.subr.bf16.mxu0 %v618_v0  ;;  %v621_v3 = vld [vmem:[%s798_s1 + $0x30] sm:$0xff]   ;;  %v623_v5 = vld [vmem:[%s798_s1 + $0x28] sm:$0xff]  }
   0x3   :  { %543 = vmatpush3.bf16.msra.mxu0 %v619_v1  ;;  %v624_v6 = vld [vmem:[%s798_s1 + $0x60] sm:$0xff]   ;;  %v626_v8 = vld [vmem:[%s798_s1 + $0x58] sm:$0xff]   ;;  %v628_v10 = vld [vmem:[%s798_s1 + $0x50] sm:$0xff]  }
   0x4   :  { %544 = vmatprep.subr.bf16.mxu0 %v620_v2  ;;  %v625_v7 = vld [vmem:[%s798_s1 + $0x20] sm:$0xff]   ;;  %v627_v9 = vld [vmem:[%s798_s1 + $0x18] sm:$0xff]   ;;  %v629_v12 = vld [vmem:[%s798_s1 + $0x10] sm:$0xff]  }
   0x5   :  { %v636_v11 = vld [vmem:[%s799_s0 + $0x4] ss:$8 sps:$4 sm:$0xff]   ;;  %v646_v16 = vld [vmem:[%s800_s3 + $0x38] sm:$0xff]   ;;  %v647_v17 = vld [vmem:[%s800_s3 + $0x30] sm:$0xff]  }
   0x6   :  { %236 = vmatprep.mubr.bf16.mxu0 %v636_v11  ;;  %v630_v13 = vld [vmem:[%s798_s1 + $0x48] sm:$0xff]   ;;  %v632_v15 = vld [vmem:[%s798_s1 + $0x40] sm:$0xff]   ;;  %594 = vmatprep.subr.bf16.mxu1 %v646_v16  ;;  %v637_v21 = vld [vmem:[%s799_s0 + $0x14] ss:$8 sps:$4 sm:$0xff]  }
   0x7   :  { %545 = vmatpush3.bf16.msra.mxu0 %v621_v3  ;;  %v631_v14 = vld [vmem:[%s798_s1 + $0x8] sm:$0xff]   ;;  %595 = vmatpush3.bf16.msra.mxu1 %v646_v16  ;;  %v633_v19 = vld [vmem:[%s798_s1] sm:$0xff]   ;;  %v639_v22 = vld [vmem:[%s799_s0 + $0x10] ss:$8 sps:$4 sm:$0xff]  }
   0x8   :  { %546 = vmatprep.subr.bf16.mxu0 %v622_v4  ;;  %v648_v18 = vld [vmem:[%s800_s3 + $0x28] sm:$0xff]   ;;  %596 = vmatprep.subr.bf16.mxu1 %v647_v17  ;;  %v643_v25 = vld [vmem:[%s799_s0 + $0x34] ss:$8 sps:$4 sm:$0xff]   ;;  %v645_v26 = vld [vmem:[%s799_s0 + $0x30] ss:$8 sps:$4 sm:$0xff]  }
   0x9   :  { %v634_v20 = vld [vmem:[%s799_s0] ss:$8 sps:$4 sm:$0xff]   ;;  %v640_v23 = vld [vmem:[%s799_s0 + $0x24] ss:$8 sps:$4 sm:$0xff]   ;;  %v650_v28 = vld [vmem:[%s800_s3 + $0x18] sm:$0xff]  }
   0xa   :  { %v642_v24 = vld [vmem:[%s799_s0 + $0x20] ss:$8 sps:$4 sm:$0xff]   ;;  %v651_v29 = vld [vmem:[%s800_s3 + $0x10] sm:$0xff]  }
   0xb   :  { %547 = vmatpush3.bf16.msra.mxu0 %v623_v5  ;;  %597 = vmatpush3.bf16.msra.mxu1 %v647_v17  ;;  %v649_v27 = vld [vmem:[%s800_s3 + $0x20] sm:$0xff]   ;;  %v652_v30 = vld [vmem:[%s800_s3 + $0x8] sm:$0xff]  }
   0xc   :  { %548 = vmatprep.subr.bf16.mxu0 %v624_v6  ;;  %598 = vmatprep.subr.bf16.mxu1 %v648_v18  ;;  %v653_v31 = vld [vmem:[%s800_s3] sm:$0xff]  }
   0xd   :  { %v469_v36 = vld [vmem:[%s801_s2] ss:$0 sm:$0xff] }
   0xf   :  { %549 = vmatpush3.bf16.msra.mxu0 %v625_v7  ;;  %599 = vmatpush3.bf16.msra.mxu1 %v648_v18 }
  0x10   :  { %550 = vmatprep.subr.bf16.mxu0 %v626_v8  ;;  %600 = vmatprep.subr.bf16.mxu1 %v649_v27 }
  0x13   :  { %551 = vmatpush3.bf16.msra.mxu0 %v627_v9  ;;  %601 = vmatpush3.bf16.msra.mxu1 %v649_v27 }
  0x14   :  { %552 = vmatprep.subr.bf16.mxu0 %v628_v10  ;;  %602 = vmatprep.subr.bf16.mxu1 %v650_v28 }
  0x17   :  { %553 = vmatpush3.bf16.msra.mxu0 %v629_v12  ;;  %603 = vmatpush3.bf16.msra.mxu1 %v650_v28 }
  0x18   :  { %554 = vmatprep.subr.bf16.mxu0 %v630_v13  ;;  %604 = vmatprep.subr.bf16.mxu1 %v651_v29 }
  0x1b   :  { %555 = vmatpush3.bf16.msra.mxu0 %v631_v14  ;;  %605 = vmatpush3.bf16.msra.mxu1 %v651_v29  ;;  %v494_v14 = vld [vmem:[%s802_s4] ss:$0 sm:$0xff] }
  0x1c   :  { %556 = vmatprep.subr.bf16.mxu0 %v632_v15  ;;  %606 = vmatprep.subr.bf16.mxu1 %v652_v30 }
  0x1f   :  { %557 = vmatpush3.bf16.msra.mxu0 %v633_v19  ;;  %607 = vmatpush3.bf16.msra.mxu1 %v652_v30 }
  0x20   :  { %608 = vmatprep.subr.bf16.mxu1 %v653_v31 }
  0x22   :  { %237 = vmatmul.mubr.bf16.vlgmr.msra.gmra.mxu0 %v634_v20 }
  0x23   :  { %244 = vmatprep.mubr.bf16.mxu0 %v637_v21  ;;  %609 = vmatpush3.bf16.msra.mxu1 %v653_v31 }
  0x2a   :  { %245 = vmatmul.mubr.bf16.gmra.mxu0 %v639_v22 }
  0x2b   :  { %252 = vmatprep.mubr.bf16.mxu0 %v640_v23 }
  0x32   :  { %253 = vmatmul.mubr.bf16.gmra.mxu0 %v642_v24 }
  0x33   :  { %260 = vmatprep.mubr.bf16.mxu0 %v643_v25 }
  0x3a   :  { %261 = vmatmul.mubr.bf16.gmra.mxu0 %v645_v26 }
  0xe2   :  { %v558_v32 = vpop.f32.mrf.mxu0 }
  0xe4   :  { %v559_v33 = vpop.f32.mrf.mxu0 }
  0xe5   :  { %v560_v34 = vadd.f32 %v559_v33, %v558_v32 }
  0xe6   :  { %v561_v35 = vpop.f32.mrf.mxu0 }
  0xe7   :  { %v239_v39 = vadd.f32 %v560_v34, %v469_v36 }
  0xe8   :  { %v562_v37 = vpop.f32.mrf.mxu0 }
  0xe9   :  { %v563_v38 = vadd.f32 %v562_v37, %v561_v35  ;;  %v269_v44 = vmax.f32 %v239_v39, 0.0 }
  0xea   :  { %v564_v40 = vpop.f32.mrf.mxu0 }
  0xeb   :  { %v242_v41 = vadd.f32 %v563_v38, %v469_v36 }
  0xec   :  { %v565_v42 = vpop.f32.mrf.mxu0 }
  0xed   :  { %v566_v43 = vadd.f32 %v565_v42, %v564_v40  ;;  %v270_v45 = vmax.f32 %v242_v41, 0.0 }
  0xee   :  { %v567_v46 = vpop.f32.mrf.mxu0 }
  0xef   :  { %v277_v47 = vpack.c.bf16 %v270_v45, %v269_v44  ;;  %v247_v49 = vadd.f32 %v566_v43, %v469_v36 }
  0xf0   :  { %v568_v48 = vpop.f32.mrf.mxu0 }
  0xf1   :  { %v569_v50 = vadd.f32 %v568_v48, %v567_v46  ;;  %610 = vmatprep.mubr.bf16.mxu1 %v277_v47  ;;  %v271_v54 = vmax.f32 %v247_v49, 0.0 }
  0xf2   :  { %v570_v51 = vpop.f32.mrf.mxu0 }
  0xf3   :  { %v250_v52 = vadd.f32 %v569_v50, %v469_v36 }
  0xf4   :  { %v571_v53 = vpop.f32.mrf.mxu0 }
  0xf5   :  { %v272_v55 = vmax.f32 %v250_v52, 0.0  ;;  %v572_v56 = vadd.f32 %v571_v53, %v570_v51 }
  0xf6   :  { %v573_v57 = vpop.f32.mrf.mxu0 }
  0xf7   :  { %v278_v58 = vpack.c.bf16 %v272_v55, %v271_v54  ;;  %v255_v60 = vadd.f32 %v572_v56, %v469_v36 }
  0xf8   :  { %v574_v59 = vpop.f32.mrf.mxu0 }
  0xf9   :  { %v575_v61 = vadd.f32 %v574_v59, %v573_v57  ;;  %611 = vmatmul.mubr.bf16.vlgmr.msra.gmra.mxu1 %v278_v58  ;;  %v273_v1 = vmax.f32 %v255_v60, 0.0 }
  0xfa   :  { %v576_v62 = vpop.f32.mrf.mxu0 }
  0xfb   :  { %v258_v63 = vadd.f32 %v575_v61, %v469_v36 }
  0xfc   :  { %v577_v0 = vpop.f32.mrf.mxu0 }
  0xfd   :  { %v274_v2 = vmax.f32 %v258_v63, 0.0  ;;  %v578_v3 = vadd.f32 %v577_v0, %v576_v62 }
  0xfe   :  { %v579_v4 = vpop.f32.mrf.mxu0 }
  0xff   :  { %v279_v5 = vpack.c.bf16 %v274_v2, %v273_v1  ;;  %v263_v7 = vadd.f32 %v578_v3, %v469_v36 }
 0x100   :  { %v580_v6 = vpop.f32.mrf.mxu0 }
 0x101   :  { %v581_v8 = vadd.f32 %v580_v6, %v579_v4  ;;  %614 = vmatprep.mubr.bf16.mxu1 %v279_v5  ;;  %v275_v10 = vmax.f32 %v263_v7, 0.0 }
 0x103   :  { %v266_v9 = vadd.f32 %v581_v8, %v469_v36 }
 0x105   :  { %v276_v11 = vmax.f32 %v266_v9, 0.0 }
 0x107   :  { %v280_v12 = vpack.c.bf16 %v276_v11, %v275_v10 }
 0x109   :  { %615 = vmatmul.mubr.bf16.gmra.mxu1 %v280_v12 }
 0x1b9   :  { %v612_v13 = vpop.f32.mrf.mxu1 }
 0x1ba   :  { %v395_v16 = vadd.f32 %v612_v13, %v494_v14 }
 0x1bb   :  { %v386_v15 = vpop.f32.mrf.mxu1 }
 0x1bc   :  { %v387_v18 = vadd.f32 %v494_v14, %v386_v15  ;;  %v419_v21 = vmax.f32 %v395_v16, 0.0 }
 0x1bd   :  { %v613_v17 = vpop.f32.mrf.mxu1 }
 0x1be   :  { %v398_v19 = vadd.f32 %v613_v17, %v494_v14  ;;  %v417_v24 = vmax.f32 %v387_v18, 0.0 }
 0x1bf   :  { %v389_v20 = vpop.f32.mrf.mxu1 }
 0x1c0   :  { %v420_v22 = vmax.f32 %v398_v19, 0.0  ;;  %v390_v23 = vadd.f32 %v494_v14, %v389_v20 }
 0x1c2   :  { %v527_v25 = vpack.c.bf16 %v420_v22, %v419_v21  ;;  %v418_v26 = vmax.f32 %v390_v23, 0.0 }
 0x1c4   :  { %539 = vst [vmem:[%s803_s5 + $0x8] sm:$0xff] %v527_v25   ;;  %v522_v27 = vpack.c.bf16 %v418_v26, %v417_v24 }
 0x1c6   :  { %523 = vst [vmem:[%s803_s5] sm:$0xff] %v522_v27  }
 0x1c9   :  { %v616_v28 = vpop.f32.mrf.mxu1 }
 0x1ca   :  { %v411_v30 = vadd.f32 %v616_v28, %v494_v14 }
 0x1cb   :  { %v402_v29 = vpop.f32.mrf.mxu1 }
 0x1cc   :  { %v403_v32 = vadd.f32 %v494_v14, %v402_v29  ;;  %v423_v35 = vmax.f32 %v411_v30, 0.0 }
 0x1cd   :  { %v617_v31 = vpop.f32.mrf.mxu1 }
 0x1ce   :  { %v414_v33 = vadd.f32 %v617_v31, %v494_v14  ;;  %v421_v38 = vmax.f32 %v403_v32, 0.0 }
 0x1cf   :  { %v405_v34 = vpop.f32.mrf.mxu1 }
 0x1d0   :  { %v424_v36 = vmax.f32 %v414_v33, 0.0  ;;  %v406_v37 = vadd.f32 %v494_v14, %v405_v34 }
 0x1d2   :  { %v537_v39 = vpack.c.bf16 %v424_v36, %v423_v35  ;;  %v422_v40 = vmax.f32 %v406_v37, 0.0 }
 0x1d4   :  { %541 = vst [vmem:[%s803_s5 + $0x18] sm:$0xff] %v537_v39   ;;  %v532_v41 = vpack.c.bf16 %v422_v40, %v421_v38 }
 0x1d6   :  { %540 = vst [vmem:[%s803_s5 + $0x10] sm:$0xff] %v532_v41  }

// kernel: forward.15
= control target key start
LH: loop header
LB: loop body
LE: loop exit
PB: predicated region body
PF: predicated region fallthrough
CT: control target
= control target key end

     0   :  { %s1338_s1 = inlined_call_operand.vmem [shape: bf16[256,128], index: 1, kind: input, shape index: {}]   ;;  %s1339_s0 = inlined_call_operand.vmem [shape: bf16[128,256], index: 0, kind: input, shape index: {}]   ;;  %s1340_s3 = inlined_call_operand.vmem [shape: bf16[128,128], index: 3, kind: input, shape index: {}]   ;;  %s1341_s5 = inlined_call_operand.vmem [shape: bf16[128,128], index: 5, kind: input, shape index: {}]   ;;  %s1342_s2 = inlined_call_operand.vmem [shape: f32[1,128], index: 2, kind: input, shape index: {}]   ;;  %s1343_s4 = inlined_call_operand.vmem [shape: f32[1,128], index: 4, kind: input, shape index: {}]   ;;  %s1344_s6 = inlined_call_operand.vmem [shape: f32[128,128], index: 6, kind: input, shape index: {}]   ;;  %s1345_s7 = inlined_call_operand.vmem [shape: f32[128,128], index: 7, kind: output, shape index: {}]  }
   0x1   :  { %v978_v0 = vld [vmem:[%s1338_s1 + $0x78] sm:$0xff]   ;;  %v980_v2 = vld [vmem:[%s1338_s1 + $0x70] sm:$0xff]   ;;  %v982_v4 = vld [vmem:[%s1338_s1 + $0x68] sm:$0xff]  }
   0x2   :  { %v979_v1 = vld [vmem:[%s1338_s1 + $0x38] sm:$0xff]   ;;  %818 = vmatprep.subr.bf16.mxu0 %v978_v0  ;;  %v981_v3 = vld [vmem:[%s1338_s1 + $0x30] sm:$0xff]   ;;  %v983_v5 = vld [vmem:[%s1338_s1 + $0x28] sm:$0xff]  }
   0x3   :  { %819 = vmatpush3.bf16.msra.mxu0 %v979_v1  ;;  %v984_v6 = vld [vmem:[%s1338_s1 + $0x60] sm:$0xff]   ;;  %v986_v8 = vld [vmem:[%s1338_s1 + $0x58] sm:$0xff]   ;;  %v988_v10 = vld [vmem:[%s1338_s1 + $0x50] sm:$0xff]  }
   0x4   :  { %820 = vmatprep.subr.bf16.mxu0 %v980_v2  ;;  %v985_v7 = vld [vmem:[%s1338_s1 + $0x20] sm:$0xff]   ;;  %v987_v9 = vld [vmem:[%s1338_s1 + $0x18] sm:$0xff]   ;;  %v989_v12 = vld [vmem:[%s1338_s1 + $0x10] sm:$0xff]  }
   0x5   :  { %v996_v11 = vld [vmem:[%s1339_s0 + $0x4] ss:$8 sps:$4 sm:$0xff]   ;;  %v1018_v17 = vld [vmem:[%s1340_s3 + $0x38] sm:$0xff]   ;;  %v994_v18 = vld [vmem:[%s1339_s0] ss:$8 sps:$4 sm:$0xff]  }
   0x6   :  { %290 = vmatprep.mubr.bf16.mxu0 %v996_v11  ;;  %v990_v13 = vld [vmem:[%s1338_s1 + $0x48] sm:$0xff]   ;;  %v992_v15 = vld [vmem:[%s1338_s1 + $0x40] sm:$0xff]   ;;  %v1019_v19 = vld [vmem:[%s1340_s3 + $0x30] sm:$0xff]   ;;  %914 = vmatprep.subr.bf16.mxu1 %v1018_v17 }
   0x7   :  { %821 = vmatpush3.bf16.msra.mxu0 %v981_v3  ;;  %v991_v14 = vld [vmem:[%s1338_s1 + $0x8] sm:$0xff]   ;;  %v993_v16 = vld [vmem:[%s1338_s1] sm:$0xff]   ;;  %v997_v20 = vld [vmem:[%s1339_s0 + $0x14] ss:$8 sps:$4 sm:$0xff]   ;;  %915 = vmatpush3.bf16.msra.mxu1 %v1018_v17 }
   0x8   :  { %822 = vmatprep.subr.bf16.mxu0 %v982_v4  ;;  %v1020_v21 = vld [vmem:[%s1340_s3 + $0x28] sm:$0xff]   ;;  %916 = vmatprep.subr.bf16.mxu1 %v1019_v19  ;;  %v999_v22 = vld [vmem:[%s1339_s0 + $0x10] ss:$8 sps:$4 sm:$0xff]   ;;  %v1003_v25 = vld [vmem:[%s1339_s0 + $0x34] ss:$8 sps:$4 sm:$0xff]  }
   0x9   :  { %v1000_v23 = vld [vmem:[%s1339_s0 + $0x24] ss:$8 sps:$4 sm:$0xff]   ;;  %v1002_v24 = vld [vmem:[%s1339_s0 + $0x20] ss:$8 sps:$4 sm:$0xff]   ;;  %v1005_v26 = vld [vmem:[%s1339_s0 + $0x30] ss:$8 sps:$4 sm:$0xff]  }
   0xa   :  { %v1006_v27 = vld [vmem:[%s1339_s0 + $0x44] ss:$8 sps:$4 sm:$0xff]   ;;  %v1008_v28 = vld [vmem:[%s1339_s0 + $0x40] ss:$8 sps:$4 sm:$0xff]   ;;  %v1009_v29 = vld [vmem:[%s1339_s0 + $0x54] ss:$8 sps:$4 sm:$0xff]  }
   0xb   :  { %823 = vmatpush3.bf16.msra.mxu0 %v983_v5  ;;  %917 = vmatpush3.bf16.msra.mxu1 %v1019_v19  ;;  %v1011_v30 = vld [vmem:[%s1339_s0 + $0x50] ss:$8 sps:$4 sm:$0xff]   ;;  %v1012_v31 = vld [vmem:[%s1339_s0 + $0x64] ss:$8 sps:$4 sm:$0xff]   ;;  %v1014_v32 = vld [vmem:[%s1339_s0 + $0x60] ss:$8 sps:$4 sm:$0xff]  }
   0xc   :  { %824 = vmatprep.subr.bf16.mxu0 %v984_v6  ;;  %918 = vmatprep.subr.bf16.mxu1 %v1020_v21  ;;  %v1015_v33 = vld [vmem:[%s1339_s0 + $0x74] ss:$8 sps:$4 sm:$0xff]   ;;  %v1017_v34 = vld [vmem:[%s1339_s0 + $0x70] ss:$8 sps:$4 sm:$0xff]   ;;  %v1021_v35 = vld [vmem:[%s1340_s3 + $0x20] sm:$0xff]  }
   0xd   :  { %v1022_v36 = vld [vmem:[%s1340_s3 + $0x18] sm:$0xff]   ;;  %v1023_v37 = vld [vmem:[%s1340_s3 + $0x10] sm:$0xff]   ;;  %v1024_v38 = vld [vmem:[%s1340_s3 + $0x8] sm:$0xff]  }
   0xe   :  { %v1025_v39 = vld [vmem:[%s1340_s3] sm:$0xff]   ;;  %v1026_v40 = vld [vmem:[%s1341_s5 + $0x38] sm:$0xff]   ;;  %v1027_v4 = vld [vmem:[%s1341_s5 + $0x30] sm:$0xff]  }
   0xf   :  { %825 = vmatpush3.bf16.msra.mxu0 %v985_v7  ;;  %919 = vmatpush3.bf16.msra.mxu1 %v1020_v21  ;;  %v1200_v45 = vld [vmem:[%s1342_s2] ss:$0 sm:$0xff] }
  0x10   :  { %826 = vmatprep.subr.bf16.mxu0 %v986_v8  ;;  %920 = vmatprep.subr.bf16.mxu1 %v1021_v35  ;;  %v1029_v17 = vld [vmem:[%s1341_s5 + $0x20] sm:$0xff]  }
  0x13   :  { %827 = vmatpush3.bf16.msra.mxu0 %v987_v9  ;;  %921 = vmatpush3.bf16.msra.mxu1 %v1021_v35 }
  0x14   :  { %828 = vmatprep.subr.bf16.mxu0 %v988_v10  ;;  %922 = vmatprep.subr.bf16.mxu1 %v1022_v36  ;;  %v1028_v10 = vld [vmem:[%s1341_s5 + $0x28] sm:$0xff]  }
  0x17   :  { %829 = vmatpush3.bf16.msra.mxu0 %v989_v12  ;;  %923 = vmatpush3.bf16.msra.mxu1 %v1022_v36 }
  0x18   :  { %830 = vmatprep.subr.bf16.mxu0 %v990_v13  ;;  %924 = vmatprep.subr.bf16.mxu1 %v1023_v37 }
  0x1b   :  { %831 = vmatpush3.bf16.msra.mxu0 %v991_v14  ;;  %925 = vmatpush3.bf16.msra.mxu1 %v1023_v37 }
  0x1c   :  { %832 = vmatprep.subr.bf16.mxu0 %v992_v15  ;;  %926 = vmatprep.subr.bf16.mxu1 %v1024_v38 }
  0x1f   :  { %833 = vmatpush3.bf16.msra.mxu0 %v993_v16  ;;  %927 = vmatpush3.bf16.msra.mxu1 %v1024_v38 }
  0x20   :  { %928 = vmatprep.subr.bf16.mxu1 %v1025_v39 }
  0x22   :  { %291 = vmatmul.mubr.bf16.vlgmr.msra.gmra.mxu0 %v994_v18 }
  0x23   :  { %298 = vmatprep.mubr.bf16.mxu0 %v997_v20  ;;  %929 = vmatpush3.bf16.msra.mxu1 %v1025_v39 }
  0x24   :  { %946 = vmatprep.subr.bf16.mxu1 %v1026_v40 }
  0x2a   :  { %299 = vmatmul.mubr.bf16.gmra.mxu0 %v999_v22 }
  0x2b   :  { %306 = vmatprep.mubr.bf16.mxu0 %v1000_v23  ;;  %v1030_v23 = vld [vmem:[%s1341_s5 + $0x18] sm:$0xff]  }
  0x32   :  { %307 = vmatmul.mubr.bf16.gmra.mxu0 %v1002_v24 }
  0x33   :  { %314 = vmatprep.mubr.bf16.mxu0 %v1003_v25 }
  0x3a   :  { %315 = vmatmul.mubr.bf16.gmra.mxu0 %v1005_v26 }
  0x3b   :  { %322 = vmatprep.mubr.bf16.mxu0 %v1006_v27 }
  0x42   :  { %323 = vmatmul.mubr.bf16.gmra.mxu0 %v1008_v28 }
  0x43   :  { %330 = vmatprep.mubr.bf16.mxu0 %v1009_v29 }
  0x4a   :  { %331 = vmatmul.mubr.bf16.gmra.mxu0 %v1011_v30 }
  0x4b   :  { %338 = vmatprep.mubr.bf16.mxu0 %v1012_v31 }
  0x52   :  { %339 = vmatmul.mubr.bf16.gmra.mxu0 %v1014_v32 }
  0x53   :  { %346 = vmatprep.mubr.bf16.mxu0 %v1015_v33 }
  0x5a   :  { %347 = vmatmul.mubr.bf16.gmra.mxu0 %v1017_v34 }
  0xe2   :  { %v834_v41 = vpop.f32.mrf.mxu0 }
  0xe4   :  { %v835_v42 = vpop.f32.mrf.mxu0 }
  0xe5   :  { %v836_v43 = vadd.f32 %v835_v42, %v834_v41 }
  0xe6   :  { %v837_v44 = vpop.f32.mrf.mxu0 }
  0xe7   :  { %v293_v48 = vadd.f32 %v836_v43, %v1200_v45 }
  0xe8   :  { %v838_v46 = vpop.f32.mrf.mxu0 }
  0xe9   :  { %v839_v47 = vadd.f32 %v838_v46, %v837_v44  ;;  %v355_v53 = vmax.f32 %v293_v48, 0.0 }
  0xea   :  { %v840_v49 = vpop.f32.mrf.mxu0 }
  0xeb   :  { %v296_v50 = vadd.f32 %v839_v47, %v1200_v45 }
  0xec   :  { %v841_v51 = vpop.f32.mrf.mxu0 }
  0xed   :  { %v842_v52 = vadd.f32 %v841_v51, %v840_v49  ;;  %v356_v54 = vmax.f32 %v296_v50, 0.0 }
  0xee   :  { %v843_v55 = vpop.f32.mrf.mxu0 }
  0xef   :  { %v371_v56 = vpack.c.bf16 %v356_v54, %v355_v53  ;;  %v301_v58 = vadd.f32 %v842_v52, %v1200_v45 }
  0xf0   :  { %v844_v57 = vpop.f32.mrf.mxu0 }
  0xf1   :  { %v845_v59 = vadd.f32 %v844_v57, %v843_v55  ;;  %930 = vmatprep.mubr.bf16.mxu1 %v371_v56  ;;  %v357_v63 = vmax.f32 %v301_v58, 0.0 }
  0xf2   :  { %v846_v60 = vpop.f32.mrf.mxu0 }
  0xf3   :  { %v304_v61 = vadd.f32 %v845_v59, %v1200_v45 }
  0xf4   :  { %v847_v62 = vpop.f32.mrf.mxu0 }
  0xf5   :  { %v358_v0 = vmax.f32 %v304_v61, 0.0  ;;  %v848_v1 = vadd.f32 %v847_v62, %v846_v60 }
  0xf6   :  { %v849_v2 = vpop.f32.mrf.mxu0 }
  0xf7   :  { %v372_v3 = vpack.c.bf16 %v358_v0, %v357_v63  ;;  %v309_v6 = vadd.f32 %v848_v1, %v1200_v45 }
  0xf8   :  { %v850_v5 = vpop.f32.mrf.mxu0 }
  0xf9   :  { %v851_v7 = vadd.f32 %v850_v5, %v849_v2  ;;  %931 = vmatmul.mubr.bf16.vlgmr.msra.gmra.mxu1 %v372_v3  ;;  %v359_v12 = vmax.f32 %v309_v6, 0.0 }
  0xfa   :  { %v852_v8 = vpop.f32.mrf.mxu0  ;;  %947 = vmatpush3.bf16.msra.mxu1 %v1026_v40 }
  0xfb   :  { %v312_v9 = vadd.f32 %v851_v7, %v1200_v45  ;;  %948 = vmatprep.subr.bf16.mxu1 %v1027_v4  ;;  %v1031_v7 = vld [vmem:[%s1341_s5 + $0x10] sm:$0xff]  }
  0xfc   :  { %v853_v11 = vpop.f32.mrf.mxu0 }
  0xfd   :  { %v360_v13 = vmax.f32 %v312_v9, 0.0  ;;  %v854_v14 = vadd.f32 %v853_v11, %v852_v8  ;;  %v1032_v8 = vld [vmem:[%s1341_s5 + $0x8] sm:$0xff]   ;;  %v801_v11 = vld [vmem:[%s1343_s4] ss:$0 sm:$0xff] }
  0xfe   :  { %v855_v15 = vpop.f32.mrf.mxu0  ;;  %949 = vmatpush3.bf16.msra.mxu1 %v1027_v4 }
  0xff   :  { %v373_v16 = vpack.c.bf16 %v360_v13, %v359_v12  ;;  %950 = vmatprep.subr.bf16.mxu1 %v1028_v10  ;;  %v317_v19 = vadd.f32 %v854_v14, %v1200_v45 }
 0x100   :  { %v856_v18 = vpop.f32.mrf.mxu0 }
 0x101   :  { %v857_v20 = vadd.f32 %v856_v18, %v855_v15  ;;  %934 = vmatprep.mubr.bf16.mxu1 %v373_v16  ;;  %v361_v25 = vmax.f32 %v317_v19, 0.0 }
 0x102   :  { %v858_v21 = vpop.f32.mrf.mxu0  ;;  %951 = vmatpush3.bf16.msra.mxu1 %v1028_v10 }
 0x103   :  { %v320_v22 = vadd.f32 %v857_v20, %v1200_v45  ;;  %952 = vmatprep.subr.bf16.mxu1 %v1029_v17 }
 0x104   :  { %v859_v24 = vpop.f32.mrf.mxu0 }
 0x105   :  { %v362_v26 = vmax.f32 %v320_v22, 0.0  ;;  %v860_v27 = vadd.f32 %v859_v24, %v858_v21 }
 0x106   :  { %v861_v28 = vpop.f32.mrf.mxu0  ;;  %953 = vmatpush3.bf16.msra.mxu1 %v1029_v17 }
 0x107   :  { %v374_v29 = vpack.c.bf16 %v362_v26, %v361_v25  ;;  %954 = vmatprep.subr.bf16.mxu1 %v1030_v23  ;;  %v325_v31 = vadd.f32 %v860_v27, %v1200_v45 }
 0x108   :  { %v862_v30 = vpop.f32.mrf.mxu0 }
 0x109   :  { %v863_v32 = vadd.f32 %v862_v30, %v861_v28  ;;  %935 = vmatmul.mubr.bf16.gmra.mxu1 %v374_v29  ;;  %v363_v36 = vmax.f32 %v325_v31, 0.0 }
 0x10a   :  { %v864_v33 = vpop.f32.mrf.mxu0  ;;  %955 = vmatpush3.bf16.msra.mxu1 %v1030_v23 }
 0x10b   :  { %v328_v34 = vadd.f32 %v863_v32, %v1200_v45  ;;  %956 = vmatprep.subr.bf16.mxu1 %v1031_v7 }
 0x10c   :  { %v865_v35 = vpop.f32.mrf.mxu0 }
 0x10d   :  { %v364_v37 = vmax.f32 %v328_v34, 0.0  ;;  %v866_v38 = vadd.f32 %v865_v35, %v864_v33 }
 0x10e   :  { %v867_v39 = vpop.f32.mrf.mxu0  ;;  %957 = vmatpush3.bf16.msra.mxu1 %v1031_v7 }
 0x10f   :  { %v375_v40 = vpack.c.bf16 %v364_v37, %v363_v36  ;;  %v333_v42 = vadd.f32 %v866_v38, %v1200_v45  ;;  %958 = vmatprep.subr.bf16.mxu1 %v1032_v8 }
 0x110   :  { %v868_v41 = vpop.f32.mrf.mxu0 }
 0x111   :  { %v869_v43 = vadd.f32 %v868_v41, %v867_v39  ;;  %938 = vmatprep.mubr.bf16.mxu1 %v375_v40  ;;  %v365_v48 = vmax.f32 %v333_v42, 0.0 }
 0x112   :  { %v870_v44 = vpop.f32.mrf.mxu0  ;;  %959 = vmatpush3.bf16.msra.mxu1 %v1032_v8  ;;  %v590_v8 = vld [vmem:[%s1344_s6 + $0x18] sm:$0xff] }
 0x113   :  { %v336_v46 = vadd.f32 %v869_v43, %v1200_v45 }
 0x114   :  { %v871_v47 = vpop.f32.mrf.mxu0 }
 0x115   :  { %v366_v49 = vmax.f32 %v336_v46, 0.0  ;;  %v872_v50 = vadd.f32 %v871_v47, %v870_v44 }
 0x116   :  { %v873_v51 = vpop.f32.mrf.mxu0 }
 0x117   :  { %v376_v52 = vpack.c.bf16 %v366_v49, %v365_v48  ;;  %v341_v54 = vadd.f32 %v872_v50, %v1200_v45 }
 0x118   :  { %v874_v53 = vpop.f32.mrf.mxu0 }
 0x119   :  { %v875_v55 = vadd.f32 %v874_v53, %v873_v51  ;;  %939 = vmatmul.mubr.bf16.gmra.mxu1 %v376_v52  ;;  %v367_v59 = vmax.f32 %v341_v54, 0.0 }
 0x11a   :  { %v876_v56 = vpop.f32.mrf.mxu0 }
 0x11b   :  { %v344_v57 = vadd.f32 %v875_v55, %v1200_v45 }
 0x11c   :  { %v877_v58 = vpop.f32.mrf.mxu0 }
 0x11d   :  { %v368_v60 = vmax.f32 %v344_v57, 0.0  ;;  %v878_v61 = vadd.f32 %v877_v58, %v876_v56 }
 0x11e   :  { %v879_v62 = vpop.f32.mrf.mxu0 }
 0x11f   :  { %v377_v63 = vpack.c.bf16 %v368_v60, %v367_v59  ;;  %v349_v1 = vadd.f32 %v878_v61, %v1200_v45 }
 0x120   :  { %v880_v0 = vpop.f32.mrf.mxu0 }
 0x121   :  { %v881_v2 = vadd.f32 %v880_v0, %v879_v62  ;;  %942 = vmatprep.mubr.bf16.mxu1 %v377_v63  ;;  %v369_v4 = vmax.f32 %v349_v1, 0.0 }
 0x123   :  { %v352_v3 = vadd.f32 %v881_v2, %v1200_v45  ;;  %v1033_v45 = vld [vmem:[%s1341_s5] sm:$0xff]  }
 0x124   :  { %960 = vmatprep.subr.bf16.mxu1 %v1033_v45 }
 0x125   :  { %v370_v5 = vmax.f32 %v352_v3, 0.0  ;;  %961 = vmatpush3.bf16.msra.mxu1 %v1033_v45  ;;  %v589_v3 = vld [vmem:[%s1344_s6 + $0x10] sm:$0xff] }
 0x127   :  { %v378_v6 = vpack.c.bf16 %v370_v5, %v369_v4  ;;  %v587_v5 = vld [vmem:[%s1344_s6] sm:$0xff] }
 0x129   :  { %943 = vmatmul.mubr.bf16.gmra.mxu1 %v378_v6 }
 0x1b9   :  { %v932_v9 = vpop.f32.mrf.mxu1 }
 0x1ba   :  { %v493_v15 = vadd.f32 %v932_v9, %v801_v11 }
 0x1bb   :  { %v484_v10 = vpop.f32.mrf.mxu1 }
 0x1bc   :  { %v485_v13 = vadd.f32 %v801_v11, %v484_v10  ;;  %v549_v21 = vmax.f32 %v493_v15, 0.0  ;;  %v588_v10 = vld [vmem:[%s1344_s6 + $0x8] sm:$0xff] }
 0x1bd   :  { %v933_v12 = vpop.f32.mrf.mxu1 }
 0x1be   :  { %v496_v14 = vadd.f32 %v933_v12, %v801_v11  ;;  %v547_v19 = vmax.f32 %v485_v13, 0.0 }
 0x1bf   :  { %v487_v16 = vpop.f32.mrf.mxu1 }
 0x1c0   :  { %v488_v17 = vadd.f32 %v801_v11, %v487_v16  ;;  %v550_v18 = vmax.f32 %v496_v14, 0.0  ;;  %v593_v14 = vld [vmem:[%s1344_s6 + $0x30] sm:$0xff]  ;;  %v591_v16 = vld [vmem:[%s1344_s6 + $0x20] sm:$0xff] }
 0x1c2   :  { %v548_v20 = vmax.f32 %v488_v17, 0.0  ;;  %v564_v23 = vpack.c.bf16 %v550_v18, %v549_v21 }
 0x1c4   :  { %v563_v22 = vpack.c.bf16 %v548_v20, %v547_v19  ;;  %v594_v19 = vld [vmem:[%s1344_s6 + $0x38] sm:$0xff] }
 0x1c6   :  { %962 = vmatprep.mubr.bf16.mxu1 %v563_v22  ;;  %v592_v22 = vld [vmem:[%s1344_s6 + $0x28] sm:$0xff] }
 0x1c7   :  { %963 = vmatmul.mubr.bf16.vlgmr.msra.gmra.mxu1 %v564_v23 }
 0x1c9   :  { %v936_v24 = vpop.f32.mrf.mxu1 }
 0x1ca   :  { %v509_v29 = vadd.f32 %v936_v24, %v801_v11 }
 0x1cb   :  { %v500_v25 = vpop.f32.mrf.mxu1 }
 0x1cc   :  { %v501_v27 = vadd.f32 %v801_v11, %v500_v25  ;;  %v553_v35 = vmax.f32 %v509_v29, 0.0 }
 0x1cd   :  { %v937_v26 = vpop.f32.mrf.mxu1 }
 0x1ce   :  { %v512_v28 = vadd.f32 %v937_v26, %v801_v11  ;;  %v551_v33 = vmax.f32 %v501_v27, 0.0  ;;  %v597_v26 = vld [vmem:[%s1344_s6 + $0x50] sm:$0xff] }
 0x1cf   :  { %v503_v30 = vpop.f32.mrf.mxu1 }
 0x1d0   :  { %v504_v31 = vadd.f32 %v801_v11, %v503_v30  ;;  %v554_v32 = vmax.f32 %v512_v28, 0.0  ;;  %v595_v28 = vld [vmem:[%s1344_s6 + $0x40] sm:$0xff] }
 0x1d2   :  { %v552_v34 = vmax.f32 %v504_v31, 0.0  ;;  %v566_v37 = vpack.c.bf16 %v554_v32, %v553_v35  ;;  %v598_v31 = vld [vmem:[%s1344_s6 + $0x58] sm:$0xff] }
 0x1d4   :  { %v565_v36 = vpack.c.bf16 %v552_v34, %v551_v33  ;;  %v596_v34 = vld [vmem:[%s1344_s6 + $0x48] sm:$0xff] }
 0x1d6   :  { %966 = vmatprep.mubr.bf16.mxu1 %v565_v36 }
 0x1d7   :  { %967 = vmatmul.mubr.bf16.gmra.mxu1 %v566_v37 }
 0x1d9   :  { %v940_v38 = vpop.f32.mrf.mxu1 }
 0x1da   :  { %v525_v43 = vadd.f32 %v940_v38, %v801_v11  ;;  %v601_v38 = vld [vmem:[%s1344_s6 + $0x70] sm:$0xff] }
 0x1db   :  { %v516_v39 = vpop.f32.mrf.mxu1 }
 0x1dc   :  { %v517_v41 = vadd.f32 %v801_v11, %v516_v39  ;;  %v557_v50 = vmax.f32 %v525_v43, 0.0  ;;  %v602_v43 = vld [vmem:[%s1344_s6 + $0x78] sm:$0xff] }
 0x1dd   :  { %v941_v40 = vpop.f32.mrf.mxu1 }
 0x1de   :  { %v528_v42 = vadd.f32 %v941_v40, %v801_v11  ;;  %v555_v48 = vmax.f32 %v517_v41, 0.0  ;;  %v599_v40 = vld [vmem:[%s1344_s6 + $0x60] sm:$0xff] }
 0x1df   :  { %v519_v44 = vpop.f32.mrf.mxu1 }
 0x1e0   :  { %v520_v46 = vadd.f32 %v801_v11, %v519_v44  ;;  %v558_v47 = vmax.f32 %v528_v42, 0.0 }
 0x1e2   :  { %v556_v49 = vmax.f32 %v520_v46, 0.0  ;;  %v568_v52 = vpack.c.bf16 %v558_v47, %v557_v50  ;;  %v600_v47 = vld [vmem:[%s1344_s6 + $0x68] sm:$0xff] }
 0x1e4   :  { %v567_v51 = vpack.c.bf16 %v556_v49, %v555_v48 }
 0x1e6   :  { %970 = vmatprep.mubr.bf16.mxu1 %v567_v51 }
 0x1e7   :  { %971 = vmatmul.mubr.bf16.gmra.mxu1 %v568_v52 }
 0x1e9   :  { %v944_v53 = vpop.f32.mrf.mxu1 }
 0x1ea   :  { %v541_v58 = vadd.f32 %v944_v53, %v801_v11 }
 0x1eb   :  { %v532_v54 = vpop.f32.mrf.mxu1 }
 0x1ec   :  { %v533_v56 = vadd.f32 %v801_v11, %v532_v54  ;;  %v561_v0 = vmax.f32 %v541_v58, 0.0 }
 0x1ed   :  { %v945_v55 = vpop.f32.mrf.mxu1 }
 0x1ee   :  { %v544_v57 = vadd.f32 %v945_v55, %v801_v11  ;;  %v559_v62 = vmax.f32 %v533_v56, 0.0 }
 0x1ef   :  { %v535_v59 = vpop.f32.mrf.mxu1 }
 0x1f0   :  { %v536_v60 = vadd.f32 %v801_v11, %v535_v59  ;;  %v562_v61 = vmax.f32 %v544_v57, 0.0 }
 0x1f2   :  { %v560_v63 = vmax.f32 %v536_v60, 0.0  ;;  %v570_v2 = vpack.c.bf16 %v562_v61, %v561_v0 }
 0x1f4   :  { %v569_v1 = vpack.c.bf16 %v560_v63, %v559_v62 }
 0x1f6   :  { %974 = vmatprep.mubr.bf16.mxu1 %v569_v1 }
 0x1f7   :  { %975 = vmatmul.mubr.bf16.gmra.mxu1 %v570_v2 }
 0x287   :  { %v964_v4 = vpop.f32.mrf.mxu1 }
 0x288   :  { %v694_v6 = vadd.f32 %v964_v4, %v589_v3 }
 0x289   :  { %v685_v7 = vpop.f32.mrf.mxu1 }
 0x28a   :  { %750 = vst [vmem:[%s1345_s7 + $0x10] sm:$0xff] %v694_v6  ;;  %v686_v45 = vadd.f32 %v685_v7, %v587_v5 }
 0x28b   :  { %v965_v9 = vpop.f32.mrf.mxu1 }
 0x28c   :  { %748 = vst [vmem:[%s1345_s7] sm:$0xff] %v686_v45  ;;  %v697_v11 = vadd.f32 %v965_v9, %v590_v8 }
 0x28d   :  { %v688_v12 = vpop.f32.mrf.mxu1 }
 0x28e   :  { %751 = vst [vmem:[%s1345_s7 + $0x18] sm:$0xff] %v697_v11  ;;  %v689_v13 = vadd.f32 %v688_v12, %v588_v10 }
 0x290   :  { %749 = vst [vmem:[%s1345_s7 + $0x8] sm:$0xff] %v689_v13 }
 0x297   :  { %v968_v15 = vpop.f32.mrf.mxu1 }
 0x298   :  { %v710_v17 = vadd.f32 %v968_v15, %v593_v14 }
 0x299   :  { %v701_v18 = vpop.f32.mrf.mxu1 }
 0x29a   :  { %754 = vst [vmem:[%s1345_s7 + $0x30] sm:$0xff] %v710_v17  ;;  %v702_v20 = vadd.f32 %v701_v18, %v591_v16 }
 0x29b   :  { %v969_v21 = vpop.f32.mrf.mxu1 }
 0x29c   :  { %752 = vst [vmem:[%s1345_s7 + $0x20] sm:$0xff] %v702_v20  ;;  %v713_v23 = vadd.f32 %v969_v21, %v594_v19 }
 0x29d   :  { %v704_v24 = vpop.f32.mrf.mxu1 }
 0x29e   :  { %755 = vst [vmem:[%s1345_s7 + $0x38] sm:$0xff] %v713_v23  ;;  %v705_v25 = vadd.f32 %v704_v24, %v592_v22 }
 0x2a0   :  { %753 = vst [vmem:[%s1345_s7 + $0x28] sm:$0xff] %v705_v25 }
 0x2a7   :  { %v972_v27 = vpop.f32.mrf.mxu1 }
 0x2a8   :  { %v726_v29 = vadd.f32 %v972_v27, %v597_v26 }
 0x2a9   :  { %v717_v30 = vpop.f32.mrf.mxu1 }
 0x2aa   :  { %758 = vst [vmem:[%s1345_s7 + $0x50] sm:$0xff] %v726_v29  ;;  %v718_v32 = vadd.f32 %v717_v30, %v595_v28 }
 0x2ab   :  { %v973_v33 = vpop.f32.mrf.mxu1 }
 0x2ac   :  { %756 = vst [vmem:[%s1345_s7 + $0x40] sm:$0xff] %v718_v32  ;;  %v729_v35 = vadd.f32 %v973_v33, %v598_v31 }
 0x2ad   :  { %v720_v36 = vpop.f32.mrf.mxu1 }
 0x2ae   :  { %759 = vst [vmem:[%s1345_s7 + $0x58] sm:$0xff] %v729_v35  ;;  %v721_v37 = vadd.f32 %v720_v36, %v596_v34 }
 0x2b0   :  { %757 = vst [vmem:[%s1345_s7 + $0x48] sm:$0xff] %v721_v37 }
 0x2b7   :  { %v976_v39 = vpop.f32.mrf.mxu1 }
 0x2b8   :  { %v742_v41 = vadd.f32 %v976_v39, %v601_v38 }
 0x2b9   :  { %v733_v42 = vpop.f32.mrf.mxu1 }
 0x2ba   :  { %762 = vst [vmem:[%s1345_s7 + $0x70] sm:$0xff] %v742_v41  ;;  %v734_v44 = vadd.f32 %v733_v42, %v599_v40 }
 0x2bb   :  { %v977_v46 = vpop.f32.mrf.mxu1 }
 0x2bc   :  { %760 = vst [vmem:[%s1345_s7 + $0x60] sm:$0xff] %v734_v44  ;;  %v745_v48 = vadd.f32 %v977_v46, %v602_v43 }
 0x2bd   :  { %v736_v49 = vpop.f32.mrf.mxu1 }
 0x2be   :  { %763 = vst [vmem:[%s1345_s7 + $0x78] sm:$0xff] %v745_v48  ;;  %v737_v50 = vadd.f32 %v736_v49, %v600_v47 }
 0x2c0   :  { %761 = vst [vmem:[%s1345_s7 + $0x68] sm:$0xff] %v737_v50 }

</bundles_post_ra>
